<compile_context>
chip_gen: v7x
topology: tpu7x:2x2x1
jax: 0.10.0
libtpu: 0.0.40
codegen_flags: <defaults>
</compile_context>

<pallas_src>
import math

import jax
import jax.numpy as jnp
from jax.experimental import pallas as pl
from jax.experimental.pallas import tpu as pltpu


def _round_up(x: int, m: int) -> int:
    return (x + m - 1) // m * m


def _vmem_capacity_bytes() -> int:
    try:
        return int(pltpu.get_tpu_info().vmem_capacity_bytes)
    except Exception:
        # Unknown chip: assume the smallest (v7x, 64 MiB) so the limit is safe.
        return 64 * 1024 * 1024


def make_cheb_kernel(tm: int, a_resident: bool):
    """Builds the Pallas kernel body for row-tile size `tm`."""

    def kernel(theta_ref, a_ref, x_ref, w_ref, o_ref,
               t0_ref, t1_ref, t0b_ref, t1b_ref, h_ref):
        # theta_ref : SMEM (K+1,)               f32
        # a_ref     : VMEM (N_p,N_p)|(TM,N_p)   bf16  D^-1/2 A D^-1/2 (resident|streamed)
        # x_ref     : VMEM (TM, F_in_p)         f32   row block of features (k==0 only)
        # w_ref     : VMEM (F_in_p, F_out_p)    bf16  W.T (VMEM-resident)
        # o_ref     : VMEM (TM, F_out_p)        f32   row block of output (last k only)
        # t0_ref    : VMEM (N_p, F_in_p)        f32   T slot 0 (T_k for even k)
        # t1_ref    : VMEM (N_p, F_in_p)        f32   T slot 1 (T_k for odd k)
        # t0b_ref   : VMEM (N_p, F_in_p)        bf16  bf16 mirror of slot 0 (MXU RHS)
        # t1b_ref   : VMEM (N_p, F_in_p)        bf16  bf16 mirror of slot 1 (MXU RHS)
        # h_ref     : VMEM (N_p, F_in_p)        f32   h = sum_k theta_k * T_k
        k = pl.program_id(0)
        i = pl.program_id(1)
        n_k = pl.num_programs(0)
        r0 = pl.multiple_of(i * tm, tm)
        rows = pl.ds(r0, tm)

        @pl.when(k == 0)
        def _init():
            x_rows = x_ref[...]                              # f32 [TM, F_in_p]
            t0_ref[rows, :] = x_rows                         # T_0 = x
            t0b_ref[rows, :] = x_rows.astype(jnp.bfloat16)   # bf16 mirror of T_0
            t1_ref[rows, :] = jnp.zeros_like(x_rows)         # makes T_{k-2} term 0 at k=1
            h_ref[rows, :] = theta_ref[0] * x_rows           # h = theta_0 * T_0

        def step(cur_f32, cur_b16, prv_f32, prv_b16):
            # cur_* holds T_{k-2}[rows] and receives T_k[rows];
            # prv_* holds the full T_{k-1} (written by all row blocks at k-1).
            if a_resident:
                a_rows = a_ref[rows, :]                      # bf16 [TM, N_p]
            else:
                a_rows = a_ref[...]                          # bf16 [TM, N_p]
            t_prev_rows = prv_f32[rows, :]                   # f32 [TM, F_in_p]
            t_km2_rows = cur_f32[rows, :]                    # f32 [TM, F_in_p]
            # L(T_{k-1})[rows] = T_{k-1}[rows] - A[rows, :] @ T_{k-1}
            lap_rows = t_prev_rows - jnp.dot(
                a_rows, prv_b16[...], preferred_element_type=jnp.float32)
            coef = jnp.where(k == 1, 1.0, 2.0)               # T_1 = L(x); T_k = 2L(.) - .
            t_k_rows = coef * lap_rows - t_km2_rows
            cur_f32[rows, :] = t_k_rows
            cur_b16[rows, :] = t_k_rows.astype(jnp.bfloat16)
            h_ref[rows, :] = h_ref[rows, :] + theta_ref[k] * t_k_rows

        is_odd = (k % 2) == 1

        @pl.when(is_odd)                                     # k = 1, 3, 5, ...
        def _step_odd():
            step(t1_ref, t1b_ref, t0_ref, t0b_ref)

        @pl.when(jnp.logical_and(k > 0, jnp.logical_not(is_odd)))   # k = 2, 4, ...
        def _step_even():
            step(t0_ref, t0b_ref, t1_ref, t1b_ref)

        @pl.when(k == n_k - 1)
        def _finalize():
            y = jnp.dot(h_ref[rows, :].astype(jnp.bfloat16), w_ref[...],
                        preferred_element_type=jnp.float32)
            # F.leaky_relu, default negative_slope = 0.01
            o_ref[...] = jnp.where(y > 0.0, y, 0.01 * y).astype(o_ref.dtype)

    return kernel


def chebyshev_conv(a_norm, feat, theta, weight_t, k_order, *, tm=None,
                   a_resident=None):
    """a_norm: [N,N] f32 (D^-1/2 A D^-1/2), feat: [N,F_in] f32,
    theta: [K+1] f32, weight_t: [F_in,F_out] f32 (== W.T). Returns [N,F_out] f32."""
    n, f_in = feat.shape
    f_out = weight_t.shape[1]

    lane = 128
    f_in_p = _round_up(f_in, lane)
    f_out_p = _round_up(f_out, lane)
    n_128 = _round_up(max(n, lane), lane)

    vmem_budget = int(_vmem_capacity_bytes() * 0.85)   # leave headroom for the compiler

    def _fits(tm_c, n_p_c, resident):
        fixed = (16 * n_p_c * f_in_p              # T f32 x2 + bf16 mirrors x2 + h f32
                 + 2 * f_in_p * f_out_p * 2       # resident W (count 2 buffers)
                 + 2 * tm_c * f_in_p * 4          # x double buffer
                 + 2 * tm_c * f_out_p * 4)        # out double buffer
        a_bytes = (2 * n_p_c * n_p_c * 2) if resident else (2 * tm_c * n_p_c * 2)
        return fixed + a_bytes <= vmem_budget

    if tm is None:
        tm_res = n_128 if n_128 <= 1024 else 512
        if (a_resident is None or a_resident) and _fits(
                tm_res, _round_up(n_128, tm_res), True):
            a_resident, tm = True, tm_res
        else:
            a_resident = False
            cands = ([n_128] if n_128 <= 1024 else []) + \
                    [c for c in (1024, 768, 512, 256, 128) if c <= n_128]
            tm = cands[-1]
            for cand in cands:
                if _fits(cand, _round_up(n_128, cand), False):
                    tm = cand
                    break
            # TODO(synk): for graphs whose O(N*F_in) T/h scratch no longer fits in
            # VMEM, add a column-blocked A grid axis with T kept in HBM and manual
            # double-buffered make_async_copy.
    else:
        tm = max(lane, (tm // lane) * lane)
        if a_resident is None:
            a_resident = _fits(tm, _round_up(n_128, tm), True)

    n_p = _round_up(n_128, tm)
    nb = n_p // tm
    k_last = k_order

    # Zero-pad: padded nodes have empty adjacency rows/cols and zero features,
    # so they stay exactly zero through the recurrence and are sliced off.
    # TODO(synk): quantize A to fp8 (v7x) / int8 (v5e,v6e) to halve the dominant
    # streamed N^2 HBM term; needs an accuracy study, so A stays bf16 here.
    a_p = jnp.zeros((n_p, n_p), jnp.bfloat16).at[:n, :n].set(
        a_norm.astype(jnp.bfloat16))
    x_p = jnp.zeros((n_p, f_in_p), jnp.float32).at[:n, :f_in].set(
        feat.astype(jnp.float32))
    w_p = jnp.zeros((f_in_p, f_out_p), jnp.bfloat16).at[:f_in, :f_out].set(
        weight_t.astype(jnp.bfloat16))
    th = theta.astype(jnp.float32)

    grid = (k_order + 1, nb)
    x_last_blk = nb - 1

    if a_resident:
        # Fetched once (constant index map) and kept VMEM-resident across the grid.
        a_spec = pl.BlockSpec((n_p, n_p), lambda k, i: (0, 0))
    else:
        # Streamed row tiles; collapsed at k==0 where A is not used.
        a_spec = pl.BlockSpec((tm, n_p), lambda k, i: (jnp.where(k == 0, 0, i), 0))

    a_passes = 1 if a_resident else max(k_order, 1)
    flops = (2 * k_order * n_p * n_p * f_in_p
             + 2 * n_p * f_in_p * f_out_p)
    bytes_accessed = (a_passes * n_p * n_p * 2 + n_p * f_in_p * 4
                      + f_in_p * f_out_p * 2 + n_p * f_out_p * 4)

    out = pl.pallas_call(
        make_cheb_kernel(tm, a_resident),
        out_shape=jax.ShapeDtypeStruct((n_p, f_out_p), jnp.float32),
        grid=grid,
        in_specs=[
            pl.BlockSpec(memory_space=pltpu.SMEM),                  # theta scalars
            a_spec,                                                 # A (resident | streamed)
            # Features are only consumed at k == 0; collapse the map afterwards
            # so no re-streaming DMA is issued for k > 0.
            pl.BlockSpec((tm, f_in_p),
                         lambda k, i: (jnp.where(k == 0, i, x_last_blk), 0)),
            pl.BlockSpec((f_in_p, f_out_p), lambda k, i: (0, 0)),   # W.T (resident)
        ],
        # Output blocks only advance on the final k, so nothing is written back
        # to HBM before the last Chebyshev order (no garbage write-backs).
        out_specs=pl.BlockSpec((tm, f_out_p),
                               lambda k, i: (jnp.where(k == k_last, i, 0), 0)),
        scratch_shapes=[
            pltpu.VMEM((n_p, f_in_p), jnp.float32),    # T slot 0 (f32 recurrence state)
            pltpu.VMEM((n_p, f_in_p), jnp.float32),    # T slot 1
            pltpu.VMEM((n_p, f_in_p), jnp.bfloat16),   # bf16 mirror of slot 0 (MXU RHS)
            pltpu.VMEM((n_p, f_in_p), jnp.bfloat16),   # bf16 mirror of slot 1
            pltpu.VMEM((n_p, f_in_p), jnp.float32),    # h accumulator
        ],
        compiler_params=pltpu.CompilerParams(
            # k must stay sequential (3-term recurrence). The row axis is also
            # "arbitrary": every row block at step k reads the full T_{k-1}
            # written by all row blocks at step k-1 through shared VMEM scratch.
            # TODO(synk): a v7x dual-core split of the row axis needs an explicit
            # cross-core exchange of T_k (core_map + CMEM/RDMA + barrier).
            dimension_semantics=("arbitrary", "arbitrary"),
            vmem_limit_bytes=vmem_budget,
        ),
        cost_estimate=pl.CostEstimate(
            flops=flops, transcendentals=0, bytes_accessed=bytes_accessed),
    )(th, a_p, x_p, w_p)

    return out[:n, :f_out]


def chebyshev_conv_ref(a_norm, feat, theta, weight_t, k_order):
    """Pure-JAX reference mirroring the PyTorch forward and the kernel's mixed
    precision (bf16 matmul operands, f32 recurrence / h accumulation)."""
    a16 = a_norm.astype(jnp.bfloat16)

    def lap(v):
        return v - jnp.dot(a16, v.astype(jnp.bfloat16),
                           preferred_element_type=jnp.float32)

    h = theta[0] * feat
    t_km2 = feat                      # T_0
    t_km1 = None
    for k in range(1, k_order + 1):
        if k == 1:
            t_k = lap(feat)           # T_1
        else:
            t_k = 2.0 * lap(t_km1) - t_km2
            t_km2 = t_km1
        t_km1 = t_k
        h = h + theta[k] * t_k
    y = jnp.dot(h.astype(jnp.bfloat16), weight_t.astype(jnp.bfloat16),
                preferred_element_type=jnp.float32)
    return jnp.where(y > 0.0, y, 0.01 * y)


if __name__ == "__main__":
    N, F_IN, F_OUT, K = 384, 48, 80, 3

    key = jax.random.PRNGKey(0)
    k_adj, k_feat, k_theta, k_w = jax.random.split(key, 4)

    # --- synthetic undirected graph (dense adjacency, zero diagonal) ---
    upper = jax.random.bernoulli(k_adj, p=0.05, shape=(N, N)).astype(jnp.float32)
    upper = jnp.triu(upper, k=1)
    adj = upper + upper.T

    # D_invsqrt = in_degrees.clamp(min=1) ** -0.5  (DGL update_all == A @ h)
    in_deg = jnp.sum(adj, axis=1)
    d_invsqrt = jnp.power(jnp.clip(in_deg, 1.0, None), -0.5)
    a_norm = (d_invsqrt[:, None] * adj) * d_invsqrt[None, :]

    # --- parameters (mirrors reset_parameters shapes) ---
    feat = jax.random.normal(k_feat, (N, F_IN), dtype=jnp.float32)
    theta = 0.1 * jax.random.normal(k_theta, (K + 1,), dtype=jnp.float32)
    bound = math.sqrt(6.0 / (F_IN + F_OUT))     # xavier_uniform_ on [out, in]
    w = jax.random.uniform(k_w, (F_OUT, F_IN), minval=-bound, maxval=bound,
                           dtype=jnp.float32)
    w_t = w.T                                    # [F_IN, F_OUT] so kernel does h @ W.T

    ref = chebyshev_conv_ref(a_norm, feat, theta, w_t, K)

    # Path 1: auto tiling -> VMEM-resident A, tm = n_p, grid (K+1, 1).
    out_res = jax.block_until_ready(chebyshev_conv(a_norm, feat, theta, w_t, K))
    # Path 2: forced streamed-A row tiles (grid (K+1, 3)); exercises the
    # multi-row-block recurrence through the shared bf16/f32 VMEM scratch.
    out_str = jax.block_until_ready(
        chebyshev_conv(a_norm, feat, theta, w_t, K, tm=128, a_resident=False))

    for out in (out_res, out_str):
        assert out.shape == (N, F_OUT)
        assert jnp.allclose(out, ref, atol=1e-2, rtol=1e-2), (
            float(jnp.max(jnp.abs(out - ref))))

    print("KERNEL_OK")
</pallas_src>

<mosaic_0001>
module attributes {stable_mosaic.version = 11 : i64} {
  func.func @kernel(%arg0: i32, %arg1: i32, %arg2: memref<4xf32, #tpu.memory_space<smem>>, %arg3: memref<384x384xbf16, #tpu.memory_space<vmem>>, %arg4: memref<384x128xf32, #tpu.memory_space<vmem>>, %arg5: memref<128x128xbf16, #tpu.memory_space<vmem>>, %arg6: memref<384x128xf32, #tpu.memory_space<vmem>>, %arg7: memref<384x128xf32, #tpu.memory_space<vmem>>, %arg8: memref<384x128xf32, #tpu.memory_space<vmem>>, %arg9: memref<384x128xbf16, #tpu.memory_space<vmem>>, %arg10: memref<384x128xbf16, #tpu.memory_space<vmem>>, %arg11: memref<384x128xf32, #tpu.memory_space<vmem>>) attributes {dimension_semantics = [#tpu.dimension_semantics<arbitrary>, #tpu.dimension_semantics<arbitrary>], iteration_bounds = array<i64: 4, 1>, scalar_prefetch = 0 : i64, scratch_operands = 5 : i64, tpu.core_type = #tpu.core_type<tc>, window_params = [{transform_indices = @transform_0, window_bounds = array<i64: 4>}, {pipeline_mode = #tpu.pipeline_mode<synchronous>, transform_indices = @transform_1, window_bounds = array<i64: 384, 384>}, {transform_indices = @transform_2, window_bounds = array<i64: 384, 128>}, {pipeline_mode = #tpu.pipeline_mode<synchronous>, transform_indices = @transform_3, window_bounds = array<i64: 128, 128>}, {transform_indices = @transform_4, window_bounds = array<i64: 384, 128>}]} {
    %c384_i32 = arith.constant 384 : i32
    %0 = arith.muli %arg1, %c384_i32 : i32
    %1 = tpu.assume_multiple %0, 384 : i32
    %c0_i32 = arith.constant 0 : i32
    %2 = arith.cmpi eq, %arg0, %c0_i32 : i32
    %3 = arith.extui %2 : i1 to i32
    %c0_i32_0 = arith.constant 0 : i32
    %4 = arith.cmpi ne, %3, %c0_i32_0 : i32
    scf.if %4 {
      %c0 = arith.constant 0 : index
      %c0_10 = arith.constant 0 : index
      %26 = vector.load %arg4[%c0, %c0_10] : memref<384x128xf32, #tpu.memory_space<vmem>>, vector<384x128xf32>
      %27 = arith.index_cast %1 : i32 to index
      %c0_11 = arith.constant 0 : index
      %28 = vector.load %arg7[%27, %c0_11] : memref<384x128xf32, #tpu.memory_space<vmem>>, vector<384x128xf32>
      tpu.vector_store %arg7[%27, %c0_11], %26 {strides = array<i32>} : memref<384x128xf32, #tpu.memory_space<vmem>>, vector<384x128xf32>,
      %29 = arith.truncf %26 : vector<384x128xf32> to vector<384x128xbf16>
      %30 = arith.index_cast %1 : i32 to index
      %c0_12 = arith.constant 0 : index
      %31 = vector.load %arg9[%30, %c0_12] : memref<384x128xbf16, #tpu.memory_space<vmem>>, vector<384x128xbf16>
      tpu.vector_store %arg9[%30, %c0_12], %29 {strides = array<i32>} : memref<384x128xbf16, #tpu.memory_space<vmem>>, vector<384x128xbf16>,
      %cst = arith.constant 0.000000e+00 : f32
      %32 = vector.broadcast %cst : f32 to vector<384x128xf32>
      %33 = arith.index_cast %1 : i32 to index
      %c0_13 = arith.constant 0 : index
      %34 = vector.load %arg8[%33, %c0_13] : memref<384x128xf32, #tpu.memory_space<vmem>>, vector<384x128xf32>
      tpu.vector_store %arg8[%33, %c0_13], %32 {strides = array<i32>} : memref<384x128xf32, #tpu.memory_space<vmem>>, vector<384x128xf32>,
      %c0_14 = arith.constant 0 : index
      %35 = memref.load %arg2[%c0_14] : memref<4xf32, #tpu.memory_space<smem>>
      %36 = vector.broadcast %35 : f32 to vector<384x128xf32>
      %37 = arith.mulf %36, %26 : vector<384x128xf32>
      %38 = arith.index_cast %1 : i32 to index
      %c0_15 = arith.constant 0 : index
      %39 = vector.load %arg11[%38, %c0_15] : memref<384x128xf32, #tpu.memory_space<vmem>>, vector<384x128xf32>
      tpu.vector_store %arg11[%38, %c0_15], %37 {strides = array<i32>} : memref<384x128xf32, #tpu.memory_space<vmem>>, vector<384x128xf32>,
    } else {
    }
    %c2_i32 = arith.constant 2 : i32
    %c0_i32_1 = arith.constant 0 : i32
    %5 = arith.cmpi eq, %c2_i32, %c0_i32_1 : i32
    %c1_i32 = arith.constant 1 : i32
    %6 = arith.select %5, %c1_i32, %c2_i32 : i32
    %7 = arith.remsi %arg0, %6 : i32
    %c0_i32_2 = arith.constant 0 : i32
    %8 = arith.cmpi ne, %7, %c0_i32_2 : i32
    %c0_i32_3 = arith.constant 0 : i32
    %9 = arith.cmpi slt, %7, %c0_i32_3 : i32
    %c0_i32_4 = arith.constant 0 : i32
    %10 = arith.cmpi slt, %6, %c0_i32_4 : i32
    %11 = arith.xori %9, %10 : i1
    %12 = arith.andi %11, %8 : i1
    %13 = arith.addi %7, %6 : i32
    %14 = arith.select %12, %13, %7 : i32
    %c1_i32_5 = arith.constant 1 : i32
    %15 = arith.cmpi eq, %14, %c1_i32_5 : i32
    %16 = arith.extui %15 : i1 to i32
    %c0_i32_6 = arith.constant 0 : i32
    %17 = arith.cmpi ne, %16, %c0_i32_6 : i32
    scf.if %17 {
      %26 = arith.index_cast %1 : i32 to index
      %c0 = arith.constant 0 : index
      %27 = vector.load %arg3[%26, %c0] : memref<384x384xbf16, #tpu.memory_space<vmem>>, vector<384x384xbf16>
      %28 = arith.index_cast %1 : i32 to index
      %c0_10 = arith.constant 0 : index
      %29 = vector.load %arg7[%28, %c0_10] : memref<384x128xf32, #tpu.memory_space<vmem>>, vector<384x128xf32>
      %30 = arith.index_cast %1 : i32 to index
      %c0_11 = arith.constant 0 : index
      %31 = vector.load %arg8[%30, %c0_11] : memref<384x128xf32, #tpu.memory_space<vmem>>, vector<384x128xf32>
      %c0_12 = arith.constant 0 : index
      %c0_13 = arith.constant 0 : index
      %32 = vector.load %arg9[%c0_12, %c0_13] : memref<384x128xbf16, #tpu.memory_space<vmem>>, vector<384x128xbf16>
      %cst = arith.constant dense<0.000000e+00> : vector<384x128xf32>
      %33 = tpu.matmul %27, %32, %cst {dimension_numbers = #tpu.dot_dimension_numbers<[1], [0], [0], [1], [0, 0, 1, 1], [], []>} : vector<384x384xbf16>, vector<384x128xbf16>, vector<384x128xf32> -> vector<384x128xf32>
      %34 = arith.subf %29, %33 : vector<384x128xf32>
      %c1_i32_14 = arith.constant 1 : i32
      %35 = arith.cmpi eq, %arg0, %c1_i32_14 : i32
      %cst_15 = arith.constant 1.000000e+00 : f32
      %cst_16 = arith.constant 2.000000e+00 : f32
      %36 = arith.select %35, %cst_15, %cst_16 : f32
      %37 = vector.broadcast %36 : f32 to vector<384x128xf32>
      %38 = arith.mulf %37, %34 : vector<384x128xf32>
      %39 = arith.subf %38, %31 : vector<384x128xf32>
      %40 = arith.index_cast %1 : i32 to index
      %c0_17 = arith.constant 0 : index
      %41 = vector.load %arg8[%40, %c0_17] : memref<384x128xf32, #tpu.memory_space<vmem>>, vector<384x128xf32>
      tpu.vector_store %arg8[%40, %c0_17], %39 {strides = array<i32>} : memref<384x128xf32, #tpu.memory_space<vmem>>, vector<384x128xf32>,
      %42 = arith.truncf %39 : vector<384x128xf32> to vector<384x128xbf16>
      %43 = arith.index_cast %1 : i32 to index
      %c0_18 = arith.constant 0 : index
      %44 = vector.load %arg10[%43, %c0_18] : memref<384x128xbf16, #tpu.memory_space<vmem>>, vector<384x128xbf16>
      tpu.vector_store %arg10[%43, %c0_18], %42 {strides = array<i32>} : memref<384x128xbf16, #tpu.memory_space<vmem>>, vector<384x128xbf16>,
      %45 = arith.index_cast %1 : i32 to index
      %c0_19 = arith.constant 0 : index
      %46 = vector.load %arg11[%45, %c0_19] : memref<384x128xf32, #tpu.memory_space<vmem>>, vector<384x128xf32>
      %47 = arith.index_cast %arg0 : i32 to index
      %48 = memref.load %arg2[%47] : memref<4xf32, #tpu.memory_space<smem>>
      %49 = vector.broadcast %48 : f32 to vector<384x128xf32>
      %50 = arith.mulf %49, %39 : vector<384x128xf32>
      %51 = arith.addf %46, %50 : vector<384x128xf32>
      %52 = arith.index_cast %1 : i32 to index
      %c0_20 = arith.constant 0 : index
      %53 = vector.load %arg11[%52, %c0_20] : memref<384x128xf32, #tpu.memory_space<vmem>>, vector<384x128xf32>
      tpu.vector_store %arg11[%52, %c0_20], %51 {strides = array<i32>} : memref<384x128xf32, #tpu.memory_space<vmem>>, vector<384x128xf32>,
    } else {
    }
    %c0_i32_7 = arith.constant 0 : i32
    %18 = arith.cmpi sgt, %arg0, %c0_i32_7 : i32
    %true = arith.constant true
    %19 = arith.xori %15, %true : i1
    %20 = arith.andi %18, %19 : i1
    %21 = arith.extui %20 : i1 to i32
    %c0_i32_8 = arith.constant 0 : i32
    %22 = arith.cmpi ne, %21, %c0_i32_8 : i32
    scf.if %22 {
      %26 = arith.index_cast %1 : i32 to index
      %c0 = arith.constant 0 : index
      %27 = vector.load %arg3[%26, %c0] : memref<384x384xbf16, #tpu.memory_space<vmem>>, vector<384x384xbf16>
      %28 = arith.index_cast %1 : i32 to index
      %c0_10 = arith.constant 0 : index
      %29 = vector.load %arg8[%28, %c0_10] : memref<384x128xf32, #tpu.memory_space<vmem>>, vector<384x128xf32>
      %30 = arith.index_cast %1 : i32 to index
      %c0_11 = arith.constant 0 : index
      %31 = vector.load %arg7[%30, %c0_11] : memref<384x128xf32, #tpu.memory_space<vmem>>, vector<384x128xf32>
      %c0_12 = arith.constant 0 : index
      %c0_13 = arith.constant 0 : index
      %32 = vector.load %arg10[%c0_12, %c0_13] : memref<384x128xbf16, #tpu.memory_space<vmem>>, vector<384x128xbf16>
      %cst = arith.constant dense<0.000000e+00> : vector<384x128xf32>
      %33 = tpu.matmul %27, %32, %cst {dimension_numbers = #tpu.dot_dimension_numbers<[1], [0], [0], [1], [0, 0, 1, 1], [], []>} : vector<384x384xbf16>, vector<384x128xbf16>, vector<384x128xf32> -> vector<384x128xf32>
      %34 = arith.subf %29, %33 : vector<384x128xf32>
      %c1_i32_14 = arith.constant 1 : i32
      %35 = arith.cmpi eq, %arg0, %c1_i32_14 : i32
      %cst_15 = arith.constant 1.000000e+00 : f32
      %cst_16 = arith.constant 2.000000e+00 : f32
      %36 = arith.select %35, %cst_15, %cst_16 : f32
      %37 = vector.broadcast %36 : f32 to vector<384x128xf32>
      %38 = arith.mulf %37, %34 : vector<384x128xf32>
      %39 = arith.subf %38, %31 : vector<384x128xf32>
      %40 = arith.index_cast %1 : i32 to index
      %c0_17 = arith.constant 0 : index
      %41 = vector.load %arg7[%40, %c0_17] : memref<384x128xf32, #tpu.memory_space<vmem>>, vector<384x128xf32>
      tpu.vector_store %arg7[%40, %c0_17], %39 {strides = array<i32>} : memref<384x128xf32, #tpu.memory_space<vmem>>, vector<384x128xf32>,
      %42 = arith.truncf %39 : vector<384x128xf32> to vector<384x128xbf16>
      %43 = arith.index_cast %1 : i32 to index
      %c0_18 = arith.constant 0 : index
      %44 = vector.load %arg9[%43, %c0_18] : memref<384x128xbf16, #tpu.memory_space<vmem>>, vector<384x128xbf16>
      tpu.vector_store %arg9[%43, %c0_18], %42 {strides = array<i32>} : memref<384x128xbf16, #tpu.memory_space<vmem>>, vector<384x128xbf16>,
      %45 = arith.index_cast %1 : i32 to index
      %c0_19 = arith.constant 0 : index
      %46 = vector.load %arg11[%45, %c0_19] : memref<384x128xf32, #tpu.memory_space<vmem>>, vector<384x128xf32>
      %47 = arith.index_cast %arg0 : i32 to index
      %48 = memref.load %arg2[%47] : memref<4xf32, #tpu.memory_space<smem>>
      %49 = vector.broadcast %48 : f32 to vector<384x128xf32>
      %50 = arith.mulf %49, %39 : vector<384x128xf32>
      %51 = arith.addf %46, %50 : vector<384x128xf32>
      %52 = arith.index_cast %1 : i32 to index
      %c0_20 = arith.constant 0 : index
      %53 = vector.load %arg11[%52, %c0_20] : memref<384x128xf32, #tpu.memory_space<vmem>>, vector<384x128xf32>
      tpu.vector_store %arg11[%52, %c0_20], %51 {strides = array<i32>} : memref<384x128xf32, #tpu.memory_space<vmem>>, vector<384x128xf32>,
    } else {
    }
    %c3_i32 = arith.constant 3 : i32
    %23 = arith.cmpi eq, %arg0, %c3_i32 : i32
    %24 = arith.extui %23 : i1 to i32
    %c0_i32_9 = arith.constant 0 : i32
    %25 = arith.cmpi ne, %24, %c0_i32_9 : i32
    scf.if %25 {
      %26 = arith.index_cast %1 : i32 to index
      %c0 = arith.constant 0 : index
      %27 = vector.load %arg11[%26, %c0] : memref<384x128xf32, #tpu.memory_space<vmem>>, vector<384x128xf32>
      %28 = arith.truncf %27 : vector<384x128xf32> to vector<384x128xbf16>
      %c0_10 = arith.constant 0 : index
      %c0_11 = arith.constant 0 : index
      %29 = vector.load %arg5[%c0_10, %c0_11] : memref<128x128xbf16, #tpu.memory_space<vmem>>, vector<128x128xbf16>
      %cst = arith.constant dense<0.000000e+00> : vector<384x128xf32>
      %30 = tpu.matmul %28, %29, %cst {dimension_numbers = #tpu.dot_dimension_numbers<[1], [0], [0], [1], [0, 0, 1, 1], [], []>} : vector<384x128xbf16>, vector<128x128xbf16>, vector<384x128xf32> -> vector<384x128xf32>
      %cst_12 = arith.constant 0.000000e+00 : f32
      %31 = vector.broadcast %cst_12 : f32 to vector<384x128xf32>
      %32 = arith.cmpf ogt, %30, %31 : vector<384x128xf32>
      %cst_13 = arith.constant 0.00999999977 : f32
      %33 = vector.broadcast %cst_13 : f32 to vector<384x128xf32>
      %34 = arith.mulf %33, %30 : vector<384x128xf32>
      %35 = arith.select %32, %30, %34 : vector<384x128xi1>, vector<384x128xf32>
      %c0_14 = arith.constant 0 : index
      %c0_15 = arith.constant 0 : index
      %36 = vector.load %arg6[%c0_14, %c0_15] : memref<384x128xf32, #tpu.memory_space<vmem>>, vector<384x128xf32>
      tpu.vector_store %arg6[%c0_14, %c0_15], %35 {strides = array<i32>} : memref<384x128xf32, #tpu.memory_space<vmem>>, vector<384x128xf32>,
    } else {
    }
    return
  }
  func.func @transform_0(%arg0: i32, %arg1: i32) -> i32 {
    %c0_i32 = arith.constant 0 : i32
    %c0_i32_0 = arith.constant 0 : i32
    return %c0_i32 : i32
  }
  func.func @transform_1(%arg0: i32, %arg1: i32) -> (i32, i32) {
    %c0_i32 = arith.constant 0 : i32
    %c0_i32_0 = arith.constant 0 : i32
    %c0_i32_1 = arith.constant 0 : i32
    return %c0_i32, %c0_i32_0 : i32, i32
  }
  func.func @transform_2(%arg0: i32, %arg1: i32) -> (i32, i32) {
    %c0_i32 = arith.constant 0 : i32
    %0 = arith.cmpi eq, %arg0, %c0_i32 : i32
    %c0_i32_0 = arith.constant 0 : i32
    %1 = arith.select %0, %arg1, %c0_i32_0 : i32
    %c0_i32_1 = arith.constant 0 : i32
    %c0_i32_2 = arith.constant 0 : i32
    return %1, %c0_i32_1 : i32, i32
  }
  func.func @transform_3(%arg0: i32, %arg1: i32) -> (i32, i32) {
    %c0_i32 = arith.constant 0 : i32
    %c0_i32_0 = arith.constant 0 : i32
    %c0_i32_1 = arith.constant 0 : i32
    return %c0_i32, %c0_i32_0 : i32, i32
  }
  func.func @transform_4(%arg0: i32, %arg1: i32) -> (i32, i32) {
    %c3_i32 = arith.constant 3 : i32
    %0 = arith.cmpi eq, %arg0, %c3_i32 : i32
    %c0_i32 = arith.constant 0 : i32
    %1 = arith.select %0, %arg1, %c0_i32 : i32
    %c0_i32_0 = arith.constant 0 : i32
    %c0_i32_1 = arith.constant 0 : i32
    return %1, %c0_i32_0 : i32, i32
  }
}

</mosaic_0001>

<bundles_post_ra>
// kernel: tpu_custom_call.1
= control target key start
LH: loop header
LB: loop body
LE: loop exit
PB: predicated region body
PF: predicated region fallthrough
CT: control target
= control target key end

     0   :  { %9 = vsyncpa [#allocation10], 0  ;;  %s6354_s0 = inlined_call_operand.hbm [shape: f32[4], index: 0, kind: input, shape index: {}]   ;;  %s6355_s1 = inlined_call_operand.hbm [shape: bf16[384,384], index: 1, kind: input, shape index: {}]   ;;  %s6356_s2 = inlined_call_operand.hbm [shape: f32[384,128], index: 2, kind: input, shape index: {}]   ;;  %s6357_s3 = inlined_call_operand.hbm [shape: bf16[128,128], index: 3, kind: input, shape index: {}]   ;;  %s6358_s4 = inlined_call_operand.hbm [shape: f32[384,128], index: 4, kind: output, shape index: {}]  }
   0x1   :  { %10 = vsyncpa [#allocation8], 0 }
   0x2   :  { %11 = vsyncpa [#allocation13], 0 }
   0x3   :  { %13 = vsyncpa [#allocation13 + $0x1], 0 }
   0x4   :  { %14 = vsyncpa [#allocation9], 0 }
   0x5   :  { %16 = vsyncpa [#allocation9 + $0x1], 0  ;;  %s5367_s15 = smov 0   ;;  %s5369_s16 = smov 0  }
   0x6   :  { %s5371_s17 = smov 0  }
   0x7 LB: > { %s5326_s18 = smov [#allocation14]   ;;  %s5383_s20 = sadd.s32 4294967295, %s5324_s17   ;;  %s5324_s17 = sphi %s5371_s17, %s22_s17   ;;  %s5320_s16 = sphi %s5369_s16, %s6376_s16   ;;  %s5316_s15 = sphi %s5367_s15, %s6375_s15  }
   0x8   : > { %s196_s19 = sshll.u32 %s5326_s18, 4  ;;  %s4327_s21 = sadd.s32 4294967294, %s5324_s17   ;;  %s197_s19 = int_to_ptr.vmem [resolvable:$true] %s196_s19 }
   0x9   : > { %p4328_p0 = scmp.ge.s32.totalorder %s5324_s17, 1  ;;  %p162_p1 = scmp.lt.s32.totalorder %s5324_s17, 5 }
   0xa   : > { %p6359_p2 = scmp.eq.s32.totalorder %s5383_s20, 0  ;;  %s34_s24 = sadd.s32 1, %s5320_s16 }
   0xb   : > { %p5389_p3 = pnand %p4328_p0, %p162_p1  ;;  %s5159_s27 = scalar_lea.hbm %s6357_s3, 1024 }
   0xc   : > { %p5160_p6 = scmp.ne.s32.totalorder %s6357_s3, %s5159_s27  ;;  %p5166_p10 = scmp.lt.u32.totalorder %s5159_s27, %s6357_s3 }
   0xd   : > { %s6361_s22 = scalar_select %p5389_p3, 1, 0 }
   0xe   : > { %p4889_p4 = pneg %p5389_p3 }
  0x10   : > { %p5397_p5 = pnand %p6359_p2, %p4889_p4 }
  0x12   : > { %p5410_p7 = pneg %p5397_p5 }
  0x14   : > { %p5162_p8 = pnand %p5410_p7, %p5160_p6 }
  0x16   : > { %p5163_p9 = pneg %p5162_p8 }
  0x18   : > { %p5168_p11 = pnand %p5166_p10, %p5163_p9 }
  0x1a   : > { %5171 = shalt.err (!%p5168_p11)
}
  0x1b   : > { %s5172_s7 = scalar_lea.vmem %s197_s19, 1024  ;;  %p5180_p1 = scmp.lt.s32.totalorder %s197_s19, %s197_s19 }
  0x1c   : > { %p5173_p12 = scmp.ne.s32.totalorder %s197_s19, %s5172_s7  ;;  %p5181_p4 = scmp.lt.s32.totalorder %s5172_s7, %s5172_s7 }
  0x1e   : > { %p5175_p13 = pnand %p5173_p12, %p5410_p7  ;;  %p5182_p2 = por %p5181_p4, %p5180_p1 }
  0x20   : > { %p5176_p0 = pneg %p5175_p13 }
  0x22   : > { %p5183_p3 = pnand %p5182_p2, %p5176_p0 }
  0x24   : > { %5186 = shalt.err (!%p5183_p3)
}
  0x25   : > { %s5327_s8 = smov 64   ;;  %s5328_s9 = smov 4  }
  0x26   : > { %4898 = dma.hbm_to_vmem [thread:$0]  (!%p5397_p5), %s6357_s3, 1024, %s197_s19, [#allocation13], %s5327_s8, %s5327_s8, %s5328_s9  }
  0x27   : > { %p36_p6 = scmp.ge.s32.totalorder %s34_s24, 4  ;;  %s5187_s14 = scalar_lea.hbm %s6354_s0, 16 }
  0x28   : > { %p5188_p2 = scmp.ne.s32.totalorder %s6354_s0, %s5187_s14  ;;  %p5194_p9 = scmp.lt.u32.totalorder %s5187_s14, %s6354_s0 }
  0x2a   : > { %p5190_p3 = pnand %p5188_p2, %p5410_p7 }
  0x2c   : > { %p5191_p8 = pneg %p5190_p3 }
  0x2e   : > { %p5196_p10 = pnand %p5194_p9, %p5191_p8 }
  0x30   : > { %5199 = shalt.err (!%p5196_p10)
}
  0x31   : > { %s5329_s19 = smov [#allocation7]   ;;  %s6378_s24 = smov (%p36_p6, %s34_s24), 0 }
  0x32   : > { %4892 = dma.hbm_to_smem (!%p5397_p5), %s6354_s0, 16, %s5329_s19, [#allocation10]  }
  0x33   : > { %s5330_s5 = smov [#allocation11]   ;;  %s5200_s9 = scalar_lea.hbm %s6355_s1, 9216 }
  0x34   : > { %s183_s6 = sshll.u32 %s5330_s5, 4  ;;  %p5201_p12 = scmp.ne.s32.totalorder %s6355_s1, %s5200_s9  ;;  %s184_s6 = int_to_ptr.vmem [resolvable:$true] %s183_s6 }
  0x35   : > { %p5207_p1 = scmp.lt.u32.totalorder %s5200_s9, %s6355_s1 }
  0x36   : > { %p5203_p13 = pnand %p5201_p12, %p5410_p7 }
  0x38   : > { %p5204_p0 = pneg %p5203_p13 }
  0x3a   : > { %p5209_p4 = pnand %p5207_p1, %p5204_p0 }
  0x3c   : > { %5212 = shalt.err (!%p5209_p4)
}
  0x3d   : > { %s5213_s14 = scalar_lea.vmem %s184_s6, 9216  ;;  %p5221_p8 = scmp.lt.s32.totalorder %s184_s6, %s184_s6 }
  0x3e   : > { %p5214_p6 = scmp.ne.s32.totalorder %s184_s6, %s5213_s14  ;;  %p5222_p9 = scmp.lt.s32.totalorder %s5213_s14, %s5213_s14 }
  0x40   : > { %p5216_p2 = pnand %p5214_p6, %p5410_p7  ;;  %p5223_p10 = por %p5222_p9, %p5221_p8 }
  0x42   : > { %p5217_p3 = pneg %p5216_p2 }
  0x44   : > { %p5224_p11 = pnand %p5223_p10, %p5217_p3 }
  0x46   : > { %5227 = shalt.err (!%p5224_p11)
}
  0x47   : > { %s5331_s18 = smov 192   ;;  %s5332_s25 = smov 12  }
  0x48   : > { %4895 = dma.hbm_to_vmem [thread:$0]  (!%p5397_p5), %s6355_s1, 9216, %s184_s6, [#allocation8], %s5331_s18, %s5331_s18, %s5332_s25  }
  0x49   : > { %p4911_p12 = scmp.eq.s32.totalorder %s5324_s17, 0  ;;  %s210_s30 = sand.u32 1, %s5324_s17  }
  0x4a   : > { %s5333_s19 = smov [#allocation12]   ;;  %p6364_p7 = scmp.lt.s32.totalorder %s5324_s17, 4 }
  0x4b   : > { %s223_s28 = sshll.u32 %s5333_s19, 4  ;;  %s211_s5 = scalar_lea.sflag [#allocation13], %s210_s30  ;;  %s224_s28 = int_to_ptr.vmem [resolvable:$true] %s223_s28 }
  0x4c   : > { %p5471_p13 = pnand %p4911_p12, %p6364_p7  ;;  %s5228_s23 = scalar_lea.hbm %s6356_s2, 6144 }
  0x4d   : > { %p5229_p5 = scmp.ne.s32.totalorder %s6356_s2, %s5228_s23  ;;  %p5235_p4 = scmp.lt.u32.totalorder %s5228_s23, %s6356_s2 }
  0x4e   : > { %p5230_p11 = pneg %p5471_p13 }
  0x50   : > { %p5231_p0 = pnand %p5230_p11, %p5229_p5 }
  0x52   : > { %p5232_p1 = pneg %p5231_p0 }
  0x54   : > { %p5237_p6 = pnand %p5235_p4, %p5232_p1 }
  0x56   : > { %5240 = shalt.err (!%p5237_p6)
}
  0x57   : > { %s5241_s12 = scalar_lea.vmem %s224_s28, 6144  ;;  %s5248_s13 = scalar_lea.vmem %s224_s28, 12288 }
  0x58   : > { %p5242_p2 = scmp.ne.s32.totalorder %s224_s28, %s5241_s12  ;;  %p5249_p9 = scmp.lt.s32.totalorder %s224_s28, %s224_s28 }
  0x59   : > { %p5250_p10 = scmp.lt.s32.totalorder %s5248_s13, %s5241_s12 }
  0x5a   : > { %p5244_p3 = pnand %p5242_p2, %p5230_p11 }
  0x5b   : > { %p5251_p12 = por %p5250_p10, %p5249_p9 }
  0x5c   : > { %p5245_p8 = pneg %p5244_p3 }
  0x5e   : > { %p5252_p7 = pnand %p5251_p12, %p5245_p8 }
  0x60   : > { %5255 = shalt.err (!%p5252_p7)
}
  0x61   : > { %s5334_s14 = smov 128   ;;  %s5335_s18 = smov 8  }
  0x62   : > { %4902 = dma.hbm_to_vmem [thread:$0]  (!%p5471_p13), %s6356_s2, 6144, %s224_s28, %s211_s5, %s5334_s14, %s5334_s14, %s5335_s18  }
  0x63   : > { %p6366_p5 = scmp.ne.s32.totalorder %s6361_s22, 0 }
  0x64   : > { %p6367_p11 = scmp.eq.s32.totalorder (!%p6366_p5), %s5383_s20, 0 }
  0x65   : > { %235 = sbr.rel (%p6366_p5) target bundleno = 1418 (0x58a), region = 36 }
  0x6c   : > { %5295 = dma.done.wait (%p6367_p11), [#allocation10], 16   ;;  %p6368_p0 = pmov %p6367_p11 }
  0x6e   : > { %5297 = vsyncadd (%p6368_p0), [#allocation10], 4294967280  ;;  %p6369_p1 = pmov %p6368_p0 }
  0x6f   : > { %p6370_p4 = pmov %p6368_p0 }
  0x70   : > { %5299 = dma.done.wait (%p6369_p1), [#allocation8], 9216  }
  0x71   : > { %5301 = vsyncadd (%p6370_p4), [#allocation8], 4294958080  ;;  %s245_s27 = sand.u32 1, %s5383_s20   ;;  %p6371_p13 = pmov %p6368_p0 }
  0x72   : > { %s246_s30 = scalar_lea.sflag [#allocation13], %s245_s27 }
  0x73   : > { %5303 = dma.done.wait (%p6371_p13), %s246_s30, 6144   ;;  %p6372_p6 = pmov %p6368_p0 }
  0x74   : > { %p6373_p2 = pmov %p6368_p0 }
  0x75   : > { %5305 = vsyncadd (%p6372_p6), %s246_s30, 4294961152 }
  0x76   : > { %5307 = dma.done.wait (%p6373_p2), [#allocation13], 1024   ;;  %p6374_p3 = pmov %p6368_p0 }
  0x78   : > { %5309 = vsyncadd (%p6374_p3), [#allocation13], 4294966272 }
  0x79   : > { %258 = sfence }
  0x7a   : > { %p4339_p8 = scmp.ne.s32.totalorder %s5316_s15, 0 }
  0x7b   : > { %v5511_v0 = vld [vmem:[#allocation12] sm:$0xff] (!%p4339_p8)  ;;  %v5513_v1 = vld [vmem:[#allocation12 + $0x8] sm:$0xff] (!%p4339_p8)  ;;  %v5515_v2 = vld [vmem:[#allocation12 + $0x10] sm:$0xff] (!%p4339_p8)  ;;  %s5517_s22 = sld [smem:[#allocation7]] (!%p4339_p8)  ;;  %v5336_v7 = vmov (!%p4339_p8), 0.0  }
  0x7c   : > { %290 = sbr.rel (%p4339_p8) target bundleno = 208 (0xd0), region = 56  ;;  %340 = vst [vmem:[#allocation2] sm:$0xff] (!%p4339_p8), %v5511_v0  ;;  %341 = vst [vmem:[#allocation2 + $0x8] sm:$0xff] (!%p4339_p8), %v5513_v1  ;;  %v5522_v3 = vld [vmem:[#allocation12 + $0x18] sm:$0xff] (!%p4339_p8)  ;;  %v5524_v4 = vld [vmem:[#allocation12 + $0x20] sm:$0xff] (!%p4339_p8)  ;;  %v388_v6 = vpack.c.bf16 (!%p4339_p8), %v5513_v1, %v5511_v0 }
  0x7d   : > { %342 = vst [vmem:[#allocation2 + $0x10] sm:$0xff] (!%p4339_p8), %v5515_v2  ;;  %v5526_v5 = vld [vmem:[#allocation12 + $0x28] sm:$0xff] (!%p4339_p8)  ;;  %441 = vst [vmem:[#allocation3] sm:$0xff] (!%p4339_p8), %v5336_v7  ;;  %v5533_v8 = vld [vmem:[#allocation12 + $0x30] sm:$0xff] (!%p4339_p8)  ;;  %v389_v11 = vpack.c.bf16 (!%p4339_p8), %v5522_v3, %v5515_v2 }
  0x7e   : > { %442 = vst [vmem:[#allocation3 + $0x8] sm:$0xff] (!%p4339_p8), %v5336_v7  ;;  %443 = vst [vmem:[#allocation3 + $0x10] sm:$0xff] (!%p4339_p8), %v5336_v7  ;;  %v5535_v9 = vld [vmem:[#allocation12 + $0x38] sm:$0xff] (!%p4339_p8)  ;;  %v5537_v10 = vld [vmem:[#allocation12 + $0x40] sm:$0xff] (!%p4339_p8)  ;;  %v390_v12 = vpack.c.bf16 (!%p4339_p8), %v5526_v5, %v5524_v4 }
  0x7f   : > { %444 = vst [vmem:[#allocation3 + $0x18] sm:$0xff] (!%p4339_p8), %v5336_v7  ;;  %445 = vst [vmem:[#allocation3 + $0x20] sm:$0xff] (!%p4339_p8), %v5336_v7  ;;  %v5546_v13 = vld [vmem:[#allocation12 + $0x48] sm:$0xff] (!%p4339_p8)  ;;  %v5548_v14 = vld [vmem:[#allocation12 + $0x50] sm:$0xff] (!%p4339_p8)  ;;  %v391_v16 = vpack.c.bf16 (!%p4339_p8), %v5535_v9, %v5533_v8 }
  0x80   : > { %446 = vst [vmem:[#allocation3 + $0x28] sm:$0xff] (!%p4339_p8), %v5336_v7  ;;  %447 = vst [vmem:[#allocation3 + $0x30] sm:$0xff] (!%p4339_p8), %v5336_v7  ;;  %v5550_v15 = vld [vmem:[#allocation12 + $0x58] sm:$0xff] (!%p4339_p8)  ;;  %v5560_v17 = vld [vmem:[#allocation12 + $0x60] sm:$0xff] (!%p4339_p8)  ;;  %v392_v20 = vpack.c.bf16 (!%p4339_p8), %v5546_v13, %v5537_v10 }
  0x81   : > { %448 = vst [vmem:[#allocation3 + $0x38] sm:$0xff] (!%p4339_p8), %v5336_v7  ;;  %449 = vst [vmem:[#allocation3 + $0x40] sm:$0xff] (!%p4339_p8), %v5336_v7  ;;  %v5562_v18 = vld [vmem:[#allocation12 + $0x68] sm:$0xff] (!%p4339_p8)  ;;  %v5564_v19 = vld [vmem:[#allocation12 + $0x70] sm:$0xff] (!%p4339_p8)  ;;  %v393_v21 = vpack.c.bf16 (!%p4339_p8), %v5550_v15, %v5548_v14  ;;  %v5595_v31 = vstv (!%p4339_p8), %s5517_s22 }
  0x82   : > { %450 = vst [vmem:[#allocation3 + $0x48] sm:$0xff] (!%p4339_p8), %v5336_v7  ;;  %451 = vst [vmem:[#allocation3 + $0x50] sm:$0xff] (!%p4339_p8), %v5336_v7  ;;  %v5573_v22 = vld [vmem:[#allocation12 + $0x78] sm:$0xff] (!%p4339_p8)  ;;  %v5575_v23 = vld [vmem:[#allocation12 + $0x80] sm:$0xff] (!%p4339_p8)  ;;  %v394_v25 = vpack.c.bf16 (!%p4339_p8), %v5562_v18, %v5560_v17  ;;  %v491_v36 = vmul.f32 (!%p4339_p8), %v5595_v31, %v5511_v0  ;;  %v492_v37 = vmul.f32 (!%p4339_p8), %v5595_v31, %v5513_v1 }
  0x83   : > { %452 = vst [vmem:[#allocation3 + $0x58] sm:$0xff] %v5336_v7  ;;  %453 = vst [vmem:[#allocation3 + $0x60] sm:$0xff] %v5336_v7  ;;  %v5577_v24 = vld [vmem:[#allocation12 + $0x88] sm:$0xff]  ;;  %v5584_v26 = vld [vmem:[#allocation12 + $0x90] sm:$0xff]  ;;  %v395_v29 = vpack.c.bf16 %v5573_v22, %v5564_v19  ;;  %v493_v38 = vmul.f32 %v5595_v31, %v5515_v2  ;;  %v494_v44 = vmul.f32 %v5595_v31, %v5522_v3 }
  0x84   : > { %454 = vst [vmem:[#allocation3 + $0x68] sm:$0xff] %v5336_v7  ;;  %455 = vst [vmem:[#allocation3 + $0x70] sm:$0xff] %v5336_v7  ;;  %v5586_v27 = vld [vmem:[#allocation12 + $0x98] sm:$0xff]  ;;  %v5588_v28 = vld [vmem:[#allocation12 + $0xa0] sm:$0xff]  ;;  %v396_v30 = vpack.c.bf16 %v5577_v24, %v5575_v23  ;;  %v495_v45 = vmul.f32 %v5595_v31, %v5524_v4  ;;  %v496_v50 = vmul.f32 %v5595_v31, %v5526_v5 }
  0x85   : > { %456 = vst [vmem:[#allocation3 + $0x78] sm:$0xff] %v5336_v7  ;;  %457 = vst [vmem:[#allocation3 + $0x80] sm:$0xff] %v5336_v7  ;;  %v5600_v32 = vld [vmem:[#allocation12 + $0xa8] sm:$0xff]  ;;  %v5602_v33 = vld [vmem:[#allocation12 + $0xb0] sm:$0xff]  ;;  %v397_v35 = vpack.c.bf16 %v5586_v27, %v5584_v26  ;;  %v497_v51 = vmul.f32 %v5595_v31, %v5533_v8  ;;  %v498_v52 = vmul.f32 %v5595_v31, %v5535_v9 }
  0x86   : > { %458 = vst [vmem:[#allocation3 + $0x88] sm:$0xff] %v5336_v7  ;;  %459 = vst [vmem:[#allocation3 + $0x90] sm:$0xff] %v5336_v7  ;;  %v5604_v34 = vld [vmem:[#allocation12 + $0xb8] sm:$0xff]  ;;  %v5617_v39 = vld [vmem:[#allocation12 + $0xc0] sm:$0xff]  ;;  %v398_v42 = vpack.c.bf16 %v5600_v32, %v5588_v28  ;;  %v499_v58 = vmul.f32 %v5595_v31, %v5537_v10  ;;  %v500_v59 = vmul.f32 %v5595_v31, %v5546_v13 }
  0x87   : > { %460 = vst [vmem:[#allocation3 + $0x98] sm:$0xff] %v5336_v7  ;;  %461 = vst [vmem:[#allocation3 + $0xa0] sm:$0xff] %v5336_v7  ;;  %v5619_v40 = vld [vmem:[#allocation12 + $0xc8] sm:$0xff]  ;;  %v5621_v41 = vld [vmem:[#allocation12 + $0xd0] sm:$0xff]  ;;  %v399_v43 = vpack.c.bf16 %v5604_v34, %v5602_v33  ;;  %v501_v0 = vmul.f32 %v5595_v31, %v5548_v14  ;;  %v502_v1 = vmul.f32 %v5595_v31, %v5550_v15 }
  0x88   : > { %462 = vst [vmem:[#allocation3 + $0xa8] sm:$0xff] %v5336_v7  ;;  %463 = vst [vmem:[#allocation3 + $0xb0] sm:$0xff] %v5336_v7  ;;  %v5634_v46 = vld [vmem:[#allocation12 + $0xd8] sm:$0xff]  ;;  %v5636_v47 = vld [vmem:[#allocation12 + $0xe0] sm:$0xff]  ;;  %v400_v49 = vpack.c.bf16 %v5619_v40, %v5617_v39  ;;  %v503_v2 = vmul.f32 %v5595_v31, %v5560_v17 }
  0x89   : > { %464 = vst [vmem:[#allocation3 + $0xb8] sm:$0xff] %v5336_v7  ;;  %465 = vst [vmem:[#allocation3 + $0xc0] sm:$0xff] %v5336_v7  ;;  %v5638_v48 = vld [vmem:[#allocation12 + $0xe8] sm:$0xff]  ;;  %v5651_v53 = vld [vmem:[#allocation12 + $0xf0] sm:$0xff]  ;;  %v401_v56 = vpack.c.bf16 %v5634_v46, %v5621_v41 }
  0x8a   : > { %466 = vst [vmem:[#allocation3 + $0xc8] sm:$0xff] %v5336_v7  ;;  %467 = vst [vmem:[#allocation3 + $0xd0] sm:$0xff] %v5336_v7  ;;  %v5653_v54 = vld [vmem:[#allocation12 + $0xf8] sm:$0xff]  ;;  %v5655_v55 = vld [vmem:[#allocation12 + $0x100] sm:$0xff]  ;;  %v402_v57 = vpack.c.bf16 %v5638_v48, %v5636_v47 }
  0x8b   : > { %468 = vst [vmem:[#allocation3 + $0xd8] sm:$0xff] %v5336_v7  ;;  %469 = vst [vmem:[#allocation3 + $0xe0] sm:$0xff] %v5336_v7  ;;  %v5668_v60 = vld [vmem:[#allocation12 + $0x108] sm:$0xff]  ;;  %v5670_v61 = vld [vmem:[#allocation12 + $0x110] sm:$0xff]  ;;  %v403_v63 = vpack.c.bf16 %v5653_v54, %v5651_v53 }
  0x8c   : > { %470 = vst [vmem:[#allocation3 + $0xe8] sm:$0xff] %v5336_v7  ;;  %471 = vst [vmem:[#allocation3 + $0xf0] sm:$0xff] %v5336_v7  ;;  %v5672_v62 = vld [vmem:[#allocation12 + $0x118] sm:$0xff] }
  0x8d   : > { %472 = vst [vmem:[#allocation3 + $0xf8] sm:$0xff] %v5336_v7  ;;  %473 = vst [vmem:[#allocation3 + $0x100] sm:$0xff] %v5336_v7 }
  0x8e   : > { %474 = vst [vmem:[#allocation3 + $0x108] sm:$0xff] %v5336_v7  ;;  %475 = vst [vmem:[#allocation3 + $0x110] sm:$0xff] %v5336_v7 }
  0x8f   : > { %476 = vst [vmem:[#allocation3 + $0x118] sm:$0xff] %v5336_v7  ;;  %477 = vst [vmem:[#allocation3 + $0x120] sm:$0xff] %v5336_v7 }
  0x90   : > { %478 = vst [vmem:[#allocation3 + $0x128] sm:$0xff] %v5336_v7  ;;  %479 = vst [vmem:[#allocation3 + $0x130] sm:$0xff] %v5336_v7 }
  0x91   : > { %480 = vst [vmem:[#allocation3 + $0x138] sm:$0xff] %v5336_v7  ;;  %481 = vst [vmem:[#allocation3 + $0x140] sm:$0xff] %v5336_v7 }
  0x92   : > { %482 = vst [vmem:[#allocation3 + $0x148] sm:$0xff] %v5336_v7  ;;  %483 = vst [vmem:[#allocation3 + $0x150] sm:$0xff] %v5336_v7 }
  0x93   : > { %484 = vst [vmem:[#allocation3 + $0x158] sm:$0xff] %v5336_v7  ;;  %485 = vst [vmem:[#allocation3 + $0x160] sm:$0xff] %v5336_v7 }
  0x94   : > { %486 = vst [vmem:[#allocation3 + $0x168] sm:$0xff] %v5336_v7  ;;  %487 = vst [vmem:[#allocation3 + $0x170] sm:$0xff] %v5336_v7 }
  0x95   : > { %488 = vst [vmem:[#allocation3 + $0x178] sm:$0xff] %v5336_v7  ;;  %343 = vst [vmem:[#allocation2 + $0x18] sm:$0xff] %v5522_v3  ;;  %v5685_v3 = vld [vmem:[#allocation12 + $0x120] sm:$0xff]  ;;  %v405_v7 = vpack.c.bf16 %v5672_v62, %v5670_v61 }
  0x96   : > { %344 = vst [vmem:[#allocation2 + $0x20] sm:$0xff] %v5524_v4  ;;  %345 = vst [vmem:[#allocation2 + $0x28] sm:$0xff] %v5526_v5  ;;  %v5687_v4 = vld [vmem:[#allocation12 + $0x128] sm:$0xff]  ;;  %v5689_v5 = vld [vmem:[#allocation12 + $0x130] sm:$0xff] }
  0x97   : > { %346 = vst [vmem:[#allocation2 + $0x30] sm:$0xff] %v5533_v8  ;;  %347 = vst [vmem:[#allocation2 + $0x38] sm:$0xff] %v5535_v9  ;;  %v504_v8 = vmul.f32 %v5595_v31, %v5562_v18  ;;  %v505_v9 = vmul.f32 %v5595_v31, %v5564_v19 }
  0x98   : > { %348 = vst [vmem:[#allocation2 + $0x40] sm:$0xff] %v5537_v10  ;;  %416 = vst [vmem:[#allocation4] sm:$0xff] %v388_v6  ;;  %v404_v6 = vpack.c.bf16 %v5668_v60, %v5655_v55  ;;  %v5702_v10 = vld [vmem:[#allocation12 + $0x138] sm:$0xff] }
  0x99   : > { %349 = vst [vmem:[#allocation2 + $0x48] sm:$0xff] %v5546_v13  ;;  %350 = vst [vmem:[#allocation2 + $0x50] sm:$0xff] %v5548_v14  ;;  %v406_v13 = vpack.c.bf16 %v5687_v4, %v5685_v3  ;;  %v506_v14 = vmul.f32 %v5595_v31, %v5573_v22 }
  0x9a   : > { %351 = vst [vmem:[#allocation2 + $0x58] sm:$0xff] %v5550_v15  ;;  %417 = vst [vmem:[#allocation4 + $0x8] sm:$0xff] %v389_v11  ;;  %v5704_v11 = vld [vmem:[#allocation12 + $0x140] sm:$0xff]  ;;  %v507_v15 = vmul.f32 %v5595_v31, %v5575_v23 }
  0x9b   : > { %418 = vst [vmem:[#allocation4 + $0x10] sm:$0xff] %v390_v12  ;;  %352 = vst [vmem:[#allocation2 + $0x60] sm:$0xff] %v5560_v17  ;;  %v5706_v12 = vld [vmem:[#allocation12 + $0x148] sm:$0xff]  ;;  %v5719_v17 = vld [vmem:[#allocation12 + $0x150] sm:$0xff] }
  0x9c   : > { %353 = vst [vmem:[#allocation2 + $0x68] sm:$0xff] %v5562_v18  ;;  %354 = vst [vmem:[#allocation2 + $0x70] sm:$0xff] %v5564_v19  ;;  %v5721_v18 = vld [vmem:[#allocation12 + $0x158] sm:$0xff]  ;;  %v5723_v19 = vld [vmem:[#allocation12 + $0x160] sm:$0xff] }
  0x9d   : > { %419 = vst [vmem:[#allocation4 + $0x18] sm:$0xff] %v391_v16  ;;  %355 = vst [vmem:[#allocation2 + $0x78] sm:$0xff] %v5573_v22  ;;  %v508_v16 = vmul.f32 %v5595_v31, %v5577_v24  ;;  %v509_v22 = vmul.f32 %v5595_v31, %v5584_v26 }
  0x9e   : > { %356 = vst [vmem:[#allocation2 + $0x80] sm:$0xff] %v5575_v23  ;;  %357 = vst [vmem:[#allocation2 + $0x88] sm:$0xff] %v5577_v24  ;;  %v510_v23 = vmul.f32 %v5595_v31, %v5586_v27  ;;  %v5736_v24 = vld [vmem:[#allocation12 + $0x168] sm:$0xff] }
  0x9f   : > { %420 = vst [vmem:[#allocation4 + $0x20] sm:$0xff] %v392_v20  ;;  %421 = vst [vmem:[#allocation4 + $0x28] sm:$0xff] %v393_v21  ;;  %v407_v20 = vpack.c.bf16 %v5702_v10, %v5689_v5  ;;  %v408_v21 = vpack.c.bf16 %v5706_v12, %v5704_v11 }
  0xa0   : > { %358 = vst [vmem:[#allocation2 + $0x90] sm:$0xff] %v5584_v26  ;;  %359 = vst [vmem:[#allocation2 + $0x98] sm:$0xff] %v5586_v27  ;;  %v511_v26 = vmul.f32 %v5595_v31, %v5588_v28  ;;  %v512_v27 = vmul.f32 %v5595_v31, %v5600_v32 }
  0xa1   : > { %360 = vst [vmem:[#allocation2 + $0xa0] sm:$0xff] %v5588_v28  ;;  %422 = vst [vmem:[#allocation4 + $0x30] sm:$0xff] %v394_v25  ;;  %v5738_v25 = vld [vmem:[#allocation12 + $0x170] sm:$0xff] }
  0xa2   : > { %361 = vst [vmem:[#allocation2 + $0xa8] sm:$0xff] %v5600_v32  ;;  %362 = vst [vmem:[#allocation2 + $0xb0] sm:$0xff] %v5602_v33  ;;  %v514_v32 = vmul.f32 %v5595_v31, %v5604_v34 }
  0xa3   : > { %363 = vst [vmem:[#allocation2 + $0xb8] sm:$0xff] %v5604_v34  ;;  %423 = vst [vmem:[#allocation4 + $0x38] sm:$0xff] %v395_v29  ;;  %v5740_v29 = vld [vmem:[#allocation12 + $0x178] sm:$0xff]  ;;  %v520_v34 = vmul.f32 %v5595_v31, %v5638_v48 }
  0xa4   : > { %424 = vst [vmem:[#allocation4 + $0x40] sm:$0xff] %v396_v30  ;;  %364 = vst [vmem:[#allocation2 + $0xc0] sm:$0xff] %v5617_v39  ;;  %v409_v30 = vpack.c.bf16 %v5721_v18, %v5719_v17  ;;  %v411_v28 = vpack.c.bf16 %v5740_v29, %v5738_v25 }
  0xa5   : > { %365 = vst [vmem:[#allocation2 + $0xc8] sm:$0xff] %v5619_v40  ;;  %366 = vst [vmem:[#allocation2 + $0xd0] sm:$0xff] %v5621_v41 }
  0xa6   : > { %425 = vst [vmem:[#allocation4 + $0x48] sm:$0xff] %v397_v35  ;;  %540 = vst [vmem:[#allocation6] sm:$0xff] %v491_v36  ;;  %v513_v35 = vmul.f32 %v5595_v31, %v5602_v33  ;;  %v410_v36 = vpack.c.bf16 %v5736_v24, %v5723_v19  ;;  %v515_v33 = vmul.f32 %v5595_v31, %v5617_v39 }
  0xa7   : > { %541 = vst [vmem:[#allocation6 + $0x8] sm:$0xff] %v492_v37  ;;  %542 = vst [vmem:[#allocation6 + $0x10] sm:$0xff] %v493_v38  ;;  %v516_v37 = vmul.f32 %v5595_v31, %v5619_v40  ;;  %v517_v38 = vmul.f32 %v5595_v31, %v5621_v41  ;;  %v521_v39 = vmul.f32 %v5595_v31, %v5651_v53 }
  0xa8   : > { %367 = vst [vmem:[#allocation2 + $0xd8] sm:$0xff] %v5634_v46  ;;  %368 = vst [vmem:[#allocation2 + $0xe0] sm:$0xff] %v5636_v47  ;;  %v522_v40 = vmul.f32 %v5595_v31, %v5653_v54  ;;  %v523_v41 = vmul.f32 %v5595_v31, %v5655_v55 }
  0xa9   : > { %369 = vst [vmem:[#allocation2 + $0xe8] sm:$0xff] %v5638_v48  ;;  %426 = vst [vmem:[#allocation4 + $0x50] sm:$0xff] %v398_v42  ;;  %v518_v42 = vmul.f32 %v5595_v31, %v5634_v46  ;;  %v526_v46 = vmul.f32 %v5595_v31, %v5672_v62  ;;  %v528_v48 = vmul.f32 %v5595_v31, %v5687_v4 }
  0xaa   : > { %427 = vst [vmem:[#allocation4 + $0x58] sm:$0xff] %v399_v43  ;;  %543 = vst [vmem:[#allocation6 + $0x18] sm:$0xff] %v494_v44  ;;  %v519_v43 = vmul.f32 %v5595_v31, %v5636_v47  ;;  %v524_v44 = vmul.f32 %v5595_v31, %v5668_v60  ;;  %v527_v47 = vmul.f32 %v5595_v31, %v5685_v3 }
  0xab   : > { %544 = vst [vmem:[#allocation6 + $0x20] sm:$0xff] %v495_v45  ;;  %370 = vst [vmem:[#allocation2 + $0xf0] sm:$0xff] %v5651_v53  ;;  %v525_v45 = vmul.f32 %v5595_v31, %v5670_v61  ;;  %v533_v53 = vmul.f32 %v5595_v31, %v5719_v17 }
  0xac   : > { %371 = vst [vmem:[#allocation2 + $0xf8] sm:$0xff] %v5653_v54  ;;  %372 = vst [vmem:[#allocation2 + $0x100] sm:$0xff] %v5655_v55  ;;  %v534_v54 = vmul.f32 %v5595_v31, %v5721_v18  ;;  %v535_v55 = vmul.f32 %v5595_v31, %v5723_v19 }
  0xad   : > { %428 = vst [vmem:[#allocation4 + $0x60] sm:$0xff] %v400_v49  ;;  %545 = vst [vmem:[#allocation6 + $0x28] sm:$0xff] %v496_v50  ;;  %v529_v49 = vmul.f32 %v5595_v31, %v5689_v5  ;;  %v530_v50 = vmul.f32 %v5595_v31, %v5702_v10 }
  0xae   : > { %546 = vst [vmem:[#allocation6 + $0x30] sm:$0xff] %v497_v51  ;;  %547 = vst [vmem:[#allocation6 + $0x38] sm:$0xff] %v498_v52  ;;  %v531_v51 = vmul.f32 %v5595_v31, %v5704_v11  ;;  %v532_v52 = vmul.f32 %v5595_v31, %v5706_v12 }
  0xaf   : > { %373 = vst [vmem:[#allocation2 + $0x108] sm:$0xff] %v5668_v60  ;;  %374 = vst [vmem:[#allocation2 + $0x110] sm:$0xff] %v5670_v61 }
  0xb0   : > { %375 = vst [vmem:[#allocation2 + $0x118] sm:$0xff] %v5672_v62  ;;  %429 = vst [vmem:[#allocation4 + $0x68] sm:$0xff] %v401_v56  ;;  %v536_v56 = vmul.f32 %v5595_v31, %v5736_v24 }
  0xb1   : > { %430 = vst [vmem:[#allocation4 + $0x70] sm:$0xff] %v402_v57  ;;  %548 = vst [vmem:[#allocation6 + $0x40] sm:$0xff] %v499_v58  ;;  %v537_v57 = vmul.f32 %v5595_v31, %v5738_v25  ;;  %v538_v58 = vmul.f32 %v5595_v31, %v5740_v29 }
  0xb2   : > { %549 = vst [vmem:[#allocation6 + $0x48] sm:$0xff] %v500_v59  ;;  %376 = vst [vmem:[#allocation2 + $0x120] sm:$0xff] %v5685_v3 }
  0xb3   : > { %377 = vst [vmem:[#allocation2 + $0x128] sm:$0xff] %v5687_v4  ;;  %378 = vst [vmem:[#allocation2 + $0x130] sm:$0xff] %v5689_v5 }
  0xb4   : > { %431 = vst [vmem:[#allocation4 + $0x78] sm:$0xff] %v403_v63  ;;  %550 = vst [vmem:[#allocation6 + $0x50] sm:$0xff] %v501_v0 }
  0xb5   : > { %551 = vst [vmem:[#allocation6 + $0x58] sm:$0xff] %v502_v1  ;;  %552 = vst [vmem:[#allocation6 + $0x60] sm:$0xff] %v503_v2 }
  0xb6   : > { %379 = vst [vmem:[#allocation2 + $0x138] sm:$0xff] %v5702_v10  ;;  %380 = vst [vmem:[#allocation2 + $0x140] sm:$0xff] %v5704_v11 }
  0xb7   : > { %381 = vst [vmem:[#allocation2 + $0x148] sm:$0xff] %v5706_v12  ;;  %432 = vst [vmem:[#allocation4 + $0x80] sm:$0xff] %v404_v6 }
  0xb8   : > { %433 = vst [vmem:[#allocation4 + $0x88] sm:$0xff] %v405_v7  ;;  %553 = vst [vmem:[#allocation6 + $0x68] sm:$0xff] %v504_v8 }
  0xb9   : > { %554 = vst [vmem:[#allocation6 + $0x70] sm:$0xff] %v505_v9  ;;  %382 = vst [vmem:[#allocation2 + $0x150] sm:$0xff] %v5719_v17 }
  0xba   : > { %383 = vst [vmem:[#allocation2 + $0x158] sm:$0xff] %v5721_v18  ;;  %384 = vst [vmem:[#allocation2 + $0x160] sm:$0xff] %v5723_v19 }
  0xbb   : > { %434 = vst [vmem:[#allocation4 + $0x90] sm:$0xff] %v406_v13  ;;  %555 = vst [vmem:[#allocation6 + $0x78] sm:$0xff] %v506_v14 }
  0xbc   : > { %556 = vst [vmem:[#allocation6 + $0x80] sm:$0xff] %v507_v15  ;;  %557 = vst [vmem:[#allocation6 + $0x88] sm:$0xff] %v508_v16 }
  0xbd   : > { %385 = vst [vmem:[#allocation2 + $0x168] sm:$0xff] %v5736_v24  ;;  %386 = vst [vmem:[#allocation2 + $0x170] sm:$0xff] %v5738_v25 }
  0xbe   : > { %387 = vst [vmem:[#allocation2 + $0x178] sm:$0xff] %v5740_v29  ;;  %435 = vst [vmem:[#allocation4 + $0x98] sm:$0xff] %v407_v20 }
  0xbf   : > { %436 = vst [vmem:[#allocation4 + $0xa0] sm:$0xff] %v408_v21  ;;  %558 = vst [vmem:[#allocation6 + $0x90] sm:$0xff] %v509_v22 }
  0xc0   : > { %559 = vst [vmem:[#allocation6 + $0x98] sm:$0xff] %v510_v23  ;;  %437 = vst [vmem:[#allocation4 + $0xa8] sm:$0xff] %v409_v30 }
  0xc1   : > { %560 = vst [vmem:[#allocation6 + $0xa0] sm:$0xff] %v511_v26  ;;  %561 = vst [vmem:[#allocation6 + $0xa8] sm:$0xff] %v512_v27 }
  0xc2   : > { %562 = vst [vmem:[#allocation6 + $0xb0] sm:$0xff] %v513_v35  ;;  %438 = vst [vmem:[#allocation4 + $0xb0] sm:$0xff] %v410_v36 }
  0xc3   : > { %439 = vst [vmem:[#allocation4 + $0xb8] sm:$0xff] %v411_v28  ;;  %563 = vst [vmem:[#allocation6 + $0xb8] sm:$0xff] %v514_v32 }
  0xc4   : > { %564 = vst [vmem:[#allocation6 + $0xc0] sm:$0xff] %v515_v33  ;;  %565 = vst [vmem:[#allocation6 + $0xc8] sm:$0xff] %v516_v37 }
  0xc5   : > { %566 = vst [vmem:[#allocation6 + $0xd0] sm:$0xff] %v517_v38  ;;  %567 = vst [vmem:[#allocation6 + $0xd8] sm:$0xff] %v518_v42 }
  0xc6   : > { %568 = vst [vmem:[#allocation6 + $0xe0] sm:$0xff] %v519_v43  ;;  %569 = vst [vmem:[#allocation6 + $0xe8] sm:$0xff] %v520_v34 }
  0xc7   : > { %570 = vst [vmem:[#allocation6 + $0xf0] sm:$0xff] %v521_v39  ;;  %571 = vst [vmem:[#allocation6 + $0xf8] sm:$0xff] %v522_v40 }
  0xc8   : > { %572 = vst [vmem:[#allocation6 + $0x100] sm:$0xff] %v523_v41  ;;  %573 = vst [vmem:[#allocation6 + $0x108] sm:$0xff] %v524_v44 }
  0xc9   : > { %574 = vst [vmem:[#allocation6 + $0x110] sm:$0xff] %v525_v45  ;;  %575 = vst [vmem:[#allocation6 + $0x118] sm:$0xff] %v526_v46 }
  0xca   : > { %576 = vst [vmem:[#allocation6 + $0x120] sm:$0xff] %v527_v47  ;;  %577 = vst [vmem:[#allocation6 + $0x128] sm:$0xff] %v528_v48 }
  0xcb   : > { %578 = vst [vmem:[#allocation6 + $0x130] sm:$0xff] %v529_v49  ;;  %579 = vst [vmem:[#allocation6 + $0x138] sm:$0xff] %v530_v50 }
  0xcc   : > { %580 = vst [vmem:[#allocation6 + $0x140] sm:$0xff] %v531_v51  ;;  %581 = vst [vmem:[#allocation6 + $0x148] sm:$0xff] %v532_v52 }
  0xcd   : > { %582 = vst [vmem:[#allocation6 + $0x150] sm:$0xff] %v533_v53  ;;  %583 = vst [vmem:[#allocation6 + $0x158] sm:$0xff] %v534_v54 }
  0xce   : > { %584 = vst [vmem:[#allocation6 + $0x160] sm:$0xff] %v535_v55  ;;  %585 = vst [vmem:[#allocation6 + $0x168] sm:$0xff] %v536_v56 }
  0xcf   : > { %586 = vst [vmem:[#allocation6 + $0x170] sm:$0xff] %v537_v57  ;;  %587 = vst [vmem:[#allocation6 + $0x178] sm:$0xff] %v538_v58 }
  0xd0 PF: > { %p588_p9 = scmp.lt.s32.totalorder %s5316_s15, 0  ;;  %s589_s19 = ssub.s32 0, %s5316_s15 }
  0xd1   : > { %s4340_s28 = smin.u32 %s5316_s15, %s589_s19 }
  0xd2   : > { %s591_s29 = sand.u32 1, %s4340_s28  }
  0xd3   : > { %s592_s5 = ssub.s32 0, %s591_s29 }
  0xd4   : > { %s6380_s5 = smov (!%p588_p9, %s592_s5), %s591_s29 }
  0xd5   : > { %p4342_p10 = scmp.lt.s32.totalorder %s6380_s5, 0  ;;  %s598_s7 = sadd.s32 2, %s6380_s5 }
  0xd7   : > { %s6382_s7 = smov (!%p4342_p10, %s598_s7), %s6380_s5 }
  0xd8   : > { %p4343_p12 = scmp.ne.s32.totalorder %s6382_s7, 1 }
  0xd9   : > { %v803_v31 = vld [vmem:[#allocation4] sm:$0xff] (!%p4343_p12)  ;;  %v5337_v59 = vmov (!%p4343_p12), 0   ;;  %v804_v60 = vld [vmem:[#allocation4 + $0x8] sm:$0xff] (!%p4343_p12)  ;;  %v805_v62 = vld [vmem:[#allocation4 + $0x10] sm:$0xff] (!%p4343_p12)  ;;  %p1709_p7 = scmp.eq.s32.totalorder (!%p4343_p12), %s5316_s15, 1  ;;  %s1957_s23 = sld [smem:[#allocation7 + %s5316_s15]] (!%p4343_p12) }
  0xda   : > { %603 = sbr.rel (%p4343_p12) target bundleno = 656 (0x290), region = 60  ;;  %1211 = vmatprep.subr.bf16.mxu0 (!%p4343_p12), %v5337_v59  ;;  %4789 = vmatprep.subr.bf16.mxu1 (!%p4343_p12), %v5337_v59  ;;  %v4961_v61 = vld [vmem:[#allocation11 + $0x4] ss:$12 sps:$4 sm:$0xff] (!%p4343_p12)   ;;  %v4964_v63 = vld [vmem:[#allocation11 + $0x1b4] ss:$12 sps:$4 sm:$0xff] (!%p4343_p12)   ;;  %v806_v0 = vld [vmem:[#allocation4 + $0x18] sm:$0xff] (!%p4343_p12) }
  0xdb   : > { %1212 = vmatpush1.bf16.msra.mxu0 (!%p4343_p12), %v803_v31  ;;  %4805 = vmatpush1.bf16.msra.mxu1 (!%p4343_p12), %v803_v31  ;;  %v807_v1 = vld [vmem:[#allocation4 + $0x20] sm:$0xff] (!%p4343_p12)  ;;  %v808_v2 = vld [vmem:[#allocation4 + $0x28] sm:$0xff] (!%p4343_p12)  ;;  %v809_v3 = vld [vmem:[#allocation4 + $0x30] sm:$0xff] (!%p4343_p12) }
  0xdc   : > { %1213 = vmatprep.subr.bf16.mxu0 (!%p4343_p12), %v5337_v59  ;;  %4790 = vmatprep.subr.bf16.mxu1 (!%p4343_p12), %v5337_v59  ;;  %v810_v4 = vld [vmem:[#allocation4 + $0x38] sm:$0xff] (!%p4343_p12)  ;;  %v811_v5 = vld [vmem:[#allocation4 + $0x40] sm:$0xff] (!%p4343_p12)  ;;  %v812_v6 = vld [vmem:[#allocation4 + $0x48] sm:$0xff] (!%p4343_p12) }
  0xdd   : > { %1243 = vmatprep.mubr.bf16.mxu0 (!%p4343_p12), %v4961_v61  ;;  %1387 = vmatprep.mubr.bf16.mxu1 (!%p4343_p12), %v4964_v63  ;;  %v813_v7 = vld [vmem:[#allocation4 + $0x50] sm:$0xff] (!%p4343_p12)  ;;  %v814_v8 = vld [vmem:[#allocation4 + $0x58] sm:$0xff] (!%p4343_p12)  ;;  %v815_v9 = vld [vmem:[#allocation4 + $0x60] sm:$0xff] (!%p4343_p12) }
  0xde   : > { %v816_v10 = vld [vmem:[#allocation4 + $0x68] sm:$0xff] (!%p4343_p12)  ;;  %v817_v11 = vld [vmem:[#allocation4 + $0x70] sm:$0xff] (!%p4343_p12)  ;;  %v818_v12 = vld [vmem:[#allocation4 + $0x78] sm:$0xff] (!%p4343_p12) }
  0xdf   : > { %1214 = vmatpush1.bf16.msra.mxu0 (!%p4343_p12), %v804_v60  ;;  %4806 = vmatpush1.bf16.msra.mxu1 (!%p4343_p12), %v804_v60  ;;  %v4959_v13 = vld [vmem:[#allocation11] ss:$12 sps:$4 sm:$0xff] (!%p4343_p12)   ;;  %v4962_v14 = vld [vmem:[#allocation11 + $0x1b0] ss:$12 sps:$4 sm:$0xff] (!%p4343_p12)   ;;  %v4969_v20 = vld [vmem:[#allocation11 + $0x18] ss:$12 sps:$4 sm:$0xff] (!%p4343_p12)  }
  0xe0   : > { %1215 = vmatprep.subr.bf16.mxu0 (!%p4343_p12), %v5337_v59  ;;  %4791 = vmatprep.subr.bf16.mxu1 (!%p4343_p12), %v5337_v59  ;;  %v819_v15 = vld [vmem:[#allocation4 + $0x80] sm:$0xff] (!%p4343_p12)  ;;  %v4965_v16 = vld [vmem:[#allocation11 + $0x1c] ss:$12 sps:$4 sm:$0xff] (!%p4343_p12)   ;;  %v4967_v17 = vld [vmem:[#allocation11 + $0x1cc] ss:$12 sps:$4 sm:$0xff] (!%p4343_p12)  }
  0xe1   : > { %v820_v18 = vld [vmem:[#allocation4 + $0x88] sm:$0xff]  ;;  %v821_v19 = vld [vmem:[#allocation4 + $0x90] sm:$0xff]  ;;  %v822_v24 = vld [vmem:[#allocation4 + $0x98] sm:$0xff]  ;;  %s1710_s8 = scalar_select %p1709_p7, 1.0, 2.0 }
  0xe2   : > { %v4970_v21 = vld [vmem:[#allocation11 + $0x1c8] ss:$12 sps:$4 sm:$0xff]   ;;  %v4973_v23 = vld [vmem:[#allocation11 + $0x1e4] ss:$12 sps:$4 sm:$0xff]   ;;  %v4976_v30 = vld [vmem:[#allocation11 + $0x1e0] ss:$12 sps:$4 sm:$0xff]  }
  0xe3   : > { %1216 = vmatpush1.bf16.msra.mxu0 %v805_v62  ;;  %4807 = vmatpush1.bf16.msra.mxu1 %v805_v62  ;;  %v4971_v22 = vld [vmem:[#allocation11 + $0x34] ss:$12 sps:$4 sm:$0xff]   ;;  %v4975_v29 = vld [vmem:[#allocation11 + $0x30] ss:$12 sps:$4 sm:$0xff]   ;;  %v4977_v26 = vld [vmem:[#allocation11 + $0x4c] ss:$12 sps:$4 sm:$0xff]  }
  0xe4   : > { %1217 = vmatprep.subr.bf16.mxu0 %v5337_v59  ;;  %4792 = vmatprep.subr.bf16.mxu1 %v5337_v59  ;;  %v823_v25 = vld [vmem:[#allocation4 + $0xa0] sm:$0xff]  ;;  %v4979_v27 = vld [vmem:[#allocation11 + $0x1fc] ss:$12 sps:$4 sm:$0xff]   ;;  %v825_v32 = vld [vmem:[#allocation4 + $0xb0] sm:$0xff] }
  0xe5   : > { %v824_v35 = vld [vmem:[#allocation4 + $0xa8] sm:$0xff]  ;;  %v4982_v28 = vld [vmem:[#allocation11 + $0x1f8] ss:$12 sps:$4 sm:$0xff]   ;;  %v4985_v37 = vld [vmem:[#allocation11 + $0x214] ss:$12 sps:$4 sm:$0xff]  }
  0xe6   : > { %v4981_v36 = vld [vmem:[#allocation11 + $0x48] ss:$12 sps:$4 sm:$0xff]   ;;  %v4983_v33 = vld [vmem:[#allocation11 + $0x64] ss:$12 sps:$4 sm:$0xff]   ;;  %v826_v38 = vld [vmem:[#allocation4 + $0xb8] sm:$0xff] }
  0xe7   : > { %1218 = vmatpush1.bf16.msra.mxu0 %v806_v0  ;;  %4808 = vmatpush1.bf16.msra.mxu1 %v806_v0  ;;  %v4987_v42 = vld [vmem:[#allocation11 + $0x60] ss:$12 sps:$4 sm:$0xff]   ;;  %v4988_v43 = vld [vmem:[#allocation11 + $0x210] ss:$12 sps:$4 sm:$0xff]   ;;  %v4993_v40 = vld [vmem:[#allocation11 + $0x78] ss:$12 sps:$4 sm:$0xff]  }
  0xe8   : > { %1219 = vmatprep.subr.bf16.mxu0 %v5337_v59  ;;  %4793 = vmatprep.subr.bf16.mxu1 %v5337_v59  ;;  %v4989_v34 = vld [vmem:[#allocation11 + $0x7c] ss:$12 sps:$4 sm:$0xff]   ;;  %v4991_v39 = vld [vmem:[#allocation11 + $0x22c] ss:$12 sps:$4 sm:$0xff]   ;;  %v4995_v44 = vld [vmem:[#allocation11 + $0x94] ss:$12 sps:$4 sm:$0xff]  }
  0xe9   : > { %v4994_v41 = vld [vmem:[#allocation11 + $0x228] ss:$12 sps:$4 sm:$0xff]   ;;  %v4998_v46 = vld [vmem:[#allocation11 + $0x90] ss:$12 sps:$4 sm:$0xff]   ;;  %v4999_v47 = vld [vmem:[#allocation11 + $0x20] ss:$12 sps:$4 sm:$0xff]  }
  0xea   : > { %v4997_v45 = vld [vmem:[#allocation11 + $0x8] ss:$12 sps:$4 sm:$0xff]   ;;  %v5000_v48 = vld [vmem:[#allocation11 + $0xac] ss:$12 sps:$4 sm:$0xff]   ;;  %v5004_v51 = vld [vmem:[#allocation11 + $0x50] ss:$12 sps:$4 sm:$0xff]  }
  0xeb   : > { %1220 = vmatpush1.bf16.msra.mxu0 %v807_v1  ;;  %4809 = vmatpush1.bf16.msra.mxu1 %v807_v1  ;;  %v5002_v49 = vld [vmem:[#allocation11 + $0x38] ss:$12 sps:$4 sm:$0xff]   ;;  %v5003_v50 = vld [vmem:[#allocation11 + $0xa8] ss:$12 sps:$4 sm:$0xff]   ;;  %v5008_v54 = vld [vmem:[#allocation11 + $0xc0] ss:$12 sps:$4 sm:$0xff]  }
  0xec   : > { %1221 = vmatprep.subr.bf16.mxu0 %v5337_v59  ;;  %4794 = vmatprep.subr.bf16.mxu1 %v5337_v59  ;;  %v5005_v52 = vld [vmem:[#allocation11 + $0xc4] ss:$12 sps:$4 sm:$0xff]   ;;  %v5007_v53 = vld [vmem:[#allocation11 + $0x68] ss:$12 sps:$4 sm:$0xff]   ;;  %v5009_v55 = vld [vmem:[#allocation11 + $0x80] ss:$12 sps:$4 sm:$0xff]  }
  0xed   : > { %v5010_v56 = vld [vmem:[#allocation11 + $0xdc] ss:$12 sps:$4 sm:$0xff]   ;;  %v5012_v57 = vld [vmem:[#allocation11 + $0x98] ss:$12 sps:$4 sm:$0xff]   ;;  %v5019_v62 = vld [vmem:[#allocation11 + $0xe0] ss:$12 sps:$4 sm:$0xff]  }
  0xee   : > { %v5013_v58 = vld [vmem:[#allocation11 + $0xd8] ss:$12 sps:$4 sm:$0xff]   ;;  %v5014_v31 = vld [vmem:[#allocation11 + $0xb0] ss:$12 sps:$4 sm:$0xff]   ;;  %v5017_v60 = vld [vmem:[#allocation11 + $0xc8] ss:$12 sps:$4 sm:$0xff]  }
  0xef   : > { %1222 = vmatpush1.bf16.msra.mxu0 %v808_v2  ;;  %4810 = vmatpush1.bf16.msra.mxu1 %v808_v2  ;;  %v5018_v61 = vld [vmem:[#allocation11 + $0xf0] ss:$12 sps:$4 sm:$0xff]   ;;  %v5020_v63 = vld [vmem:[#allocation11 + $0x10c] ss:$12 sps:$4 sm:$0xff]   ;;  %v5023_v1 = vld [vmem:[#allocation11 + $0x108] ss:$12 sps:$4 sm:$0xff]  }
  0xf0   : > { %1223 = vmatprep.subr.bf16.mxu0 %v5337_v59  ;;  %4795 = vmatprep.subr.bf16.mxu1 %v5337_v59  ;;  %v5022_v0 = vld [vmem:[#allocation11 + $0xf8] ss:$12 sps:$4 sm:$0xff]   ;;  %v5024_v2 = vld [vmem:[#allocation11 + $0x110] ss:$12 sps:$4 sm:$0xff]  }
  0xf3   : > { %1224 = vmatpush1.bf16.msra.mxu0 %v809_v3  ;;  %4811 = vmatpush1.bf16.msra.mxu1 %v809_v3  ;;  %v5025_v3 = vld [vmem:[#allocation11 + $0x124] ss:$12 sps:$4 sm:$0xff]  }
  0xf4   : > { %1225 = vmatprep.subr.bf16.mxu0 %v5337_v59  ;;  %4796 = vmatprep.subr.bf16.mxu1 %v5337_v59 }
  0xf7   : > { %1226 = vmatpush1.bf16.msra.mxu0 %v810_v4  ;;  %4812 = vmatpush1.bf16.msra.mxu1 %v810_v4  ;;  %v5027_v4 = vld [vmem:[#allocation11 + $0x128] ss:$12 sps:$4 sm:$0xff]  }
  0xf8   : > { %1227 = vmatprep.subr.bf16.mxu0 %v5337_v59  ;;  %4797 = vmatprep.subr.bf16.mxu1 %v5337_v59 }
  0xfb   : > { %1228 = vmatpush1.bf16.msra.mxu0 %v811_v5  ;;  %4813 = vmatpush1.bf16.msra.mxu1 %v811_v5  ;;  %v5028_v5 = vld [vmem:[#allocation11 + $0x120] ss:$12 sps:$4 sm:$0xff]  }
  0xfc   : > { %1229 = vmatprep.subr.bf16.mxu0 %v5337_v59  ;;  %4798 = vmatprep.subr.bf16.mxu1 %v5337_v59 }
  0xff   : > { %1230 = vmatpush1.bf16.msra.mxu0 %v812_v6  ;;  %4814 = vmatpush1.bf16.msra.mxu1 %v812_v6  ;;  %v5029_v6 = vld [vmem:[#allocation11 + $0x140] ss:$12 sps:$4 sm:$0xff]  }
 0x100   : > { %1231 = vmatprep.subr.bf16.mxu0 %v5337_v59  ;;  %4799 = vmatprep.subr.bf16.mxu1 %v5337_v59 }
 0x103   : > { %1232 = vmatpush1.bf16.msra.mxu0 %v813_v7  ;;  %4815 = vmatpush1.bf16.msra.mxu1 %v813_v7  ;;  %v5030_v7 = vld [vmem:[#allocation11 + $0x13c] ss:$12 sps:$4 sm:$0xff]  }
 0x104   : > { %1233 = vmatprep.subr.bf16.mxu0 %v5337_v59  ;;  %4800 = vmatprep.subr.bf16.mxu1 %v5337_v59 }
 0x107   : > { %1234 = vmatpush1.bf16.msra.mxu0 %v814_v8  ;;  %4816 = vmatpush1.bf16.msra.mxu1 %v814_v8  ;;  %v5032_v8 = vld [vmem:[#allocation11 + $0x158] ss:$12 sps:$4 sm:$0xff]  }
 0x108   : > { %1235 = vmatprep.subr.bf16.mxu0 %v5337_v59  ;;  %4801 = vmatprep.subr.bf16.mxu1 %v5337_v59 }
 0x10b   : > { %1236 = vmatpush1.bf16.msra.mxu0 %v815_v9  ;;  %4817 = vmatpush1.bf16.msra.mxu1 %v815_v9  ;;  %v5033_v9 = vld [vmem:[#allocation11 + $0x138] ss:$12 sps:$4 sm:$0xff]  }
 0x10c   : > { %1237 = vmatprep.subr.bf16.mxu0 %v5337_v59  ;;  %4802 = vmatprep.subr.bf16.mxu1 %v5337_v59 }
 0x10f   : > { %1238 = vmatpush1.bf16.msra.mxu0 %v816_v10  ;;  %4818 = vmatpush1.bf16.msra.mxu1 %v816_v10  ;;  %v5034_v10 = vld [vmem:[#allocation11 + $0x170] ss:$12 sps:$4 sm:$0xff]  }
 0x110   : > { %1239 = vmatprep.subr.bf16.mxu0 %v5337_v59  ;;  %4803 = vmatprep.subr.bf16.mxu1 %v5337_v59 }
 0x113   : > { %1240 = vmatpush1.bf16.msra.mxu0 %v817_v11  ;;  %4819 = vmatpush1.bf16.msra.mxu1 %v817_v11  ;;  %v5035_v11 = vld [vmem:[#allocation11 + $0x154] ss:$12 sps:$4 sm:$0xff]  }
 0x114   : > { %1241 = vmatprep.subr.bf16.mxu0 %v5337_v59  ;;  %4804 = vmatprep.subr.bf16.mxu1 %v5337_v59  ;;  %v5015_v59 = vld [vmem:[#allocation11 + $0xf4] ss:$12 sps:$4 sm:$0xff]  }
 0x117   : > { %1242 = vmatpush1.bf16.msra.mxu0 %v818_v12  ;;  %4820 = vmatpush1.bf16.msra.mxu1 %v818_v12  ;;  %v5037_v12 = vld [vmem:[#allocation11 + $0x188] ss:$12 sps:$4 sm:$0xff]  }
 0x118   : > { %4597 = vmatprep.subr.bf16.mxu1 %v819_v15 }
 0x11a   : > { %1244 = vmatmul.mubr.bf16.vlgmr.msra.gmra.mrb[0].mxu0 %v4959_v13  ;;  %1388 = vmatmul.mubr.bf16.vlgmr.msra.gmra.mrb[0].mxu1 %v4962_v14  ;;  %v5038_v13 = vld [vmem:[#allocation11 + $0x150] ss:$12 sps:$4 sm:$0xff]   ;;  %v5039_v14 = vld [vmem:[#allocation11 + $0x1a0] ss:$12 sps:$4 sm:$0xff]  }
 0x11b   : > { %4598 = vmatpush3.bf16.msra.mxu1 %v819_v15  ;;  %1251 = vmatprep.mubr.bf16.mxu0 %v4965_v16  ;;  %v5040_v15 = vld [vmem:[#allocation11 + $0x16c] ss:$12 sps:$4 sm:$0xff]  }
 0x11c   : > { %4599 = vmatprep.subr.bf16.mxu1 %v820_v18  ;;  %1395 = vmatprep.mubr.bf16.mxu1 %v4967_v17  ;;  %v5042_v16 = vld [vmem:[#allocation11 + $0x1b8] ss:$12 sps:$4 sm:$0xff]   ;;  %v5043_v17 = vld [vmem:[#allocation11 + $0x168] ss:$12 sps:$4 sm:$0xff]  }
 0x11f   : > { %4600 = vmatpush3.bf16.msra.mxu1 %v820_v18  ;;  %v5044_v18 = vld [vmem:[#allocation11 + $0x1d0] ss:$12 sps:$4 sm:$0xff]  }
 0x120   : > { %4601 = vmatprep.subr.bf16.mxu1 %v821_v19 }
 0x122   : > { %1252 = vmatmul.mubr.bf16.gmra.mrb[4].mxu0 %v4969_v20  ;;  %1396 = vmatmul.mubr.bf16.gmra.mrb[4].mxu1 %v4970_v21  ;;  %v5047_v20 = vld [vmem:[#allocation11 + $0x1e8] ss:$12 sps:$4 sm:$0xff]   ;;  %v5048_v21 = vld [vmem:[#allocation11 + $0x180] ss:$12 sps:$4 sm:$0xff]  }
 0x123   : > { %4602 = vmatpush3.bf16.msra.mxu1 %v821_v19  ;;  %1259 = vmatprep.mubr.bf16.mxu0 %v4971_v22  ;;  %v5045_v19 = vld [vmem:[#allocation11 + $0x184] ss:$12 sps:$4 sm:$0xff]   ;;  %v5049_v22 = vld [vmem:[#allocation11 + $0x200] ss:$12 sps:$4 sm:$0xff]  }
 0x124   : > { %1403 = vmatprep.mubr.bf16.mxu1 %v4973_v23  ;;  %4603 = vmatprep.subr.bf16.mxu1 %v822_v24  ;;  %v5050_v23 = vld [vmem:[#allocation11 + $0x19c] ss:$12 sps:$4 sm:$0xff]  }
 0x127   : > { %4604 = vmatpush3.bf16.msra.mxu1 %v822_v24  ;;  %v5052_v24 = vld [vmem:[#allocation11 + $0x218] ss:$12 sps:$4 sm:$0xff]  }
 0x128   : > { %4605 = vmatprep.subr.bf16.mxu1 %v823_v25 }
 0x12a   : > { %1260 = vmatmul.mubr.bf16.gmra.mrb[8].mxu0 %v4975_v29  ;;  %1404 = vmatmul.mubr.bf16.gmra.mrb[8].mxu1 %v4976_v30  ;;  %v5054_v29 = vld [vmem:[#allocation11 + $0x230] ss:$12 sps:$4 sm:$0xff]  }
 0x12b   : > { %1267 = vmatprep.mubr.bf16.mxu0 %v4977_v26  ;;  %1411 = vmatprep.mubr.bf16.mxu1 %v4979_v27 }
 0x12c   : > { %4606 = vmatpush3.bf16.msra.mxu1 %v823_v25  ;;  %v5053_v25 = vld [vmem:[#allocation11 + $0x198] ss:$12 sps:$4 sm:$0xff]  }
 0x12d   : > { %4607 = vmatprep.subr.bf16.mxu1 %v824_v35 }
 0x130   : > { %4608 = vmatpush3.bf16.msra.mxu1 %v824_v35 }
 0x131   : > { %4609 = vmatprep.subr.bf16.mxu1 %v825_v32 }
 0x132   : > { %1268 = vmatmul.mubr.bf16.gmra.mrb[12].mxu0 %v4981_v36  ;;  %1412 = vmatmul.mubr.bf16.gmra.mrb[12].mxu1 %v4982_v28 }
 0x133   : > { %1275 = vmatprep.mubr.bf16.mxu0 %v4983_v33  ;;  %1419 = vmatprep.mubr.bf16.mxu1 %v4985_v37 }
 0x134   : > { %4610 = vmatpush3.bf16.msra.mxu1 %v825_v32 }
 0x135   : > { %4611 = vmatprep.subr.bf16.mxu1 %v826_v38 }
 0x138   : > { %4612 = vmatpush3.bf16.msra.mxu1 %v826_v38 }
 0x13a   : > { %1276 = vmatmul.mubr.bf16.gmra.mrb[16].mxu0 %v4987_v42  ;;  %1420 = vmatmul.mubr.bf16.gmra.mrb[16].mxu1 %v4988_v43 }
 0x13b   : > { %1283 = vmatprep.mubr.bf16.mxu0 %v4989_v34  ;;  %1427 = vmatprep.mubr.bf16.mxu1 %v4991_v39 }
 0x142   : > { %1284 = vmatmul.mubr.bf16.gmra.mrb[20].mxu0 %v4993_v40  ;;  %1428 = vmatmul.mubr.bf16.gmra.mrb[20].mxu1 %v4994_v41 }
 0x143   : > { %1291 = vmatprep.mubr.bf16.mxu0 %v4995_v44  ;;  %4613 = vmatprep.mubr.bf16.mxu1 %v4997_v45 }
 0x14a   : > { %1292 = vmatmul.mubr.bf16.gmra.mrb[24].mxu0 %v4998_v46  ;;  %4614 = vmatmul.mubr.bf16.vlgmr.msra.gmra.mrb[24].mxu1 %v4999_v47 }
 0x14b   : > { %1299 = vmatprep.mubr.bf16.mxu0 %v5000_v48  ;;  %4617 = vmatprep.mubr.bf16.mxu1 %v5002_v49 }
 0x152   : > { %1300 = vmatmul.mubr.bf16.gmra.mrb[28].mxu0 %v5003_v50  ;;  %4618 = vmatmul.mubr.bf16.gmra.mrb[28].mxu1 %v5004_v51 }
 0x153   : > { %1307 = vmatprep.mubr.bf16.mxu0 %v5005_v52  ;;  %4621 = vmatprep.mubr.bf16.mxu1 %v5007_v53 }
 0x15a   : > { %1308 = vmatmul.mubr.bf16.gmra.mrb[32].mxu0 %v5008_v54  ;;  %4622 = vmatmul.mubr.bf16.gmra.mrb[32].mxu1 %v5009_v55 }
 0x15b   : > { %1315 = vmatprep.mubr.bf16.mxu0 %v5010_v56  ;;  %4625 = vmatprep.mubr.bf16.mxu1 %v5012_v57 }
 0x162   : > { %1316 = vmatmul.mubr.bf16.gmra.mrb[36].mxu0 %v5013_v58  ;;  %4626 = vmatmul.mubr.bf16.gmra.mrb[36].mxu1 %v5014_v31 }
 0x163   : > { %1323 = vmatprep.mubr.bf16.mxu0 %v5015_v59  ;;  %4629 = vmatprep.mubr.bf16.mxu1 %v5017_v60 }
 0x16a   : > { %1324 = vmatmul.mubr.bf16.gmra.mrb[40].mxu0 %v5018_v61  ;;  %4630 = vmatmul.mubr.bf16.gmra.mrb[40].mxu1 %v5019_v62 }
 0x16b   : > { %1331 = vmatprep.mubr.bf16.mxu0 %v5020_v63  ;;  %4633 = vmatprep.mubr.bf16.mxu1 %v5022_v0 }
 0x172   : > { %1332 = vmatmul.mubr.bf16.gmra.mrb[44].mxu0 %v5023_v1  ;;  %4634 = vmatmul.mubr.bf16.gmra.mrb[44].mxu1 %v5024_v2 }
 0x173   : > { %1339 = vmatprep.mubr.bf16.mxu0 %v5025_v3  ;;  %4637 = vmatprep.mubr.bf16.mxu1 %v5027_v4 }
 0x17a   : > { %1340 = vmatmul.mubr.bf16.gmra.mrb[48].mxu0 %v5028_v5  ;;  %4638 = vmatmul.mubr.bf16.gmra.mrb[48].mxu1 %v5029_v6 }
 0x17b   : > { %1347 = vmatprep.mubr.bf16.mxu0 %v5030_v7  ;;  %4641 = vmatprep.mubr.bf16.mxu1 %v5032_v8 }
 0x182   : > { %1348 = vmatmul.mubr.bf16.gmra.mrb[52].mxu0 %v5033_v9  ;;  %4642 = vmatmul.mubr.bf16.gmra.mrb[52].mxu1 %v5034_v10 }
 0x183   : > { %1355 = vmatprep.mubr.bf16.mxu0 %v5035_v11  ;;  %4645 = vmatprep.mubr.bf16.mxu1 %v5037_v12  ;;  %v708_v12 = vld [vmem:[#allocation2 + $0x10] sm:$0xff] }
 0x18a   : > { %1356 = vmatmul.mubr.bf16.gmra.mrb[56].mxu0 %v5038_v13  ;;  %4646 = vmatmul.mubr.bf16.gmra.mrb[56].mxu1 %v5039_v14 }
 0x18b   : > { %1363 = vmatprep.mubr.bf16.mxu0 %v5040_v15  ;;  %4649 = vmatprep.mubr.bf16.mxu1 %v5042_v16  ;;  %v706_v16 = vld [vmem:[#allocation2] sm:$0xff] }
 0x192   : > { %1364 = vmatmul.mubr.bf16.gmra.mrb[60].mxu0 %v5043_v17  ;;  %4650 = vmatmul.mubr.bf16.gmra.mrb[60].mxu1 %v5044_v18  ;;  %v5893_v18 = vstv %s1710_s8 }
 0x193   : > { %1371 = vmatprep.mubr.bf16.mxu0 %v5045_v19  ;;  %4653 = vmatprep.mubr.bf16.mxu1 %v5047_v20 }
 0x19a   : > { %1372 = vmatmul.mubr.bf16.gmra.mrb[64].mxu0 %v5048_v21  ;;  %4654 = vmatmul.mubr.bf16.gmra.mrb[64].mxu1 %v5049_v22  ;;  %v709_v21 = vld [vmem:[#allocation2 + $0x18] sm:$0xff] }
 0x19b   : > { %1379 = vmatprep.mubr.bf16.mxu0 %v5050_v23  ;;  %4657 = vmatprep.mubr.bf16.mxu1 %v5052_v24 }
 0x1a2   : > { %1380 = vmatmul.mubr.bf16.gmra.mrb[68].mxu0 %v5053_v25  ;;  %4658 = vmatmul.mubr.bf16.gmra.mrb[68].mxu1 %v5054_v29  ;;  %v707_v29 = vld [vmem:[#allocation2 + $0x8] sm:$0xff] }
 0x1ed   : > { %v1245_v30 = vpop.f32.mrb[0].mxu0  ;;  %v5847_v26 = vpop.f32.mrb[0].mxu1 }
 0x1ee   : > { %v1247_v27 = vpop.f32.mrb[1].mxu0  ;;  %v1391_v35 = vpop.f32.mrb[1].mxu1 }
 0x1ef   : > { %v5849_v36 = vpop.f32.mrb[2].mxu0  ;;  %v5851_v28 = vpop.f32.mrb[2].mxu1  ;;  %v757_v35 = vld [vmem:[#allocation3 + $0x10] sm:$0xff] }
 0x1f0   : > { %v1250_v32 = vpop.f32.mrb[3].mxu0  ;;  %v1394_v33 = vpop.f32.mrb[3].mxu1 }
 0x1f5   : > { %v1253_v37 = vpop.f32.mrb[4].mxu0  ;;  %v5853_v38 = vpop.f32.mrb[4].mxu1 }
 0x1f6   : > { %v1255_v42 = vpop.f32.mrb[5].mxu0  ;;  %v1399_v43 = vpop.f32.mrb[5].mxu1 }
 0x1f7   : > { %v1256_v34 = vpop.f32.mrb[6].mxu0  ;;  %v5855_v39 = vpop.f32.mrb[6].mxu1  ;;  %v755_v42 = vld [vmem:[#allocation3] sm:$0xff] }
 0x1f8   : > { %v1258_v40 = vpop.f32.mrb[7].mxu0  ;;  %v1402_v41 = vpop.f32.mrb[7].mxu1 }
 0x1f9   : > { %v5899_v40 = vstv %s1957_s23  ;;  %v758_v41 = vld [vmem:[#allocation3 + $0x18] sm:$0xff] }
 0x1fd   : > { %v5857_v44 = vpop.f32.mrb[8].mxu0  ;;  %v5859_v45 = vpop.f32.mrb[8].mxu1 }
 0x1fe   : > { %v1263_v46 = vpop.f32.mrb[9].mxu0  ;;  %v1407_v47 = vpop.f32.mrb[9].mxu1 }
 0x1ff   : > { %v5861_v48 = vpop.f32.mrb[10].mxu0  ;;  %v5863_v49 = vpop.f32.mrb[10].mxu1 }
 0x200   : > { %v1266_v50 = vpop.f32.mrb[11].mxu0  ;;  %v1410_v51 = vpop.f32.mrb[11].mxu1 }
 0x201   : > { %v756_v50 = vld [vmem:[#allocation3 + $0x8] sm:$0xff]  ;;  %v1911_v51 = vld [vmem:[#allocation6 + $0x10] sm:$0xff] }
 0x205   : > { %v5865_v52 = vpop.f32.mrb[12].mxu0  ;;  %v5867_v53 = vpop.f32.mrb[12].mxu1 }
 0x206   : > { %v1271_v54 = vpop.f32.mrb[13].mxu0  ;;  %v1415_v55 = vpop.f32.mrb[13].mxu1 }
 0x207   : > { %v5869_v56 = vpop.f32.mrb[14].mxu0  ;;  %v5871_v57 = vpop.f32.mrb[14].mxu1 }
 0x208   : > { %v1274_v58 = vpop.f32.mrb[15].mxu0  ;;  %v1418_v31 = vpop.f32.mrb[15].mxu1 }
 0x20d   : > { %v5873_v59 = vpop.f32.mrb[16].mxu0  ;;  %v5875_v60 = vpop.f32.mrb[16].mxu1 }
 0x20e   : > { %v1279_v61 = vpop.f32.mrb[17].mxu0  ;;  %v1423_v62 = vpop.f32.mrb[17].mxu1 }
 0x20f   : > { %v5877_v63 = vpop.f32.mrb[18].mxu0  ;;  %v5879_v0 = vpop.f32.mrb[18].mxu1  ;;  %v1909_v62 = vld [vmem:[#allocation6] sm:$0xff] }
 0x210   : > { %v1282_v1 = vpop.f32.mrb[19].mxu0  ;;  %v1426_v2 = vpop.f32.mrb[19].mxu1 }
 0x215   : > { %v5881_v3 = vpop.f32.mrb[20].mxu0  ;;  %v5883_v4 = vpop.f32.mrb[20].mxu1 }
 0x216   : > { %v1287_v5 = vpop.f32.mrb[21].mxu0  ;;  %v1431_v6 = vpop.f32.mrb[21].mxu1 }
 0x217   : > { %v5886_v7 = vpop.f32.mrb[22].mxu0  ;;  %v5888_v8 = vpop.f32.mrb[22].mxu1  ;;  %v710_v6 = vld [vmem:[#allocation2 + $0x20] sm:$0xff] }
 0x218   : > { %v1290_v9 = vpop.f32.mrb[23].mxu0  ;;  %v1434_v10 = vpop.f32.mrb[23].mxu1 }
 0x21d   : > { %v5891_v11 = vpop.f32.mrb[24].mxu0  ;;  %v4615_v13 = vpop.f32.mrb[24].mxu1 }
 0x21e   : > { %v1479_v14 = vadd.f32 %v4615_v13, %v1253_v37  ;;  %v1295_v15 = vpop.f32.mrb[25].mxu0  ;;  %v1470_v17 = vpop.f32.mrb[25].mxu1 }
 0x21f   : > { %v1471_v19 = vadd.f32 %v1470_v17, %v1245_v30  ;;  %v5895_v20 = vpop.f32.mrb[26].mxu0  ;;  %v4616_v22 = vpop.f32.mrb[26].mxu1 }
 0x220   : > { %v1663_v23 = vsub.f32 %v708_v12, %v1479_v14  ;;  %v1482_v24 = vadd.f32 %v4616_v22, %v1256_v34  ;;  %v1298_v25 = vpop.f32.mrb[27].mxu0  ;;  %v1473_v27 = vpop.f32.mrb[27].mxu1  ;;  %v1912_v12 = vld [vmem:[#allocation6 + $0x18] sm:$0xff]  ;;  %v1910_v22 = vld [vmem:[#allocation6 + $0x8] sm:$0xff] }
 0x221   : > { %v1661_v32 = vsub.f32 %v706_v16, %v1471_v19  ;;  %v1474_v33 = vadd.f32 %v1473_v27, %v5849_v36  ;;  %v712_v36 = vld [vmem:[#allocation2 + $0x30] sm:$0xff] }
 0x222   : > { %v1714_v37 = vmul.f32 %v5893_v18, %v1663_v23  ;;  %v1664_v43 = vsub.f32 %v709_v21, %v1482_v24 }
 0x223   : > { %v1712_v30 = vmul.f32 %v5893_v18, %v1661_v32  ;;  %v1662_v46 = vsub.f32 %v707_v29, %v1474_v33  ;;  %v711_v33 = vld [vmem:[#allocation2 + $0x28] sm:$0xff] }
 0x224   : > { %v1762_v47 = vsub.f32 %v1714_v37, %v757_v35  ;;  %v1715_v34 = vmul.f32 %v5893_v18, %v1664_v43  ;;  %v761_v35 = vld [vmem:[#allocation3 + $0x30] sm:$0xff]  ;;  %v759_v43 = vld [vmem:[#allocation3 + $0x20] sm:$0xff] }
 0x225   : > { %v1760_v54 = vsub.f32 %v1712_v30, %v755_v42  ;;  %v1713_v55 = vmul.f32 %v5893_v18, %v1662_v46  ;;  %v5904_v58 = vpop.f32.mrb[28].mxu0  ;;  %v4619_v31 = vpop.f32.mrb[28].mxu1 }
 0x226   : > { %1810 = vst [vmem:[#allocation3 + $0x10] sm:$0xff] %v1762_v47  ;;  %v1961_v61 = vmul.f32 %v5899_v40, %v1762_v47  ;;  %v1763_v1 = vsub.f32 %v1715_v34, %v758_v41  ;;  %v1495_v2 = vadd.f32 %v4619_v31, %v5865_v52  ;;  %v1303_v5 = vpop.f32.mrb[29].mxu0  ;;  %v1486_v9 = vpop.f32.mrb[29].mxu1  ;;  %v760_v31 = vld [vmem:[#allocation3 + $0x28] sm:$0xff] }
 0x227   : > { %1808 = vst [vmem:[#allocation3] sm:$0xff] %v1760_v54  ;;  %v1959_v10 = vmul.f32 %v5899_v40, %v1760_v54  ;;  %v1761_v13 = vsub.f32 %v1713_v55, %v756_v50  ;;  %v1487_v14 = vadd.f32 %v1486_v9, %v5857_v44  ;;  %v5910_v15 = vpop.f32.mrb[30].mxu0  ;;  %v4620_v16 = vpop.f32.mrb[30].mxu1  ;;  %v713_v44 = vld [vmem:[#allocation2 + $0x38] sm:$0xff]  ;;  %v1915_v55 = vld [vmem:[#allocation6 + $0x30] sm:$0xff] }
 0x228   : > { %v2009_v17 = vadd.f32 %v1961_v61, %v1911_v51  ;;  %1811 = vst [vmem:[#allocation3 + $0x18] sm:$0xff] %v1763_v1  ;;  %v1857_v19 = vpack.c.bf16 %v1763_v1, %v1762_v47  ;;  %v1962_v21 = vmul.f32 %v5899_v40, %v1763_v1  ;;  %v1667_v52 = vsub.f32 %v712_v36, %v1495_v2  ;;  %v1306_v23 = vpop.f32.mrb[31].mxu0  ;;  %v1489_v24 = vpop.f32.mrb[31].mxu1  ;;  %v762_v50 = vld [vmem:[#allocation3 + $0x38] sm:$0xff]  ;;  %v1913_v1 = vld [vmem:[#allocation6 + $0x20] sm:$0xff] }
 0x229   : > { %v2007_v25 = vadd.f32 %v1959_v10, %v1909_v62  ;;  %1809 = vst [vmem:[#allocation3 + $0x8] sm:$0xff] %v1761_v13  ;;  %v1856_v29 = vpack.c.bf16 %v1761_v13, %v1760_v54  ;;  %v1960_v27 = vmul.f32 %v5899_v40, %v1761_v13  ;;  %v1665_v32 = vsub.f32 %v710_v6, %v1487_v14  ;;  %v716_v62 = vld [vmem:[#allocation2 + $0x50] sm:$0xff]  ;;  %v714_v10 = vld [vmem:[#allocation2 + $0x40] sm:$0xff]  ;;  %v717_v23 = vld [vmem:[#allocation2 + $0x58] sm:$0xff] }
 0x22a   : > { %2057 = vst [vmem:[#allocation6 + $0x10] sm:$0xff] %v2009_v17  ;;  %1885 = vst [vmem:[#allocation5 + $0x8] sm:$0xff] %v1857_v19  ;;  %v2010_v37 = vadd.f32 %v1962_v21, %v1912_v12  ;;  %v1718_v42 = vmul.f32 %v5893_v18, %v1667_v52  ;;  %v1498_v30 = vadd.f32 %v4620_v16, %v5869_v56 }
 0x22b   : > { %v1490_v41 = vadd.f32 %v1489_v24, %v5861_v48  ;;  %2055 = vst [vmem:[#allocation6] sm:$0xff] %v2007_v25  ;;  %1884 = vst [vmem:[#allocation5] sm:$0xff] %v1856_v29  ;;  %v2008_v46 = vadd.f32 %v1960_v27, %v1910_v22  ;;  %v1716_v47 = vmul.f32 %v5893_v18, %v1665_v32  ;;  %v715_v25 = vld [vmem:[#allocation2 + $0x48] sm:$0xff]  ;;  %v1916_v27 = vld [vmem:[#allocation6 + $0x38] sm:$0xff] }
 0x22c   : > { %2058 = vst [vmem:[#allocation6 + $0x18] sm:$0xff] %v2010_v37  ;;  %v1766_v34 = vsub.f32 %v1718_v42, %v761_v35  ;;  %v1668_v51 = vsub.f32 %v713_v44, %v1498_v30  ;;  %v1914_v35 = vld [vmem:[#allocation6 + $0x28] sm:$0xff]  ;;  %v765_v30 = vld [vmem:[#allocation3 + $0x50] sm:$0xff] }
 0x22d   : > { %v1666_v54 = vsub.f32 %v711_v33, %v1490_v41  ;;  %2056 = vst [vmem:[#allocation6 + $0x8] sm:$0xff] %v2008_v46  ;;  %v1764_v36 = vsub.f32 %v1716_v47, %v759_v43  ;;  %v5918_v61 = vpop.f32.mrb[32].mxu0  ;;  %v4623_v56 = vpop.f32.mrb[32].mxu1  ;;  %v763_v41 = vld [vmem:[#allocation3 + $0x40] sm:$0xff] }
 0x22e   : > { %1814 = vst [vmem:[#allocation3 + $0x30] sm:$0xff] %v1766_v34  ;;  %v1965_v48 = vmul.f32 %v5899_v40, %v1766_v34  ;;  %v1719_v2 = vmul.f32 %v5893_v18, %v1668_v51  ;;  %v1511_v6 = vadd.f32 %v4623_v56, %v5881_v3  ;;  %v1311_v9 = vpop.f32.mrb[33].mxu0  ;;  %v1502_v12 = vpop.f32.mrb[33].mxu1 }
 0x22f   : > { %v1717_v5 = vmul.f32 %v5893_v18, %v1666_v54  ;;  %1812 = vst [vmem:[#allocation3 + $0x20] sm:$0xff] %v1764_v36  ;;  %v1963_v13 = vmul.f32 %v5899_v40, %v1764_v36  ;;  %v1503_v14 = vadd.f32 %v1502_v12, %v5873_v59  ;;  %v5926_v16 = vpop.f32.mrb[34].mxu0  ;;  %v4624_v17 = vpop.f32.mrb[34].mxu1  ;;  %v764_v54 = vld [vmem:[#allocation3 + $0x48] sm:$0xff] }
 0x230   : > { %v2013_v19 = vadd.f32 %v1965_v48, %v1915_v55  ;;  %v1767_v21 = vsub.f32 %v1719_v2, %v762_v50  ;;  %v1671_v52 = vsub.f32 %v716_v62, %v1511_v6  ;;  %v1314_v24 = vpop.f32.mrb[35].mxu0  ;;  %v1505_v29 = vpop.f32.mrb[35].mxu1  ;;  %v1514_v44 = vadd.f32 %v4624_v17, %v5886_v7  ;;  %v720_v48 = vld [vmem:[#allocation2 + $0x70] sm:$0xff] }
 0x231   : > { %v1765_v22 = vsub.f32 %v1717_v5, %v760_v31  ;;  %v2011_v3 = vadd.f32 %v1963_v13, %v1913_v1  ;;  %v1669_v32 = vsub.f32 %v714_v10, %v1503_v14  ;;  %v1506_v33 = vadd.f32 %v1505_v29, %v5877_v63  ;;  %v1919_v2 = vld [vmem:[#allocation6 + $0x50] sm:$0xff]  ;;  %v1917_v5 = vld [vmem:[#allocation6 + $0x40] sm:$0xff] }
 0x232   : > { %2061 = vst [vmem:[#allocation6 + $0x30] sm:$0xff] %v2013_v19  ;;  %1815 = vst [vmem:[#allocation3 + $0x38] sm:$0xff] %v1767_v21  ;;  %v1859_v59 = vpack.c.bf16 %v1767_v21, %v1766_v34  ;;  %v1966_v37 = vmul.f32 %v5899_v40, %v1767_v21  ;;  %v1722_v46 = vmul.f32 %v5893_v18, %v1671_v52  ;;  %v766_v34 = vld [vmem:[#allocation3 + $0x58] sm:$0xff]  ;;  %v718_v19 = vld [vmem:[#allocation2 + $0x60] sm:$0xff] }
 0x233   : > { %1813 = vst [vmem:[#allocation3 + $0x28] sm:$0xff] %v1765_v22  ;;  %v1858_v42 = vpack.c.bf16 %v1765_v22, %v1764_v36  ;;  %v1964_v43 = vmul.f32 %v5899_v40, %v1765_v22  ;;  %2059 = vst [vmem:[#allocation6 + $0x20] sm:$0xff] %v2011_v3  ;;  %v1720_v47 = vmul.f32 %v5893_v18, %v1669_v32  ;;  %v1920_v52 = vld [vmem:[#allocation6 + $0x58] sm:$0xff] }
 0x234   : > { %v1672_v50 = vsub.f32 %v717_v23, %v1514_v44  ;;  %v1670_v7 = vsub.f32 %v715_v25, %v1506_v33  ;;  %1887 = vst [vmem:[#allocation5 + $0x18] sm:$0xff] %v1859_v59  ;;  %v2014_v63 = vadd.f32 %v1966_v37, %v1916_v27  ;;  %v1770_v55 = vsub.f32 %v1722_v46, %v765_v30  ;;  %v721_v25 = vld [vmem:[#allocation2 + $0x78] sm:$0xff]  ;;  %v1918_v33 = vld [vmem:[#allocation6 + $0x48] sm:$0xff]  ;;  %v769_v59 = vld [vmem:[#allocation3 + $0x70] sm:$0xff] }
 0x235   : > { %1886 = vst [vmem:[#allocation5 + $0x10] sm:$0xff] %v1858_v42  ;;  %v2012_v51 = vadd.f32 %v1964_v43, %v1914_v35  ;;  %v1768_v31 = vsub.f32 %v1720_v47, %v763_v41  ;;  %v5936_v56 = vpop.f32.mrb[36].mxu0  ;;  %v4627_v1 = vpop.f32.mrb[36].mxu1  ;;  %v719_v30 = vld [vmem:[#allocation2 + $0x68] sm:$0xff]  ;;  %v767_v41 = vld [vmem:[#allocation3 + $0x60] sm:$0xff] }
 0x236   : > { %v1723_v36 = vmul.f32 %v5893_v18, %v1672_v50  ;;  %v1721_v62 = vmul.f32 %v5893_v18, %v1670_v7  ;;  %2062 = vst [vmem:[#allocation6 + $0x38] sm:$0xff] %v2014_v63  ;;  %v1527_v6 = vadd.f32 %v4627_v1, %v5904_v58  ;;  %v1319_v9 = vpop.f32.mrb[37].mxu0  ;;  %v1518_v10 = vpop.f32.mrb[37].mxu1  ;;  %1818 = vst [vmem:[#allocation3 + $0x50] sm:$0xff] %v1770_v55  ;;  %v768_v1 = vld [vmem:[#allocation3 + $0x68] sm:$0xff] }
 0x237   : > { %2060 = vst [vmem:[#allocation6 + $0x28] sm:$0xff] %v2012_v51  ;;  %v1969_v12 = vmul.f32 %v5899_v40, %v1770_v55  ;;  %1816 = vst [vmem:[#allocation3 + $0x40] sm:$0xff] %v1768_v31  ;;  %v1967_v13 = vmul.f32 %v5899_v40, %v1768_v31  ;;  %v1320_v21 = vpop.f32.mrb[38].mxu0  ;;  %v4628_v22 = vpop.f32.mrb[38].mxu1  ;;  %v1519_v24 = vadd.f32 %v1518_v10, %v5891_v11  ;;  %v770_v51 = vld [vmem:[#allocation3 + $0x78] sm:$0xff]  ;;  %v1921_v10 = vld [vmem:[#allocation6 + $0x60] sm:$0xff] }
 0x238   : > { %v1771_v14 = vsub.f32 %v1723_v36, %v766_v34  ;;  %v1769_v17 = vsub.f32 %v1721_v62, %v764_v54  ;;  %v1675_v23 = vsub.f32 %v720_v48, %v1527_v6  ;;  %v1530_v58 = vadd.f32 %v4628_v22, %v5910_v15  ;;  %v1322_v29 = vpop.f32.mrb[39].mxu0  ;;  %v1521_v3 = vpop.f32.mrb[39].mxu1  ;;  %v1923_v34 = vld [vmem:[#allocation6 + $0x70] sm:$0xff]  ;;  %v722_v6 = vld [vmem:[#allocation2 + $0x80] sm:$0xff] }
 0x239   : > { %v2017_v27 = vadd.f32 %v1969_v12, %v1919_v2  ;;  %v2015_v35 = vadd.f32 %v1967_v13, %v1917_v5  ;;  %v1673_v11 = vsub.f32 %v718_v19, %v1519_v24  ;;  %v1522_v47 = vadd.f32 %v1521_v3, %v5895_v20  ;;  %v724_v36 = vld [vmem:[#allocation2 + $0x90] sm:$0xff]  ;;  %v725_v19 = vld [vmem:[#allocation2 + $0x98] sm:$0xff] }
 0x23a   : > { %1819 = vst [vmem:[#allocation3 + $0x58] sm:$0xff] %v1771_v14  ;;  %v1861_v32 = vpack.c.bf16 %v1771_v14, %v1770_v55  ;;  %v1970_v44 = vmul.f32 %v5899_v40, %v1771_v14  ;;  %1817 = vst [vmem:[#allocation3 + $0x48] sm:$0xff] %v1769_v17  ;;  %v1860_v37 = vpack.c.bf16 %v1769_v17, %v1768_v31  ;;  %v1924_v24 = vld [vmem:[#allocation6 + $0x78] sm:$0xff] }
 0x23b   : > { %v1968_v42 = vmul.f32 %v5899_v40, %v1769_v17  ;;  %v1726_v43 = vmul.f32 %v5893_v18, %v1675_v23  ;;  %2065 = vst [vmem:[#allocation6 + $0x50] sm:$0xff] %v2017_v27  ;;  %2063 = vst [vmem:[#allocation6 + $0x40] sm:$0xff] %v2015_v35  ;;  %v1676_v46 = vsub.f32 %v721_v25, %v1530_v58 }
 0x23c   : > { %1889 = vst [vmem:[#allocation5 + $0x28] sm:$0xff] %v1861_v32  ;;  %v2018_v15 = vadd.f32 %v1970_v44, %v1920_v52  ;;  %1888 = vst [vmem:[#allocation5 + $0x20] sm:$0xff] %v1860_v37  ;;  %v1724_v63 = vmul.f32 %v5893_v18, %v1673_v11  ;;  %v1674_v55 = vsub.f32 %v719_v30, %v1522_v47  ;;  %v773_v32 = vld [vmem:[#allocation3 + $0x90] sm:$0xff]  ;;  %v723_v44 = vld [vmem:[#allocation2 + $0x88] sm:$0xff] }
 0x23d   : > { %v2016_v50 = vadd.f32 %v1968_v42, %v1918_v33  ;;  %v1774_v7 = vsub.f32 %v1726_v43, %v769_v59  ;;  %v1727_v54 = vmul.f32 %v5893_v18, %v1676_v46  ;;  %v5949_v31 = vpop.f32.mrb[40].mxu0  ;;  %v4631_v62 = vpop.f32.mrb[40].mxu1  ;;  %v1922_v59 = vld [vmem:[#allocation6 + $0x68] sm:$0xff]  ;;  %v771_v42 = vld [vmem:[#allocation3 + $0x80] sm:$0xff]  ;;  %v774_v46 = vld [vmem:[#allocation3 + $0x98] sm:$0xff] }
 0x23e   : > { %2066 = vst [vmem:[#allocation6 + $0x58] sm:$0xff] %v2018_v15  ;;  %v1772_v20 = vsub.f32 %v1724_v63, %v767_v41  ;;  %v1543_v2 = vadd.f32 %v4631_v62, %v5936_v56  ;;  %v1327_v5 = vpop.f32.mrb[41].mxu0  ;;  %v1534_v9 = vpop.f32.mrb[41].mxu1  ;;  %v1725_v13 = vmul.f32 %v5893_v18, %v1674_v55  ;;  %v1925_v62 = vld [vmem:[#allocation6 + $0x80] sm:$0xff] }
 0x23f   : > { %2064 = vst [vmem:[#allocation6 + $0x48] sm:$0xff] %v2016_v50  ;;  %1822 = vst [vmem:[#allocation3 + $0x70] sm:$0xff] %v1774_v7  ;;  %v1973_v48 = vmul.f32 %v5899_v40, %v1774_v7  ;;  %v1775_v12 = vsub.f32 %v1727_v54, %v770_v51  ;;  %v1535_v14 = vadd.f32 %v1534_v9, %v5918_v61  ;;  %v5955_v17 = vpop.f32.mrb[42].mxu0  ;;  %v4632_v22 = vpop.f32.mrb[42].mxu1  ;;  %v1927_v51 = vld [vmem:[#allocation6 + $0x90] sm:$0xff] }
 0x240   : > { %1820 = vst [vmem:[#allocation3 + $0x60] sm:$0xff] %v1772_v20  ;;  %v1971_v23 = vmul.f32 %v5899_v40, %v1772_v20  ;;  %v1679_v25 = vsub.f32 %v724_v36, %v1543_v2  ;;  %v1546_v56 = vadd.f32 %v4632_v22, %v1320_v21  ;;  %v1330_v58 = vpop.f32.mrb[43].mxu0  ;;  %v1537_v29 = vpop.f32.mrb[43].mxu1  ;;  %v1773_v35 = vsub.f32 %v1725_v13, %v768_v1  ;;  %v728_v1 = vld [vmem:[#allocation2 + $0xb0] sm:$0xff] }
 0x241   : > { %v2021_v52 = vadd.f32 %v1973_v48, %v1923_v34  ;;  %1823 = vst [vmem:[#allocation3 + $0x78] sm:$0xff] %v1775_v12  ;;  %v1863_v3 = vpack.c.bf16 %v1775_v12, %v1774_v7  ;;  %v1974_v27 = vmul.f32 %v5899_v40, %v1775_v12  ;;  %v1677_v61 = vsub.f32 %v722_v6, %v1535_v14  ;;  %v726_v6 = vld [vmem:[#allocation2 + $0xa0] sm:$0xff]  ;;  %v1928_v12 = vld [vmem:[#allocation6 + $0x98] sm:$0xff] }
 0x242   : > { %v2019_v33 = vadd.f32 %v1971_v23, %v1921_v10  ;;  %v1730_v37 = vmul.f32 %v5893_v18, %v1679_v25  ;;  %v1680_v43 = vsub.f32 %v725_v19, %v1546_v56  ;;  %v1538_v11 = vadd.f32 %v1537_v29, %v5926_v16  ;;  %1821 = vst [vmem:[#allocation3 + $0x68] sm:$0xff] %v1773_v35  ;;  %v772_v16 = vld [vmem:[#allocation3 + $0x88] sm:$0xff]  ;;  %v729_v25 = vld [vmem:[#allocation2 + $0xb8] sm:$0xff] }
 0x243   : > { %2069 = vst [vmem:[#allocation6 + $0x70] sm:$0xff] %v2021_v52  ;;  %1891 = vst [vmem:[#allocation5 + $0x38] sm:$0xff] %v1863_v3  ;;  %v2022_v21 = vadd.f32 %v1974_v27, %v1924_v24  ;;  %v1862_v30 = vpack.c.bf16 %v1773_v35, %v1772_v20  ;;  %v1972_v15 = vmul.f32 %v5899_v40, %v1773_v35  ;;  %v1926_v3 = vld [vmem:[#allocation6 + $0x88] sm:$0xff] }
 0x244   : > { %v1728_v41 = vmul.f32 %v5893_v18, %v1677_v61  ;;  %2067 = vst [vmem:[#allocation6 + $0x60] sm:$0xff] %v2019_v33  ;;  %v1778_v47 = vsub.f32 %v1730_v37, %v773_v32  ;;  %v1731_v50 = vmul.f32 %v5893_v18, %v1680_v43  ;;  %v1678_v7 = vsub.f32 %v723_v44, %v1538_v11  ;;  %v727_v61 = vld [vmem:[#allocation2 + $0xa8] sm:$0xff]  ;;  %v775_v37 = vld [vmem:[#allocation3 + $0xa0] sm:$0xff] }
 0x245   : > { %2070 = vst [vmem:[#allocation6 + $0x78] sm:$0xff] %v2022_v21  ;;  %1890 = vst [vmem:[#allocation5 + $0x30] sm:$0xff] %v1862_v30  ;;  %v2020_v63 = vadd.f32 %v1972_v15, %v1922_v59  ;;  %v1333_v54 = vpop.f32.mrb[44].mxu0  ;;  %v4635_v55 = vpop.f32.mrb[44].mxu1  ;;  %v777_v59 = vld [vmem:[#allocation3 + $0xb0] sm:$0xff]  ;;  %v778_v15 = vld [vmem:[#allocation3 + $0xb8] sm:$0xff] }
 0x246   : > { %v1776_v34 = vsub.f32 %v1728_v41, %v771_v42  ;;  %1826 = vst [vmem:[#allocation3 + $0x90] sm:$0xff] %v1778_v47  ;;  %v1977_v36 = vmul.f32 %v5899_v40, %v1778_v47  ;;  %v1779_v48 = vsub.f32 %v1731_v50, %v774_v46  ;;  %v1729_v20 = vmul.f32 %v5893_v18, %v1678_v7  ;;  %v1335_v5 = vpop.f32.mrb[45].mxu0  ;;  %v1550_v9 = vpop.f32.mrb[45].mxu1  ;;  %v776_v7 = vld [vmem:[#allocation3 + $0xa8] sm:$0xff] }
 0x247   : > { %v1559_v2 = vadd.f32 %v4635_v55, %v1333_v54  ;;  %2068 = vst [vmem:[#allocation6 + $0x68] sm:$0xff] %v2020_v63  ;;  %v1551_v13 = vadd.f32 %v1550_v9, %v5949_v31  ;;  %v1336_v14 = vpop.f32.mrb[46].mxu0  ;;  %v4636_v19 = vpop.f32.mrb[46].mxu1 }
 0x248   : > { %1824 = vst [vmem:[#allocation3 + $0x80] sm:$0xff] %v1776_v34  ;;  %v1975_v10 = vmul.f32 %v5899_v40, %v1776_v34  ;;  %v2025_v22 = vadd.f32 %v1977_v36, %v1927_v51  ;;  %1827 = vst [vmem:[#allocation3 + $0x98] sm:$0xff] %v1779_v48  ;;  %v1865_v52 = vpack.c.bf16 %v1779_v48, %v1778_v47  ;;  %v1338_v56 = vpop.f32.mrb[47].mxu0  ;;  %v1553_v58 = vpop.f32.mrb[47].mxu1 }
 0x249   : > { %v1978_v23 = vmul.f32 %v5899_v40, %v1779_v48  ;;  %v1777_v24 = vsub.f32 %v1729_v20, %v772_v16  ;;  %v1683_v27 = vsub.f32 %v728_v1, %v1559_v2  ;;  %v1681_v35 = vsub.f32 %v726_v6, %v1551_v13  ;;  %v730_v20 = vld [vmem:[#allocation2 + $0xc0] sm:$0xff]  ;;  %v1932_v6 = vld [vmem:[#allocation6 + $0xb8] sm:$0xff] }
 0x24a   : > { %v2023_v29 = vadd.f32 %v1975_v10, %v1925_v62  ;;  %v1562_v32 = vadd.f32 %v4636_v19, %v1336_v14  ;;  %2073 = vst [vmem:[#allocation6 + $0x90] sm:$0xff] %v2025_v22  ;;  %1893 = vst [vmem:[#allocation5 + $0x48] sm:$0xff] %v1865_v52  ;;  %v1554_v42 = vadd.f32 %v1553_v58, %v5955_v17  ;;  %v1931_v17 = vld [vmem:[#allocation6 + $0xb0] sm:$0xff]  ;;  %v1930_v52 = vld [vmem:[#allocation6 + $0xa8] sm:$0xff] }
 0x24b   : > { %v2026_v31 = vadd.f32 %v1978_v23, %v1928_v12  ;;  %1825 = vst [vmem:[#allocation3 + $0x88] sm:$0xff] %v1777_v24  ;;  %v1864_v44 = vpack.c.bf16 %v1777_v24, %v1776_v34  ;;  %v1976_v33 = vmul.f32 %v5899_v40, %v1777_v24  ;;  %v1734_v43 = vmul.f32 %v5893_v18, %v1683_v27  ;;  %v1929_v34 = vld [vmem:[#allocation6 + $0xa0] sm:$0xff]  ;;  %v731_v23 = vld [vmem:[#allocation2 + $0xc8] sm:$0xff] }
 0x24c   : > { %2071 = vst [vmem:[#allocation6 + $0x80] sm:$0xff] %v2023_v29  ;;  %v1732_v11 = vmul.f32 %v5893_v18, %v1681_v35  ;;  %v1684_v21 = vsub.f32 %v729_v25, %v1562_v32  ;;  %v1682_v41 = vsub.f32 %v727_v61, %v1554_v42  ;;  %v780_v61 = vld [vmem:[#allocation3 + $0xc8] sm:$0xff] }
 0x24d   : > { %2074 = vst [vmem:[#allocation6 + $0x98] sm:$0xff] %v2026_v31  ;;  %1892 = vst [vmem:[#allocation5 + $0x40] sm:$0xff] %v1864_v44  ;;  %v2024_v30 = vadd.f32 %v1976_v33, %v1926_v3  ;;  %v1782_v46 = vsub.f32 %v1734_v43, %v777_v59  ;;  %v1341_v63 = vpop.f32.mrb[48].mxu0  ;;  %v4639_v51 = vpop.f32.mrb[48].mxu1  ;;  %v779_v3 = vld [vmem:[#allocation3 + $0xc0] sm:$0xff]  ;;  %v732_v31 = vld [vmem:[#allocation2 + $0xd0] sm:$0xff] }
 0x24e   : > { %v1780_v47 = vsub.f32 %v1732_v11, %v775_v37  ;;  %v1735_v50 = vmul.f32 %v5893_v18, %v1684_v21  ;;  %v1733_v16 = vmul.f32 %v5893_v18, %v1682_v41  ;;  %v1343_v54 = vpop.f32.mrb[49].mxu0  ;;  %v1566_v55 = vpop.f32.mrb[49].mxu1  ;;  %v1933_v21 = vld [vmem:[#allocation6 + $0xc0] sm:$0xff] }
 0x24f   : > { %2072 = vst [vmem:[#allocation6 + $0x88] sm:$0xff] %v2024_v30  ;;  %1830 = vst [vmem:[#allocation3 + $0xb0] sm:$0xff] %v1782_v46  ;;  %v1981_v36 = vmul.f32 %v5899_v40, %v1782_v46  ;;  %v1567_v1 = vadd.f32 %v1566_v55, %v1341_v63  ;;  %v1344_v2 = vpop.f32.mrb[50].mxu0  ;;  %v4640_v5 = vpop.f32.mrb[50].mxu1 }
 0x250   : > { %1828 = vst [vmem:[#allocation3 + $0xa0] sm:$0xff] %v1780_v47  ;;  %v1979_v62 = vmul.f32 %v5899_v40, %v1780_v47  ;;  %v1783_v48 = vsub.f32 %v1735_v50, %v778_v15  ;;  %v1781_v9 = vsub.f32 %v1733_v16, %v776_v7  ;;  %v1346_v10 = vpop.f32.mrb[51].mxu0  ;;  %v1569_v12 = vpop.f32.mrb[51].mxu1  ;;  %v733_v50 = vld [vmem:[#allocation2 + $0xd8] sm:$0xff]  ;;  %v781_v16 = vld [vmem:[#allocation3 + $0xd0] sm:$0xff] }
 0x251   : > { %v2029_v13 = vadd.f32 %v1981_v36, %v1931_v17  ;;  %v1685_v56 = vsub.f32 %v730_v20, %v1567_v1  ;;  %v1570_v58 = vadd.f32 %v1569_v12, %v1344_v2  ;;  %v782_v1 = vld [vmem:[#allocation3 + $0xd8] sm:$0xff]  ;;  %v1935_v2 = vld [vmem:[#allocation6 + $0xd0] sm:$0xff] }
 0x252   : > { %v2027_v14 = vadd.f32 %v1979_v62, %v1929_v34  ;;  %1831 = vst [vmem:[#allocation3 + $0xb8] sm:$0xff] %v1783_v48  ;;  %v1867_v19 = vpack.c.bf16 %v1783_v48, %v1782_v46  ;;  %v1982_v22 = vmul.f32 %v5899_v40, %v1783_v48  ;;  %1829 = vst [vmem:[#allocation3 + $0xa8] sm:$0xff] %v1781_v9  ;;  %v1934_v34 = vld [vmem:[#allocation6 + $0xc8] sm:$0xff] }
 0x253   : > { %v1866_v24 = vpack.c.bf16 %v1781_v9, %v1780_v47  ;;  %v1980_v25 = vmul.f32 %v5899_v40, %v1781_v9  ;;  %2077 = vst [vmem:[#allocation6 + $0xb0] sm:$0xff] %v2029_v13  ;;  %v1736_v35 = vmul.f32 %v5893_v18, %v1685_v56  ;;  %v1686_v32 = vsub.f32 %v731_v23, %v1570_v58  ;;  %v1936_v56 = vld [vmem:[#allocation6 + $0xd8] sm:$0xff] }
 0x254   : > { %2075 = vst [vmem:[#allocation6 + $0xa0] sm:$0xff] %v2027_v14  ;;  %1895 = vst [vmem:[#allocation5 + $0x58] sm:$0xff] %v1867_v19  ;;  %v2030_v29 = vadd.f32 %v1982_v22, %v1932_v6  ;;  %v734_v6 = vld [vmem:[#allocation2 + $0xe0] sm:$0xff] }
 0x255   : > { %1894 = vst [vmem:[#allocation5 + $0x50] sm:$0xff] %v1866_v24  ;;  %v2028_v27 = vadd.f32 %v1980_v25, %v1930_v52  ;;  %v1349_v44 = vpop.f32.mrb[52].mxu0  ;;  %v5980_v33 = vpop.f32.mrb[52].mxu1  ;;  %v1784_v59 = vsub.f32 %v1736_v35, %v779_v3  ;;  %v1737_v37 = vmul.f32 %v5893_v18, %v1686_v32  ;;  %v735_v52 = vld [vmem:[#allocation2 + $0xe8] sm:$0xff] }
 0x256   : > { %2078 = vst [vmem:[#allocation6 + $0xb8] sm:$0xff] %v2030_v29  ;;  %v1575_v42 = vadd.f32 %v4639_v51, %v1349_v44  ;;  %v1351_v43 = vpop.f32.mrb[53].mxu0  ;;  %v1582_v11 = vpop.f32.mrb[53].mxu1 }
 0x257   : > { %2076 = vst [vmem:[#allocation6 + $0xa8] sm:$0xff] %v2028_v27  ;;  %v1352_v30 = vpop.f32.mrb[54].mxu0  ;;  %v5983_v15 = vpop.f32.mrb[54].mxu1  ;;  %1832 = vst [vmem:[#allocation3 + $0xc0] sm:$0xff] %v1784_v59  ;;  %v1983_v41 = vmul.f32 %v5899_v40, %v1784_v59  ;;  %v1785_v46 = vsub.f32 %v1737_v37, %v780_v61  ;;  %v783_v61 = vld [vmem:[#allocation3 + $0xe0] sm:$0xff]  ;;  %v784_v37 = vld [vmem:[#allocation3 + $0xe8] sm:$0xff] }
 0x258   : > { %v1687_v47 = vsub.f32 %v732_v31, %v1575_v42  ;;  %v1578_v7 = vadd.f32 %v4640_v5, %v1352_v30  ;;  %v1354_v63 = vpop.f32.mrb[55].mxu0  ;;  %v1585_v17 = vpop.f32.mrb[55].mxu1 }
 0x259   : > { %v2031_v54 = vadd.f32 %v1983_v41, %v1933_v21  ;;  %1833 = vst [vmem:[#allocation3 + $0xc8] sm:$0xff] %v1785_v46  ;;  %v1868_v51 = vpack.c.bf16 %v1785_v46, %v1784_v59  ;;  %v1984_v55 = vmul.f32 %v5899_v40, %v1785_v46  ;;  %v736_v21 = vld [vmem:[#allocation2 + $0xf0] sm:$0xff] }
 0x25a   : > { %v1738_v36 = vmul.f32 %v5893_v18, %v1687_v47  ;;  %v1688_v62 = vsub.f32 %v733_v50, %v1578_v7  ;;  %v744_v7 = vld [vmem:[#allocation2 + $0x130] sm:$0xff] }
 0x25b   : > { %2079 = vst [vmem:[#allocation6 + $0xc0] sm:$0xff] %v2031_v54  ;;  %1896 = vst [vmem:[#allocation5 + $0x60] sm:$0xff] %v1868_v51  ;;  %v2032_v48 = vadd.f32 %v1984_v55, %v1934_v34  ;;  %v742_v34 = vld [vmem:[#allocation2 + $0x120] sm:$0xff]  ;;  %v1938_v54 = vld [vmem:[#allocation6 + $0xe8] sm:$0xff] }
 0x25c   : > { %v1786_v20 = vsub.f32 %v1738_v36, %v781_v16  ;;  %v1739_v5 = vmul.f32 %v5893_v18, %v1688_v62 }
 0x25d   : > { %v1357_v9 = vpop.f32.mrb[56].mxu0  ;;  %v5989_v10 = vpop.f32.mrb[56].mxu1  ;;  %2080 = vst [vmem:[#allocation6 + $0xc8] sm:$0xff] %v2032_v48 }
 0x25e   : > { %1834 = vst [vmem:[#allocation3 + $0xd0] sm:$0xff] %v1786_v20  ;;  %v1985_v12 = vmul.f32 %v5899_v40, %v1786_v20  ;;  %v1583_v13 = vadd.f32 %v1582_v11, %v1357_v9  ;;  %v1359_v14 = vpop.f32.mrb[57].mxu0  ;;  %v5992_v19 = vpop.f32.mrb[57].mxu1  ;;  %v1787_v22 = vsub.f32 %v1739_v5, %v782_v1  ;;  %v1937_v11 = vld [vmem:[#allocation6 + $0xe0] sm:$0xff]  ;;  %v745_v5 = vld [vmem:[#allocation2 + $0x138] sm:$0xff]  ;;  %v785_v9 = vld [vmem:[#allocation3 + $0xf0] sm:$0xff] }
 0x25f   : > { %v1360_v23 = vpop.f32.mrb[58].mxu0  ;;  %v5994_v24 = vpop.f32.mrb[58].mxu1 }
 0x260   : > { %v2033_v25 = vadd.f32 %v1985_v12, %v1935_v2  ;;  %v1689_v58 = vsub.f32 %v734_v6, %v1583_v13  ;;  %v1586_v29 = vadd.f32 %v1585_v17, %v1360_v23  ;;  %v1362_v3 = vpop.f32.mrb[59].mxu0  ;;  %v5996_v27 = vpop.f32.mrb[59].mxu1  ;;  %1835 = vst [vmem:[#allocation3 + $0xd8] sm:$0xff] %v1787_v22  ;;  %v1869_v35 = vpack.c.bf16 %v1787_v22, %v1786_v20  ;;  %v737_v2 = vld [vmem:[#allocation2 + $0xf8] sm:$0xff]  ;;  %v793_v23 = vld [vmem:[#allocation3 + $0x130] sm:$0xff] }
 0x261   : > { %v1986_v32 = vmul.f32 %v5899_v40, %v1787_v22 }
 0x262   : > { %2081 = vst [vmem:[#allocation6 + $0xd0] sm:$0xff] %v2033_v25  ;;  %v1740_v31 = vmul.f32 %v5893_v18, %v1689_v58  ;;  %v1690_v44 = vsub.f32 %v735_v52, %v1586_v29  ;;  %1897 = vst [vmem:[#allocation5 + $0x68] sm:$0xff] %v1869_v35  ;;  %v791_v25 = vld [vmem:[#allocation3 + $0x120] sm:$0xff] }
 0x263   : > { %v2034_v59 = vadd.f32 %v1986_v32, %v1936_v56  ;;  %v1939_v32 = vld [vmem:[#allocation6 + $0xf0] sm:$0xff] }
 0x264   : > { %v1788_v42 = vsub.f32 %v1740_v31, %v783_v61  ;;  %v1741_v43 = vmul.f32 %v5893_v18, %v1690_v44  ;;  %v794_v61 = vld [vmem:[#allocation3 + $0x138] sm:$0xff] }
 0x265   : > { %2082 = vst [vmem:[#allocation6 + $0xd8] sm:$0xff] %v2034_v59  ;;  %v1365_v30 = vpop.f32.mrb[60].mxu0  ;;  %v4651_v41 = vpop.f32.mrb[60].mxu1 }
 0x266   : > { %1836 = vst [vmem:[#allocation3 + $0xe0] sm:$0xff] %v1788_v42  ;;  %v1987_v46 = vmul.f32 %v5899_v40, %v1788_v42  ;;  %v1789_v47 = vsub.f32 %v1741_v43, %v784_v37  ;;  %v1591_v50 = vadd.f32 %v5980_v33, %v1365_v30  ;;  %v1623_v63 = vadd.f32 %v4651_v41, %v5853_v38  ;;  %v1367_v17 = vpop.f32.mrb[61].mxu0  ;;  %v1614_v16 = vpop.f32.mrb[61].mxu1  ;;  %v792_v43 = vld [vmem:[#allocation3 + $0x128] sm:$0xff] }
 0x267   : > { %v1615_v51 = vadd.f32 %v1614_v16, %v5847_v26  ;;  %v1368_v55 = vpop.f32.mrb[62].mxu0  ;;  %v4652_v36 = vpop.f32.mrb[62].mxu1  ;;  %v743_v26 = vld [vmem:[#allocation2 + $0x128] sm:$0xff] }
 0x268   : > { %v2035_v62 = vadd.f32 %v1987_v46, %v1937_v11  ;;  %1837 = vst [vmem:[#allocation3 + $0xe8] sm:$0xff] %v1789_v47  ;;  %v1870_v48 = vpack.c.bf16 %v1789_v47, %v1788_v42  ;;  %v1988_v20 = vmul.f32 %v5899_v40, %v1789_v47  ;;  %v1691_v1 = vsub.f32 %v736_v21, %v1591_v50  ;;  %v1370_v33 = vpop.f32.mrb[63].mxu0  ;;  %v1617_v6 = vpop.f32.mrb[63].mxu1  ;;  %v748_v21 = vld [vmem:[#allocation2 + $0x150] sm:$0xff]  ;;  %v1945_v47 = vld [vmem:[#allocation6 + $0x120] sm:$0xff] }
 0x269   : > { %v1699_v38 = vsub.f32 %v744_v7, %v1623_v63  ;;  %v1697_v12 = vsub.f32 %v742_v34, %v1615_v51  ;;  %v1594_v13 = vadd.f32 %v5983_v15, %v1368_v55  ;;  %v1626_v14 = vadd.f32 %v4652_v36, %v5855_v39  ;;  %v786_v39 = vld [vmem:[#allocation3 + $0xf8] sm:$0xff]  ;;  %v1947_v46 = vld [vmem:[#allocation6 + $0x130] sm:$0xff] }
 0x26a   : > { %2083 = vst [vmem:[#allocation6 + $0xe0] sm:$0xff] %v2035_v62  ;;  %1898 = vst [vmem:[#allocation5 + $0x70] sm:$0xff] %v1870_v48  ;;  %v2036_v22 = vadd.f32 %v1988_v20, %v1938_v54  ;;  %v1742_v52 = vmul.f32 %v5893_v18, %v1691_v1  ;;  %v1618_v56 = vadd.f32 %v1617_v6, %v5851_v28  ;;  %v738_v28 = vld [vmem:[#allocation2 + $0x100] sm:$0xff]  ;;  %v1940_v20 = vld [vmem:[#allocation6 + $0xf8] sm:$0xff] }
 0x26b   : > { %v1750_v58 = vmul.f32 %v5893_v18, %v1699_v38  ;;  %v1748_v29 = vmul.f32 %v5893_v18, %v1697_v12  ;;  %v1692_v3 = vsub.f32 %v737_v2, %v1594_v13  ;;  %v1700_v35 = vsub.f32 %v745_v5, %v1626_v14  ;;  %v1948_v12 = vld [vmem:[#allocation6 + $0x138] sm:$0xff]  ;;  %v1946_v13 = vld [vmem:[#allocation6 + $0x128] sm:$0xff] }
 0x26c   : > { %2084 = vst [vmem:[#allocation6 + $0xe8] sm:$0xff] %v2036_v22  ;;  %v1790_v15 = vsub.f32 %v1742_v52, %v785_v9  ;;  %v1698_v31 = vsub.f32 %v743_v26, %v1618_v56  ;;  %v746_v56 = vld [vmem:[#allocation2 + $0x140] sm:$0xff] }
 0x26d   : > { %v1798_v44 = vsub.f32 %v1750_v58, %v793_v23  ;;  %v1796_v59 = vsub.f32 %v1748_v29, %v791_v25  ;;  %v1743_v37 = vmul.f32 %v5893_v18, %v1692_v3  ;;  %v1751_v42 = vmul.f32 %v5893_v18, %v1700_v35  ;;  %v1373_v11 = vpop.f32.mrb[64].mxu0  ;;  %v4655_v30 = vpop.f32.mrb[64].mxu1  ;;  %v787_v23 = vld [vmem:[#allocation3 + $0x100] sm:$0xff]  ;;  %v797_v25 = vld [vmem:[#allocation3 + $0x150] sm:$0xff] }
 0x26e   : > { %1838 = vst [vmem:[#allocation3 + $0xf0] sm:$0xff] %v1790_v15  ;;  %v1989_v41 = vmul.f32 %v5899_v40, %v1790_v15  ;;  %v1749_v50 = vmul.f32 %v5893_v18, %v1698_v31  ;;  %v1599_v7 = vadd.f32 %v5992_v19, %v1373_v11  ;;  %v1639_v63 = vadd.f32 %v4655_v30, %v5867_v53  ;;  %v1375_v17 = vpop.f32.mrb[65].mxu0  ;;  %v1630_v34 = vpop.f32.mrb[65].mxu1 }
 0x26f   : > { %1846 = vst [vmem:[#allocation3 + $0x130] sm:$0xff] %v1798_v44  ;;  %v1997_v16 = vmul.f32 %v5899_v40, %v1798_v44  ;;  %1844 = vst [vmem:[#allocation3 + $0x120] sm:$0xff] %v1796_v59  ;;  %v1995_v54 = vmul.f32 %v5899_v40, %v1796_v59  ;;  %v1791_v51 = vsub.f32 %v1743_v37, %v786_v39  ;;  %v1376_v36 = vpop.f32.mrb[66].mxu0  ;;  %v4656_v62 = vpop.f32.mrb[66].mxu1 }
 0x270   : > { %v1799_v55 = vsub.f32 %v1751_v42, %v794_v61  ;;  %v2037_v48 = vadd.f32 %v1989_v41, %v1939_v32  ;;  %v1797_v1 = vsub.f32 %v1749_v50, %v792_v43  ;;  %v1693_v2 = vsub.f32 %v738_v28, %v1599_v7  ;;  %v1378_v19 = vpop.f32.mrb[67].mxu0  ;;  %v1633_v33 = vpop.f32.mrb[67].mxu1  ;;  %v749_v32 = vld [vmem:[#allocation2 + $0x158] sm:$0xff]  ;;  %v1941_v41 = vld [vmem:[#allocation6 + $0x100] sm:$0xff] }
 0x271   : > { %v1703_v5 = vsub.f32 %v748_v21, %v1639_v63  ;;  %v2045_v53 = vadd.f32 %v1997_v16, %v1947_v46  ;;  %v2043_v6 = vadd.f32 %v1995_v54, %v1945_v47  ;;  %1839 = vst [vmem:[#allocation3 + $0xf8] sm:$0xff] %v1791_v51  ;;  %v1871_v9 = vpack.c.bf16 %v1791_v51, %v1790_v15  ;;  %v739_v15 = vld [vmem:[#allocation2 + $0x108] sm:$0xff]  ;;  %v752_v21 = vld [vmem:[#allocation2 + $0x170] sm:$0xff] }
 0x272   : > { %v1990_v38 = vmul.f32 %v5899_v40, %v1791_v51  ;;  %1847 = vst [vmem:[#allocation3 + $0x138] sm:$0xff] %v1799_v55  ;;  %2085 = vst [vmem:[#allocation6 + $0xf0] sm:$0xff] %v2037_v48  ;;  %v1875_v14 = vpack.c.bf16 %v1799_v55, %v1798_v44  ;;  %v1998_v26 = vmul.f32 %v5899_v40, %v1799_v55  ;;  %v1951_v46 = vld [vmem:[#allocation6 + $0x150] sm:$0xff]  ;;  %v788_v54 = vld [vmem:[#allocation3 + $0x108] sm:$0xff] }
 0x273   : > { %1845 = vst [vmem:[#allocation3 + $0x128] sm:$0xff] %v1797_v1  ;;  %v1874_v22 = vpack.c.bf16 %v1797_v1, %v1796_v59  ;;  %v1996_v52 = vmul.f32 %v5899_v40, %v1797_v1  ;;  %2093 = vst [vmem:[#allocation6 + $0x130] sm:$0xff] %v2045_v53  ;;  %v1744_v29 = vmul.f32 %v5893_v18, %v1693_v2  ;;  %v747_v59 = vld [vmem:[#allocation2 + $0x148] sm:$0xff]  ;;  %v798_v51 = vld [vmem:[#allocation3 + $0x158] sm:$0xff] }
 0x274   : > { %2091 = vst [vmem:[#allocation6 + $0x120] sm:$0xff] %v2043_v6  ;;  %1899 = vst [vmem:[#allocation5 + $0x78] sm:$0xff] %v1871_v9  ;;  %v2038_v58 = vadd.f32 %v1990_v38, %v1940_v20  ;;  %v1754_v3 = vmul.f32 %v5893_v18, %v1703_v5  ;;  %v1631_v35 = vadd.f32 %v1630_v34, %v5859_v45  ;;  %v740_v45 = vld [vmem:[#allocation2 + $0x110] sm:$0xff]  ;;  %v796_v48 = vld [vmem:[#allocation3 + $0x148] sm:$0xff] }
 0x275   : > { %1903 = vst [vmem:[#allocation5 + $0x98] sm:$0xff] %v1875_v14  ;;  %v2046_v39 = vadd.f32 %v1998_v26, %v1948_v12  ;;  %1902 = vst [vmem:[#allocation5 + $0x90] sm:$0xff] %v1874_v22  ;;  %v2044_v61 = vadd.f32 %v1996_v52, %v1946_v13  ;;  %v1602_v31 = vadd.f32 %v5996_v27, %v1376_v36  ;;  %v1381_v11 = vpop.f32.mrb[68].mxu0  ;;  %v4659_v30 = vpop.f32.mrb[68].mxu1  ;;  %v795_v27 = vld [vmem:[#allocation3 + $0x140] sm:$0xff]  ;;  %v789_v13 = vld [vmem:[#allocation3 + $0x110] sm:$0xff] }
 0x276   : > { %v1642_v44 = vadd.f32 %v4656_v62, %v5871_v57  ;;  %2086 = vst [vmem:[#allocation6 + $0xf8] sm:$0xff] %v2038_v58  ;;  %v6028_v37 = vsub.f32 %v1744_v29, %v787_v23  ;;  %v6030_v42 = vsub.f32 %v1754_v3, %v797_v25  ;;  %v1701_v43 = vsub.f32 %v746_v56, %v1631_v35  ;;  %v1383_v63 = vpop.f32.mrb[69].mxu0  ;;  %v1646_v17 = vpop.f32.mrb[69].mxu1  ;;  %v1949_v9 = vld [vmem:[#allocation6 + $0x140] sm:$0xff]  ;;  %v1942_v23 = vld [vmem:[#allocation6 + $0x108] sm:$0xff]  ;;  %v1952_v25 = vld [vmem:[#allocation6 + $0x158] sm:$0xff] }
 0x277   : > { %v1634_v28 = vadd.f32 %v1633_v33, %v5863_v49  ;;  %2094 = vst [vmem:[#allocation6 + $0x138] sm:$0xff] %v2046_v39  ;;  %2092 = vst [vmem:[#allocation6 + $0x128] sm:$0xff] %v2044_v61  ;;  %v1694_v47 = vsub.f32 %v739_v15, %v1602_v31  ;;  %v1607_v50 = vadd.f32 %v5989_v10, %v1381_v11  ;;  %v1384_v10 = vpop.f32.mrb[70].mxu0  ;;  %v4660_v36 = vpop.f32.mrb[70].mxu1  ;;  %v750_v22 = vld [vmem:[#allocation2 + $0x160] sm:$0xff]  ;;  %v801_v58 = vld [vmem:[#allocation3 + $0x170] sm:$0xff] }
 0x278   : > { %v1704_v57 = vsub.f32 %v749_v32, %v1642_v44  ;;  %v1655_v7 = vadd.f32 %v4659_v30, %v5883_v4  ;;  %1840 = vst [vmem:[#allocation3 + $0x100] sm:$0xff] %v6028_v37  ;;  %v1991_v49 = vmul.f32 %v5899_v40, %v6028_v37  ;;  %1850 = vst [vmem:[#allocation3 + $0x150] sm:$0xff] %v6030_v42  ;;  %v1386_v2 = vpop.f32.mrb[71].mxu0  ;;  %v1649_v5 = vpop.f32.mrb[71].mxu1  ;;  %v1950_v61 = vld [vmem:[#allocation6 + $0x148] sm:$0xff]  ;;  %v741_v31 = vld [vmem:[#allocation2 + $0x118] sm:$0xff] }
 0x279   : > { %v2001_v34 = vmul.f32 %v5899_v40, %v6030_v42  ;;  %v1752_v16 = vmul.f32 %v5893_v18, %v1701_v43  ;;  %v1702_v55 = vsub.f32 %v747_v59, %v1634_v28  ;;  %v1745_v4 = vmul.f32 %v5893_v18, %v1694_v47  ;;  %v790_v63 = vld [vmem:[#allocation3 + $0x118] sm:$0xff] }
 0x27a   : > { %v1755_v62 = vmul.f32 %v5893_v18, %v1704_v57  ;;  %v1695_v20 = vsub.f32 %v740_v45, %v1607_v50  ;;  %v1707_v1 = vsub.f32 %v752_v21, %v1655_v7  ;;  %v2039_v19 = vadd.f32 %v1991_v49, %v1941_v41  ;;  %v753_v21 = vld [vmem:[#allocation2 + $0x178] sm:$0xff]  ;;  %v1955_v41 = vld [vmem:[#allocation6 + $0x170] sm:$0xff]  ;;  %v751_v57 = vld [vmem:[#allocation2 + $0x168] sm:$0xff] }
 0x27b   : > { %v2049_v33 = vadd.f32 %v2001_v34, %v1951_v46  ;;  %v1800_v53 = vsub.f32 %v1752_v16, %v795_v27  ;;  %v1753_v6 = vmul.f32 %v5893_v18, %v1702_v55  ;;  %v1793_v38 = vsub.f32 %v1745_v4, %v788_v54  ;;  %v799_v46 = vld [vmem:[#allocation3 + $0x160] sm:$0xff]  ;;  %v802_v55 = vld [vmem:[#allocation3 + $0x178] sm:$0xff] }
 0x27c   : > { %v1803_v12 = vsub.f32 %v1755_v62, %v798_v51  ;;  %v1746_v14 = vmul.f32 %v5893_v18, %v1695_v20  ;;  %v1758_v26 = vmul.f32 %v5893_v18, %v1707_v1  ;;  %2087 = vst [vmem:[#allocation6 + $0x100] sm:$0xff] %v2039_v19  ;;  %v1647_v29 = vadd.f32 %v1646_v17, %v5875_v60  ;;  %v800_v62 = vld [vmem:[#allocation3 + $0x168] sm:$0xff] }
 0x27d   : > { %2097 = vst [vmem:[#allocation6 + $0x150] sm:$0xff] %v2049_v33  ;;  %1848 = vst [vmem:[#allocation3 + $0x140] sm:$0xff] %v1800_v53  ;;  %v1999_v52 = vmul.f32 %v5899_v40, %v1800_v53  ;;  %v1801_v56 = vsub.f32 %v1753_v6, %v796_v48  ;;  %v1610_v3 = vadd.f32 %v5994_v24, %v1384_v10  ;;  %v1953_v10 = vld [vmem:[#allocation6 + $0x160] sm:$0xff]  ;;  %v1956_v33 = vld [vmem:[#allocation6 + $0x178] sm:$0xff] }
 0x27e   : > { %1841 = vst [vmem:[#allocation3 + $0x108] sm:$0xff] %v1793_v38  ;;  %v1872_v35 = vpack.c.bf16 %v1793_v38, %v6028_v37  ;;  %v1992_v15 = vmul.f32 %v5899_v40, %v1793_v38  ;;  %1851 = vst [vmem:[#allocation3 + $0x158] sm:$0xff] %v1803_v12  ;;  %v1877_v32 = vpack.c.bf16 %v1803_v12, %v6030_v42  ;;  %v1943_v37 = vld [vmem:[#allocation6 + $0x110] sm:$0xff] }
 0x27f   : > { %v2002_v39 = vmul.f32 %v5899_v40, %v1803_v12  ;;  %v2047_v44 = vadd.f32 %v1999_v52, %v1949_v9  ;;  %1849 = vst [vmem:[#allocation3 + $0x148] sm:$0xff] %v1801_v56  ;;  %v1876_v59 = vpack.c.bf16 %v1801_v56, %v1800_v53  ;;  %v2000_v43 = vmul.f32 %v5899_v40, %v1801_v56  ;;  %v1954_v12 = vld [vmem:[#allocation6 + $0x168] sm:$0xff] }
 0x280   : > { %v1794_v60 = vsub.f32 %v1746_v14, %v789_v13  ;;  %1900 = vst [vmem:[#allocation5 + $0x80] sm:$0xff] %v1872_v35  ;;  %v2040_v24 = vadd.f32 %v1992_v15, %v1942_v23  ;;  %1905 = vst [vmem:[#allocation5 + $0xa8] sm:$0xff] %v1877_v32  ;;  %v1806_v45 = vsub.f32 %v1758_v26, %v801_v58 }
 0x281   : > { %v2050_v28 = vadd.f32 %v2002_v39, %v1952_v25  ;;  %v1705_v11 = vsub.f32 %v750_v22, %v1647_v29  ;;  %2095 = vst [vmem:[#allocation6 + $0x140] sm:$0xff] %v2047_v44  ;;  %1904 = vst [vmem:[#allocation5 + $0xa0] sm:$0xff] %v1876_v59  ;;  %v2048_v42 = vadd.f32 %v2000_v43, %v1950_v61 }
 0x282   : > { %1842 = vst [vmem:[#allocation3 + $0x110] sm:$0xff] %v1794_v60  ;;  %v1993_v30 = vmul.f32 %v5899_v40, %v1794_v60  ;;  %v1696_v27 = vsub.f32 %v741_v31, %v1610_v3  ;;  %v1658_v47 = vadd.f32 %v4660_v36, %v5888_v8  ;;  %2088 = vst [vmem:[#allocation6 + $0x108] sm:$0xff] %v2040_v24 }
 0x283   : > { %2098 = vst [vmem:[#allocation6 + $0x158] sm:$0xff] %v2050_v28  ;;  %1854 = vst [vmem:[#allocation3 + $0x170] sm:$0xff] %v1806_v45  ;;  %v2005_v50 = vmul.f32 %v5899_v40, %v1806_v45  ;;  %v1756_v7 = vmul.f32 %v5893_v18, %v1705_v11  ;;  %v1650_v17 = vadd.f32 %v1649_v5, %v5879_v0  ;;  %v1944_v0 = vld [vmem:[#allocation6 + $0x118] sm:$0xff] }
 0x284   : > { %2096 = vst [vmem:[#allocation6 + $0x148] sm:$0xff] %v2048_v42  ;;  %v2041_v49 = vadd.f32 %v1993_v30, %v1943_v37  ;;  %v1747_v34 = vmul.f32 %v5893_v18, %v1696_v27  ;;  %v1708_v16 = vsub.f32 %v753_v21, %v1658_v47 }
 0x285   : > { %v2053_v54 = vadd.f32 %v2005_v50, %v1955_v41  ;;  %v1804_v51 = vsub.f32 %v1756_v7, %v799_v46  ;;  %v1706_v8 = vsub.f32 %v751_v57, %v1650_v17 }
 0x286   : > { %2089 = vst [vmem:[#allocation6 + $0x110] sm:$0xff] %v2041_v49  ;;  %v1795_v36 = vsub.f32 %v1747_v34, %v790_v63  ;;  %v1759_v4 = vmul.f32 %v5893_v18, %v1708_v16 }
 0x287   : > { %2101 = vst [vmem:[#allocation6 + $0x170] sm:$0xff] %v2053_v54  ;;  %1852 = vst [vmem:[#allocation3 + $0x160] sm:$0xff] %v1804_v51  ;;  %v2003_v48 = vmul.f32 %v5899_v40, %v1804_v51  ;;  %v1757_v20 = vmul.f32 %v5893_v18, %v1706_v8 }
 0x288   : > { %1843 = vst [vmem:[#allocation3 + $0x118] sm:$0xff] %v1795_v36  ;;  %v1873_v1 = vpack.c.bf16 %v1795_v36, %v1794_v60  ;;  %v1994_v2 = vmul.f32 %v5899_v40, %v1795_v36  ;;  %v1807_v5 = vsub.f32 %v1759_v4, %v802_v55 }
 0x289   : > { %v2051_v19 = vadd.f32 %v2003_v48, %v1953_v10  ;;  %v1805_v53 = vsub.f32 %v1757_v20, %v800_v62 }
 0x28a   : > { %1901 = vst [vmem:[#allocation5 + $0x88] sm:$0xff] %v1873_v1  ;;  %v2042_v6 = vadd.f32 %v1994_v2, %v1944_v0  ;;  %1855 = vst [vmem:[#allocation3 + $0x178] sm:$0xff] %v1807_v5  ;;  %v1879_v9 = vpack.c.bf16 %v1807_v5, %v1806_v45  ;;  %v2006_v38 = vmul.f32 %v5899_v40, %v1807_v5 }
 0x28b   : > { %2099 = vst [vmem:[#allocation6 + $0x160] sm:$0xff] %v2051_v19  ;;  %1853 = vst [vmem:[#allocation3 + $0x168] sm:$0xff] %v1805_v53  ;;  %v1878_v13 = vpack.c.bf16 %v1805_v53, %v1804_v51  ;;  %v2004_v18 = vmul.f32 %v5899_v40, %v1805_v53 }
 0x28c   : > { %2090 = vst [vmem:[#allocation6 + $0x118] sm:$0xff] %v2042_v6  ;;  %1907 = vst [vmem:[#allocation5 + $0xb8] sm:$0xff] %v1879_v9  ;;  %v2054_v14 = vadd.f32 %v2006_v38, %v1956_v33 }
 0x28d   : > { %1906 = vst [vmem:[#allocation5 + $0xb0] sm:$0xff] %v1878_v13  ;;  %v2052_v26 = vadd.f32 %v2004_v18, %v1954_v12 }
 0x28e   : > { %2102 = vst [vmem:[#allocation6 + $0x178] sm:$0xff] %v2054_v14 }
 0x28f   : > { %2100 = vst [vmem:[#allocation6 + $0x168] sm:$0xff] %v2052_v26 }
 0x290 PF: > { %p2103_p5 = scmp.gt.s32.totalorder %s5316_s15, 0 }
 0x292   : > { %p2105_p11 = pnand %p4343_p12, %p2103_p5 }
 0x293   : > { %v2308_v22 = vld [vmem:[#allocation5] sm:$0xff] (!%p2105_p11)  ;;  %v5338_v52 = vmov (!%p2105_p11), 0   ;;  %v2309_v40 = vld [vmem:[#allocation5 + $0x8] sm:$0xff] (!%p2105_p11)  ;;  %v2310_v25 = vld [vmem:[#allocation5 + $0x10] sm:$0xff] (!%p2105_p11)  ;;  %p3214_p0 = scmp.eq.s32.totalorder (!%p2105_p11), %s5316_s15, 1  ;;  %s3462_s10 = sld [smem:[#allocation7 + %s5316_s15]] (!%p2105_p11) }
 0x294   : > { %2108 = sbr.rel (%p2105_p11) target bundleno = 1098 (0x44a), region = 64  ;;  %2716 = vmatprep.subr.bf16.mxu0 (!%p2105_p11), %v5338_v52  ;;  %4821 = vmatprep.subr.bf16.mxu1 (!%p2105_p11), %v5338_v52  ;;  %v5057_v23 = vld [vmem:[#allocation11 + $0x4] ss:$12 sps:$4 sm:$0xff] (!%p2105_p11)   ;;  %v5060_v56 = vld [vmem:[#allocation11 + $0x1b4] ss:$12 sps:$4 sm:$0xff] (!%p2105_p11)   ;;  %v2311_v58 = vld [vmem:[#allocation5 + $0x18] sm:$0xff] (!%p2105_p11) }
 0x295   : > { %2717 = vmatpush1.bf16.msra.mxu0 (!%p2105_p11), %v2308_v22  ;;  %4837 = vmatpush1.bf16.msra.mxu1 (!%p2105_p11), %v2308_v22  ;;  %v2312_v29 = vld [vmem:[#allocation5 + $0x20] sm:$0xff] (!%p2105_p11)  ;;  %v2313_v3 = vld [vmem:[#allocation5 + $0x28] sm:$0xff] (!%p2105_p11)  ;;  %v2314_v35 = vld [vmem:[#allocation5 + $0x30] sm:$0xff] (!%p2105_p11) }
 0x296   : > { %2718 = vmatprep.subr.bf16.mxu0 (!%p2105_p11), %v5338_v52  ;;  %4822 = vmatprep.subr.bf16.mxu1 (!%p2105_p11), %v5338_v52  ;;  %v2315_v15 = vld [vmem:[#allocation5 + $0x38] sm:$0xff] (!%p2105_p11)  ;;  %v2316_v32 = vld [vmem:[#allocation5 + $0x40] sm:$0xff] (!%p2105_p11)  ;;  %v2317_v39 = vld [vmem:[#allocation5 + $0x48] sm:$0xff] (!%p2105_p11) }
 0x297   : > { %2748 = vmatprep.mubr.bf16.mxu0 (!%p2105_p11), %v5057_v23  ;;  %2892 = vmatprep.mubr.bf16.mxu1 (!%p2105_p11), %v5060_v56  ;;  %v2318_v61 = vld [vmem:[#allocation5 + $0x50] sm:$0xff] (!%p2105_p11)  ;;  %v2319_v31 = vld [vmem:[#allocation5 + $0x58] sm:$0xff] (!%p2105_p11)  ;;  %v2320_v44 = vld [vmem:[#allocation5 + $0x60] sm:$0xff] (!%p2105_p11) }
 0x298   : > { %v2321_v59 = vld [vmem:[#allocation5 + $0x68] sm:$0xff] (!%p2105_p11)  ;;  %v2322_v43 = vld [vmem:[#allocation5 + $0x70] sm:$0xff] (!%p2105_p11)  ;;  %v2323_v60 = vld [vmem:[#allocation5 + $0x78] sm:$0xff] (!%p2105_p11) }
 0x299   : > { %2719 = vmatpush1.bf16.msra.mxu0 (!%p2105_p11), %v2309_v40  ;;  %4838 = vmatpush1.bf16.msra.mxu1 (!%p2105_p11), %v2309_v40  ;;  %v5055_v24 = vld [vmem:[#allocation11] ss:$12 sps:$4 sm:$0xff] (!%p2105_p11)   ;;  %v5058_v28 = vld [vmem:[#allocation11 + $0x1b0] ss:$12 sps:$4 sm:$0xff] (!%p2105_p11)   ;;  %v5065_v30 = vld [vmem:[#allocation11 + $0x18] ss:$12 sps:$4 sm:$0xff] (!%p2105_p11)  }
 0x29a   : > { %2720 = vmatprep.subr.bf16.mxu0 (!%p2105_p11), %v5338_v52  ;;  %4823 = vmatprep.subr.bf16.mxu1 (!%p2105_p11), %v5338_v52  ;;  %v2324_v37 = vld [vmem:[#allocation5 + $0x80] sm:$0xff] (!%p2105_p11)  ;;  %v5061_v45 = vld [vmem:[#allocation11 + $0x1c] ss:$12 sps:$4 sm:$0xff] (!%p2105_p11)   ;;  %v5063_v11 = vld [vmem:[#allocation11 + $0x1cc] ss:$12 sps:$4 sm:$0xff] (!%p2105_p11)  }
 0x29b   : > { %v2325_v21 = vld [vmem:[#allocation5 + $0x88] sm:$0xff]  ;;  %v2326_v42 = vld [vmem:[#allocation5 + $0x90] sm:$0xff]  ;;  %v2327_v47 = vld [vmem:[#allocation5 + $0x98] sm:$0xff]  ;;  %s3215_s9 = scalar_select %p3214_p0, 1.0, 2.0 }
 0x29c   : > { %v5066_v41 = vld [vmem:[#allocation11 + $0x1c8] ss:$12 sps:$4 sm:$0xff]   ;;  %v5069_v27 = vld [vmem:[#allocation11 + $0x1e4] ss:$12 sps:$4 sm:$0xff]   ;;  %v5072_v7 = vld [vmem:[#allocation11 + $0x1e0] ss:$12 sps:$4 sm:$0xff]  }
 0x29d   : > { %2721 = vmatpush1.bf16.msra.mxu0 %v2310_v25  ;;  %4839 = vmatpush1.bf16.msra.mxu1 %v2310_v25  ;;  %v5067_v46 = vld [vmem:[#allocation11 + $0x34] ss:$12 sps:$4 sm:$0xff]   ;;  %v5071_v50 = vld [vmem:[#allocation11 + $0x30] ss:$12 sps:$4 sm:$0xff]   ;;  %v5073_v63 = vld [vmem:[#allocation11 + $0x4c] ss:$12 sps:$4 sm:$0xff]  }
 0x29e   : > { %2722 = vmatprep.subr.bf16.mxu0 %v5338_v52  ;;  %4824 = vmatprep.subr.bf16.mxu1 %v5338_v52  ;;  %v2328_v57 = vld [vmem:[#allocation5 + $0xa0] sm:$0xff]  ;;  %v5075_v17 = vld [vmem:[#allocation11 + $0x1fc] ss:$12 sps:$4 sm:$0xff]   ;;  %v2330_v54 = vld [vmem:[#allocation5 + $0xb0] sm:$0xff] }
 0x29f   : > { %v2329_v49 = vld [vmem:[#allocation5 + $0xa8] sm:$0xff]  ;;  %v5078_v16 = vld [vmem:[#allocation11 + $0x1f8] ss:$12 sps:$4 sm:$0xff]   ;;  %v5081_v55 = vld [vmem:[#allocation11 + $0x214] ss:$12 sps:$4 sm:$0xff]  }
 0x2a0   : > { %v5077_v34 = vld [vmem:[#allocation11 + $0x48] ss:$12 sps:$4 sm:$0xff]   ;;  %v5079_v51 = vld [vmem:[#allocation11 + $0x64] ss:$12 sps:$4 sm:$0xff]   ;;  %v2331_v8 = vld [vmem:[#allocation5 + $0xb8] sm:$0xff] }
 0x2a1   : > { %2723 = vmatpush1.bf16.msra.mxu0 %v2311_v58  ;;  %4840 = vmatpush1.bf16.msra.mxu1 %v2311_v58  ;;  %v5083_v10 = vld [vmem:[#allocation11 + $0x60] ss:$12 sps:$4 sm:$0xff]   ;;  %v5084_v36 = vld [vmem:[#allocation11 + $0x210] ss:$12 sps:$4 sm:$0xff]   ;;  %v5089_v48 = vld [vmem:[#allocation11 + $0x78] ss:$12 sps:$4 sm:$0xff]  }
 0x2a2   : > { %2724 = vmatprep.subr.bf16.mxu0 %v5338_v52  ;;  %4825 = vmatprep.subr.bf16.mxu1 %v5338_v52  ;;  %v5085_v4 = vld [vmem:[#allocation11 + $0x7c] ss:$12 sps:$4 sm:$0xff]   ;;  %v5087_v62 = vld [vmem:[#allocation11 + $0x22c] ss:$12 sps:$4 sm:$0xff]   ;;  %v5091_v20 = vld [vmem:[#allocation11 + $0x94] ss:$12 sps:$4 sm:$0xff]  }
 0x2a3   : > { %v5090_v0 = vld [vmem:[#allocation11 + $0x228] ss:$12 sps:$4 sm:$0xff]   ;;  %v5094_v2 = vld [vmem:[#allocation11 + $0x90] ss:$12 sps:$4 sm:$0xff]   ;;  %v5095_v5 = vld [vmem:[#allocation11 + $0x20] ss:$12 sps:$4 sm:$0xff]  }
 0x2a4   : > { %v5093_v1 = vld [vmem:[#allocation11 + $0x8] ss:$12 sps:$4 sm:$0xff]   ;;  %v5096_v19 = vld [vmem:[#allocation11 + $0xac] ss:$12 sps:$4 sm:$0xff]   ;;  %v5100_v6 = vld [vmem:[#allocation11 + $0x50] ss:$12 sps:$4 sm:$0xff]  }
 0x2a5   : > { %2725 = vmatpush1.bf16.msra.mxu0 %v2312_v29  ;;  %4841 = vmatpush1.bf16.msra.mxu1 %v2312_v29  ;;  %v5098_v33 = vld [vmem:[#allocation11 + $0x38] ss:$12 sps:$4 sm:$0xff]   ;;  %v5099_v53 = vld [vmem:[#allocation11 + $0xa8] ss:$12 sps:$4 sm:$0xff]   ;;  %v5104_v12 = vld [vmem:[#allocation11 + $0xc0] ss:$12 sps:$4 sm:$0xff]  }
 0x2a6   : > { %2726 = vmatprep.subr.bf16.mxu0 %v5338_v52  ;;  %4826 = vmatprep.subr.bf16.mxu1 %v5338_v52  ;;  %v5101_v9 = vld [vmem:[#allocation11 + $0xc4] ss:$12 sps:$4 sm:$0xff]   ;;  %v5103_v38 = vld [vmem:[#allocation11 + $0x68] ss:$12 sps:$4 sm:$0xff]   ;;  %v5105_v13 = vld [vmem:[#allocation11 + $0x80] ss:$12 sps:$4 sm:$0xff]  }
 0x2a7   : > { %v5106_v18 = vld [vmem:[#allocation11 + $0xdc] ss:$12 sps:$4 sm:$0xff]   ;;  %v5108_v14 = vld [vmem:[#allocation11 + $0x98] ss:$12 sps:$4 sm:$0xff]   ;;  %v5115_v25 = vld [vmem:[#allocation11 + $0xe0] ss:$12 sps:$4 sm:$0xff]  }
 0x2a8   : > { %v5109_v26 = vld [vmem:[#allocation11 + $0xd8] ss:$12 sps:$4 sm:$0xff]   ;;  %v5110_v22 = vld [vmem:[#allocation11 + $0xb0] ss:$12 sps:$4 sm:$0xff]   ;;  %v5113_v40 = vld [vmem:[#allocation11 + $0xc8] ss:$12 sps:$4 sm:$0xff]  }
 0x2a9   : > { %2727 = vmatpush1.bf16.msra.mxu0 %v2313_v3  ;;  %4842 = vmatpush1.bf16.msra.mxu1 %v2313_v3  ;;  %v5114_v23 = vld [vmem:[#allocation11 + $0xf0] ss:$12 sps:$4 sm:$0xff]   ;;  %v5116_v56 = vld [vmem:[#allocation11 + $0x10c] ss:$12 sps:$4 sm:$0xff]   ;;  %v5119_v29 = vld [vmem:[#allocation11 + $0x108] ss:$12 sps:$4 sm:$0xff]  }
 0x2aa   : > { %2728 = vmatprep.subr.bf16.mxu0 %v5338_v52  ;;  %4827 = vmatprep.subr.bf16.mxu1 %v5338_v52  ;;  %v5118_v58 = vld [vmem:[#allocation11 + $0xf8] ss:$12 sps:$4 sm:$0xff]   ;;  %v5120_v3 = vld [vmem:[#allocation11 + $0x110] ss:$12 sps:$4 sm:$0xff]  }
 0x2ad   : > { %2729 = vmatpush1.bf16.msra.mxu0 %v2314_v35  ;;  %4843 = vmatpush1.bf16.msra.mxu1 %v2314_v35  ;;  %v5121_v35 = vld [vmem:[#allocation11 + $0x124] ss:$12 sps:$4 sm:$0xff]  }
 0x2ae   : > { %2730 = vmatprep.subr.bf16.mxu0 %v5338_v52  ;;  %4828 = vmatprep.subr.bf16.mxu1 %v5338_v52 }
 0x2b1   : > { %2731 = vmatpush1.bf16.msra.mxu0 %v2315_v15  ;;  %4844 = vmatpush1.bf16.msra.mxu1 %v2315_v15  ;;  %v5123_v15 = vld [vmem:[#allocation11 + $0x128] ss:$12 sps:$4 sm:$0xff]  }
 0x2b2   : > { %2732 = vmatprep.subr.bf16.mxu0 %v5338_v52  ;;  %4829 = vmatprep.subr.bf16.mxu1 %v5338_v52 }
 0x2b5   : > { %2733 = vmatpush1.bf16.msra.mxu0 %v2316_v32  ;;  %4845 = vmatpush1.bf16.msra.mxu1 %v2316_v32  ;;  %v5124_v32 = vld [vmem:[#allocation11 + $0x120] ss:$12 sps:$4 sm:$0xff]  }
 0x2b6   : > { %2734 = vmatprep.subr.bf16.mxu0 %v5338_v52  ;;  %4830 = vmatprep.subr.bf16.mxu1 %v5338_v52 }
 0x2b9   : > { %2735 = vmatpush1.bf16.msra.mxu0 %v2317_v39  ;;  %4846 = vmatpush1.bf16.msra.mxu1 %v2317_v39  ;;  %v5125_v39 = vld [vmem:[#allocation11 + $0x140] ss:$12 sps:$4 sm:$0xff]  }
 0x2ba   : > { %2736 = vmatprep.subr.bf16.mxu0 %v5338_v52  ;;  %4831 = vmatprep.subr.bf16.mxu1 %v5338_v52 }
 0x2bd   : > { %2737 = vmatpush1.bf16.msra.mxu0 %v2318_v61  ;;  %4847 = vmatpush1.bf16.msra.mxu1 %v2318_v61  ;;  %v5126_v61 = vld [vmem:[#allocation11 + $0x13c] ss:$12 sps:$4 sm:$0xff]  }
 0x2be   : > { %2738 = vmatprep.subr.bf16.mxu0 %v5338_v52  ;;  %4832 = vmatprep.subr.bf16.mxu1 %v5338_v52 }
 0x2c1   : > { %2739 = vmatpush1.bf16.msra.mxu0 %v2319_v31  ;;  %4848 = vmatpush1.bf16.msra.mxu1 %v2319_v31  ;;  %v5128_v31 = vld [vmem:[#allocation11 + $0x158] ss:$12 sps:$4 sm:$0xff]  }
 0x2c2   : > { %2740 = vmatprep.subr.bf16.mxu0 %v5338_v52  ;;  %4833 = vmatprep.subr.bf16.mxu1 %v5338_v52 }
 0x2c5   : > { %2741 = vmatpush1.bf16.msra.mxu0 %v2320_v44  ;;  %4849 = vmatpush1.bf16.msra.mxu1 %v2320_v44  ;;  %v5129_v44 = vld [vmem:[#allocation11 + $0x138] ss:$12 sps:$4 sm:$0xff]  }
 0x2c6   : > { %2742 = vmatprep.subr.bf16.mxu0 %v5338_v52  ;;  %4834 = vmatprep.subr.bf16.mxu1 %v5338_v52 }
 0x2c9   : > { %2743 = vmatpush1.bf16.msra.mxu0 %v2321_v59  ;;  %4850 = vmatpush1.bf16.msra.mxu1 %v2321_v59  ;;  %v5130_v59 = vld [vmem:[#allocation11 + $0x170] ss:$12 sps:$4 sm:$0xff]  }
 0x2ca   : > { %2744 = vmatprep.subr.bf16.mxu0 %v5338_v52  ;;  %4835 = vmatprep.subr.bf16.mxu1 %v5338_v52 }
 0x2cd   : > { %2745 = vmatpush1.bf16.msra.mxu0 %v2322_v43  ;;  %4851 = vmatpush1.bf16.msra.mxu1 %v2322_v43  ;;  %v5131_v43 = vld [vmem:[#allocation11 + $0x154] ss:$12 sps:$4 sm:$0xff]  }
 0x2ce   : > { %2746 = vmatprep.subr.bf16.mxu0 %v5338_v52  ;;  %4836 = vmatprep.subr.bf16.mxu1 %v5338_v52  ;;  %v5111_v52 = vld [vmem:[#allocation11 + $0xf4] ss:$12 sps:$4 sm:$0xff]  }
 0x2d1   : > { %2747 = vmatpush1.bf16.msra.mxu0 %v2323_v60  ;;  %4852 = vmatpush1.bf16.msra.mxu1 %v2323_v60  ;;  %v5133_v60 = vld [vmem:[#allocation11 + $0x188] ss:$12 sps:$4 sm:$0xff]  }
 0x2d2   : > { %4661 = vmatprep.subr.bf16.mxu1 %v2324_v37 }
 0x2d4   : > { %2749 = vmatmul.mubr.bf16.vlgmr.msra.gmra.mrb[0].mxu0 %v5055_v24  ;;  %2893 = vmatmul.mubr.bf16.vlgmr.msra.gmra.mrb[0].mxu1 %v5058_v28  ;;  %v5134_v24 = vld [vmem:[#allocation11 + $0x150] ss:$12 sps:$4 sm:$0xff]   ;;  %v5135_v28 = vld [vmem:[#allocation11 + $0x1a0] ss:$12 sps:$4 sm:$0xff]  }
 0x2d5   : > { %4662 = vmatpush3.bf16.msra.mxu1 %v2324_v37  ;;  %2756 = vmatprep.mubr.bf16.mxu0 %v5061_v45  ;;  %v5136_v37 = vld [vmem:[#allocation11 + $0x16c] ss:$12 sps:$4 sm:$0xff]  }
 0x2d6   : > { %4663 = vmatprep.subr.bf16.mxu1 %v2325_v21  ;;  %2900 = vmatprep.mubr.bf16.mxu1 %v5063_v11  ;;  %v5138_v45 = vld [vmem:[#allocation11 + $0x1b8] ss:$12 sps:$4 sm:$0xff]   ;;  %v5139_v11 = vld [vmem:[#allocation11 + $0x168] ss:$12 sps:$4 sm:$0xff]  }
 0x2d9   : > { %4664 = vmatpush3.bf16.msra.mxu1 %v2325_v21  ;;  %v5140_v21 = vld [vmem:[#allocation11 + $0x1d0] ss:$12 sps:$4 sm:$0xff]  }
 0x2da   : > { %4665 = vmatprep.subr.bf16.mxu1 %v2326_v42 }
 0x2dc   : > { %2757 = vmatmul.mubr.bf16.gmra.mrb[4].mxu0 %v5065_v30  ;;  %2901 = vmatmul.mubr.bf16.gmra.mrb[4].mxu1 %v5066_v41  ;;  %v5143_v30 = vld [vmem:[#allocation11 + $0x1e8] ss:$12 sps:$4 sm:$0xff]   ;;  %v5144_v41 = vld [vmem:[#allocation11 + $0x180] ss:$12 sps:$4 sm:$0xff]  }
 0x2dd   : > { %4666 = vmatpush3.bf16.msra.mxu1 %v2326_v42  ;;  %2764 = vmatprep.mubr.bf16.mxu0 %v5067_v46  ;;  %v5141_v42 = vld [vmem:[#allocation11 + $0x184] ss:$12 sps:$4 sm:$0xff]   ;;  %v5145_v46 = vld [vmem:[#allocation11 + $0x200] ss:$12 sps:$4 sm:$0xff]  }
 0x2de   : > { %2908 = vmatprep.mubr.bf16.mxu1 %v5069_v27  ;;  %4667 = vmatprep.subr.bf16.mxu1 %v2327_v47  ;;  %v5146_v27 = vld [vmem:[#allocation11 + $0x19c] ss:$12 sps:$4 sm:$0xff]  }
 0x2e1   : > { %4668 = vmatpush3.bf16.msra.mxu1 %v2327_v47  ;;  %v5148_v47 = vld [vmem:[#allocation11 + $0x218] ss:$12 sps:$4 sm:$0xff]  }
 0x2e2   : > { %4669 = vmatprep.subr.bf16.mxu1 %v2328_v57 }
 0x2e4   : > { %2765 = vmatmul.mubr.bf16.gmra.mrb[8].mxu0 %v5071_v50  ;;  %2909 = vmatmul.mubr.bf16.gmra.mrb[8].mxu1 %v5072_v7  ;;  %v5150_v50 = vld [vmem:[#allocation11 + $0x230] ss:$12 sps:$4 sm:$0xff]  }
 0x2e5   : > { %2772 = vmatprep.mubr.bf16.mxu0 %v5073_v63  ;;  %2916 = vmatprep.mubr.bf16.mxu1 %v5075_v17 }
 0x2e6   : > { %4670 = vmatpush3.bf16.msra.mxu1 %v2328_v57  ;;  %v5149_v57 = vld [vmem:[#allocation11 + $0x198] ss:$12 sps:$4 sm:$0xff]  }
 0x2e7   : > { %4671 = vmatprep.subr.bf16.mxu1 %v2329_v49 }
 0x2ea   : > { %4672 = vmatpush3.bf16.msra.mxu1 %v2329_v49 }
 0x2eb   : > { %4673 = vmatprep.subr.bf16.mxu1 %v2330_v54 }
 0x2ec   : > { %2773 = vmatmul.mubr.bf16.gmra.mrb[12].mxu0 %v5077_v34  ;;  %2917 = vmatmul.mubr.bf16.gmra.mrb[12].mxu1 %v5078_v16 }
 0x2ed   : > { %2780 = vmatprep.mubr.bf16.mxu0 %v5079_v51  ;;  %2924 = vmatprep.mubr.bf16.mxu1 %v5081_v55 }
 0x2ee   : > { %4674 = vmatpush3.bf16.msra.mxu1 %v2330_v54 }
 0x2ef   : > { %4675 = vmatprep.subr.bf16.mxu1 %v2331_v8 }
 0x2f2   : > { %4676 = vmatpush3.bf16.msra.mxu1 %v2331_v8 }
 0x2f4   : > { %2781 = vmatmul.mubr.bf16.gmra.mrb[16].mxu0 %v5083_v10  ;;  %2925 = vmatmul.mubr.bf16.gmra.mrb[16].mxu1 %v5084_v36 }
 0x2f5   : > { %2788 = vmatprep.mubr.bf16.mxu0 %v5085_v4  ;;  %2932 = vmatprep.mubr.bf16.mxu1 %v5087_v62 }
 0x2fc   : > { %2789 = vmatmul.mubr.bf16.gmra.mrb[20].mxu0 %v5089_v48  ;;  %2933 = vmatmul.mubr.bf16.gmra.mrb[20].mxu1 %v5090_v0 }
 0x2fd   : > { %2796 = vmatprep.mubr.bf16.mxu0 %v5091_v20  ;;  %4677 = vmatprep.mubr.bf16.mxu1 %v5093_v1 }
 0x304   : > { %2797 = vmatmul.mubr.bf16.gmra.mrb[24].mxu0 %v5094_v2  ;;  %4678 = vmatmul.mubr.bf16.vlgmr.msra.gmra.mrb[24].mxu1 %v5095_v5 }
 0x305   : > { %2804 = vmatprep.mubr.bf16.mxu0 %v5096_v19  ;;  %4681 = vmatprep.mubr.bf16.mxu1 %v5098_v33 }
 0x30c   : > { %2805 = vmatmul.mubr.bf16.gmra.mrb[28].mxu0 %v5099_v53  ;;  %4682 = vmatmul.mubr.bf16.gmra.mrb[28].mxu1 %v5100_v6 }
 0x30d   : > { %2812 = vmatprep.mubr.bf16.mxu0 %v5101_v9  ;;  %4685 = vmatprep.mubr.bf16.mxu1 %v5103_v38 }
 0x314   : > { %2813 = vmatmul.mubr.bf16.gmra.mrb[32].mxu0 %v5104_v12  ;;  %4686 = vmatmul.mubr.bf16.gmra.mrb[32].mxu1 %v5105_v13 }
 0x315   : > { %2820 = vmatprep.mubr.bf16.mxu0 %v5106_v18  ;;  %4689 = vmatprep.mubr.bf16.mxu1 %v5108_v14 }
 0x31c   : > { %2821 = vmatmul.mubr.bf16.gmra.mrb[36].mxu0 %v5109_v26  ;;  %4690 = vmatmul.mubr.bf16.gmra.mrb[36].mxu1 %v5110_v22 }
 0x31d   : > { %2828 = vmatprep.mubr.bf16.mxu0 %v5111_v52  ;;  %4693 = vmatprep.mubr.bf16.mxu1 %v5113_v40 }
 0x324   : > { %2829 = vmatmul.mubr.bf16.gmra.mrb[40].mxu0 %v5114_v23  ;;  %4694 = vmatmul.mubr.bf16.gmra.mrb[40].mxu1 %v5115_v25 }
 0x325   : > { %2836 = vmatprep.mubr.bf16.mxu0 %v5116_v56  ;;  %4697 = vmatprep.mubr.bf16.mxu1 %v5118_v58 }
 0x32c   : > { %2837 = vmatmul.mubr.bf16.gmra.mrb[44].mxu0 %v5119_v29  ;;  %4698 = vmatmul.mubr.bf16.gmra.mrb[44].mxu1 %v5120_v3 }
 0x32d   : > { %2844 = vmatprep.mubr.bf16.mxu0 %v5121_v35  ;;  %4701 = vmatprep.mubr.bf16.mxu1 %v5123_v15 }
 0x334   : > { %2845 = vmatmul.mubr.bf16.gmra.mrb[48].mxu0 %v5124_v32  ;;  %4702 = vmatmul.mubr.bf16.gmra.mrb[48].mxu1 %v5125_v39 }
 0x335   : > { %2852 = vmatprep.mubr.bf16.mxu0 %v5126_v61  ;;  %4705 = vmatprep.mubr.bf16.mxu1 %v5128_v31 }
 0x33c   : > { %2853 = vmatmul.mubr.bf16.gmra.mrb[52].mxu0 %v5129_v44  ;;  %4706 = vmatmul.mubr.bf16.gmra.mrb[52].mxu1 %v5130_v59 }
 0x33d   : > { %2860 = vmatprep.mubr.bf16.mxu0 %v5131_v43  ;;  %4709 = vmatprep.mubr.bf16.mxu1 %v5133_v60  ;;  %v2213_v60 = vld [vmem:[#allocation3 + $0x10] sm:$0xff] }
 0x344   : > { %2861 = vmatmul.mubr.bf16.gmra.mrb[56].mxu0 %v5134_v24  ;;  %4710 = vmatmul.mubr.bf16.gmra.mrb[56].mxu1 %v5135_v28 }
 0x345   : > { %2868 = vmatprep.mubr.bf16.mxu0 %v5136_v37  ;;  %4713 = vmatprep.mubr.bf16.mxu1 %v5138_v45  ;;  %v2211_v45 = vld [vmem:[#allocation3] sm:$0xff] }
 0x34c   : > { %2869 = vmatmul.mubr.bf16.gmra.mrb[60].mxu0 %v5139_v11  ;;  %4714 = vmatmul.mubr.bf16.gmra.mrb[60].mxu1 %v5140_v21  ;;  %v6148_v21 = vstv %s3215_s9 }
 0x34d   : > { %2876 = vmatprep.mubr.bf16.mxu0 %v5141_v42  ;;  %4717 = vmatprep.mubr.bf16.mxu1 %v5143_v30 }
 0x354   : > { %2877 = vmatmul.mubr.bf16.gmra.mrb[64].mxu0 %v5144_v41  ;;  %4718 = vmatmul.mubr.bf16.gmra.mrb[64].mxu1 %v5145_v46  ;;  %v2214_v41 = vld [vmem:[#allocation3 + $0x18] sm:$0xff] }
 0x355   : > { %2884 = vmatprep.mubr.bf16.mxu0 %v5146_v27  ;;  %4721 = vmatprep.mubr.bf16.mxu1 %v5148_v47 }
 0x35c   : > { %2885 = vmatmul.mubr.bf16.gmra.mrb[68].mxu0 %v5149_v57  ;;  %4722 = vmatmul.mubr.bf16.gmra.mrb[68].mxu1 %v5150_v50  ;;  %v2212_v50 = vld [vmem:[#allocation3 + $0x8] sm:$0xff] }
 0x3a7   : > { %v2750_v7 = vpop.f32.mrb[0].mxu0  ;;  %v6102_v63 = vpop.f32.mrb[0].mxu1 }
 0x3a8   : > { %v2752_v17 = vpop.f32.mrb[1].mxu0  ;;  %v2896_v49 = vpop.f32.mrb[1].mxu1 }
 0x3a9   : > { %v6104_v34 = vpop.f32.mrb[2].mxu0  ;;  %v6106_v16 = vpop.f32.mrb[2].mxu1  ;;  %v2262_v49 = vld [vmem:[#allocation2 + $0x10] sm:$0xff] }
 0x3aa   : > { %v2755_v54 = vpop.f32.mrb[3].mxu0  ;;  %v2899_v51 = vpop.f32.mrb[3].mxu1 }
 0x3af   : > { %v2758_v55 = vpop.f32.mrb[4].mxu0  ;;  %v6108_v8 = vpop.f32.mrb[4].mxu1 }
 0x3b0   : > { %v2760_v10 = vpop.f32.mrb[5].mxu0  ;;  %v2904_v36 = vpop.f32.mrb[5].mxu1 }
 0x3b1   : > { %v2761_v4 = vpop.f32.mrb[6].mxu0  ;;  %v6110_v62 = vpop.f32.mrb[6].mxu1  ;;  %v2260_v10 = vld [vmem:[#allocation2] sm:$0xff] }
 0x3b2   : > { %v2763_v48 = vpop.f32.mrb[7].mxu0  ;;  %v2907_v0 = vpop.f32.mrb[7].mxu1 }
 0x3b3   : > { %v6154_v48 = vstv %s3462_s10  ;;  %v2263_v0 = vld [vmem:[#allocation2 + $0x18] sm:$0xff] }
 0x3b7   : > { %v6112_v20 = vpop.f32.mrb[8].mxu0  ;;  %v6114_v1 = vpop.f32.mrb[8].mxu1 }
 0x3b8   : > { %v2768_v2 = vpop.f32.mrb[9].mxu0  ;;  %v2912_v5 = vpop.f32.mrb[9].mxu1 }
 0x3b9   : > { %v6116_v19 = vpop.f32.mrb[10].mxu0  ;;  %v6118_v33 = vpop.f32.mrb[10].mxu1 }
 0x3ba   : > { %v2771_v53 = vpop.f32.mrb[11].mxu0  ;;  %v2915_v6 = vpop.f32.mrb[11].mxu1 }
 0x3bb   : > { %v2261_v53 = vld [vmem:[#allocation2 + $0x8] sm:$0xff]  ;;  %v3416_v6 = vld [vmem:[#allocation6 + $0x10] sm:$0xff] }
 0x3bf   : > { %v6120_v9 = vpop.f32.mrb[12].mxu0  ;;  %v6122_v38 = vpop.f32.mrb[12].mxu1 }
 0x3c0   : > { %v2776_v12 = vpop.f32.mrb[13].mxu0  ;;  %v2920_v13 = vpop.f32.mrb[13].mxu1 }
 0x3c1   : > { %v6124_v18 = vpop.f32.mrb[14].mxu0  ;;  %v6126_v14 = vpop.f32.mrb[14].mxu1 }
 0x3c2   : > { %v2779_v26 = vpop.f32.mrb[15].mxu0  ;;  %v2923_v22 = vpop.f32.mrb[15].mxu1 }
 0x3c7   : > { %v6128_v52 = vpop.f32.mrb[16].mxu0  ;;  %v6130_v40 = vpop.f32.mrb[16].mxu1 }
 0x3c8   : > { %v2784_v23 = vpop.f32.mrb[17].mxu0  ;;  %v2928_v25 = vpop.f32.mrb[17].mxu1 }
 0x3c9   : > { %v6132_v56 = vpop.f32.mrb[18].mxu0  ;;  %v6134_v58 = vpop.f32.mrb[18].mxu1  ;;  %v3414_v25 = vld [vmem:[#allocation6] sm:$0xff] }
 0x3ca   : > { %v2787_v29 = vpop.f32.mrb[19].mxu0  ;;  %v2931_v3 = vpop.f32.mrb[19].mxu1 }
 0x3cf   : > { %v6136_v35 = vpop.f32.mrb[20].mxu0  ;;  %v6138_v15 = vpop.f32.mrb[20].mxu1 }
 0x3d0   : > { %v2792_v32 = vpop.f32.mrb[21].mxu0  ;;  %v2936_v39 = vpop.f32.mrb[21].mxu1 }
 0x3d1   : > { %v6141_v61 = vpop.f32.mrb[22].mxu0  ;;  %v6143_v31 = vpop.f32.mrb[22].mxu1  ;;  %v2215_v39 = vld [vmem:[#allocation3 + $0x20] sm:$0xff] }
 0x3d2   : > { %v2795_v44 = vpop.f32.mrb[23].mxu0  ;;  %v2939_v59 = vpop.f32.mrb[23].mxu1 }
 0x3d7   : > { %v6146_v43 = vpop.f32.mrb[24].mxu0  ;;  %v4679_v24 = vpop.f32.mrb[24].mxu1 }
 0x3d8   : > { %v2984_v28 = vadd.f32 %v4679_v24, %v2758_v55  ;;  %v2800_v37 = vpop.f32.mrb[25].mxu0  ;;  %v2975_v11 = vpop.f32.mrb[25].mxu1 }
 0x3d9   : > { %v2976_v42 = vadd.f32 %v2975_v11, %v2750_v7  ;;  %v6150_v30 = vpop.f32.mrb[26].mxu0  ;;  %v4680_v46 = vpop.f32.mrb[26].mxu1 }
 0x3da   : > { %v3168_v27 = vsub.f32 %v2213_v60, %v2984_v28  ;;  %v2987_v47 = vadd.f32 %v4680_v46, %v2761_v4  ;;  %v2803_v57 = vpop.f32.mrb[27].mxu0  ;;  %v2978_v17 = vpop.f32.mrb[27].mxu1  ;;  %v3417_v60 = vld [vmem:[#allocation6 + $0x18] sm:$0xff]  ;;  %v3415_v46 = vld [vmem:[#allocation6 + $0x8] sm:$0xff] }
 0x3db   : > { %v3166_v54 = vsub.f32 %v2211_v45, %v2976_v42  ;;  %v2979_v51 = vadd.f32 %v2978_v17, %v6104_v34  ;;  %v2217_v34 = vld [vmem:[#allocation3 + $0x30] sm:$0xff] }
 0x3dc   : > { %v3219_v55 = vmul.f32 %v6148_v21, %v3168_v27  ;;  %v3169_v36 = vsub.f32 %v2214_v41, %v2987_v47 }
 0x3dd   : > { %v3217_v7 = vmul.f32 %v6148_v21, %v3166_v54  ;;  %v3167_v2 = vsub.f32 %v2212_v50, %v2979_v51  ;;  %v2216_v51 = vld [vmem:[#allocation3 + $0x28] sm:$0xff] }
 0x3de   : > { %v3267_v5 = vsub.f32 %v3219_v55, %v2262_v49  ;;  %v3220_v4 = vmul.f32 %v6148_v21, %v3169_v36  ;;  %v2266_v49 = vld [vmem:[#allocation2 + $0x30] sm:$0xff]  ;;  %v2264_v36 = vld [vmem:[#allocation2 + $0x20] sm:$0xff] }
 0x3df   : > { %v3265_v12 = vsub.f32 %v3217_v7, %v2260_v10  ;;  %v3218_v13 = vmul.f32 %v6148_v21, %v3167_v2  ;;  %v6159_v26 = vpop.f32.mrb[28].mxu0  ;;  %v4683_v22 = vpop.f32.mrb[28].mxu1 }
 0x3e0   : > { %3315 = vst [vmem:[#allocation2 + $0x10] sm:$0xff] %v3267_v5  ;;  %v3466_v23 = vmul.f32 %v6154_v48, %v3267_v5  ;;  %v3268_v29 = vsub.f32 %v3220_v4, %v2263_v0  ;;  %v3000_v3 = vadd.f32 %v4683_v22, %v6120_v9  ;;  %v2808_v32 = vpop.f32.mrb[29].mxu0  ;;  %v2991_v44 = vpop.f32.mrb[29].mxu1  ;;  %v2265_v22 = vld [vmem:[#allocation2 + $0x28] sm:$0xff] }
 0x3e1   : > { %3313 = vst [vmem:[#allocation2] sm:$0xff] %v3265_v12  ;;  %v3464_v59 = vmul.f32 %v6154_v48, %v3265_v12  ;;  %v3266_v24 = vsub.f32 %v3218_v13, %v2261_v53  ;;  %v2992_v28 = vadd.f32 %v2991_v44, %v6112_v20  ;;  %v6165_v37 = vpop.f32.mrb[30].mxu0  ;;  %v4684_v45 = vpop.f32.mrb[30].mxu1  ;;  %v2218_v20 = vld [vmem:[#allocation3 + $0x38] sm:$0xff]  ;;  %v3420_v13 = vld [vmem:[#allocation6 + $0x30] sm:$0xff] }
 0x3e2   : > { %v3514_v11 = vadd.f32 %v3466_v23, %v3416_v6  ;;  %3316 = vst [vmem:[#allocation2 + $0x18] sm:$0xff] %v3268_v29  ;;  %v3362_v42 = vpack.c.bf16 %v3268_v29, %v3267_v5  ;;  %v3467_v41 = vmul.f32 %v6154_v48, %v3268_v29  ;;  %v3172_v9 = vsub.f32 %v2217_v34, %v3000_v3  ;;  %v2811_v27 = vpop.f32.mrb[31].mxu0  ;;  %v2994_v47 = vpop.f32.mrb[31].mxu1  ;;  %v2267_v53 = vld [vmem:[#allocation2 + $0x38] sm:$0xff]  ;;  %v3418_v29 = vld [vmem:[#allocation6 + $0x20] sm:$0xff] }
 0x3e3   : > { %v3512_v57 = vadd.f32 %v3464_v59, %v3414_v25  ;;  %3314 = vst [vmem:[#allocation2 + $0x8] sm:$0xff] %v3266_v24  ;;  %v3361_v50 = vpack.c.bf16 %v3266_v24, %v3265_v12  ;;  %v3465_v17 = vmul.f32 %v6154_v48, %v3266_v24  ;;  %v3170_v54 = vsub.f32 %v2215_v39, %v2992_v28  ;;  %v2221_v25 = vld [vmem:[#allocation3 + $0x50] sm:$0xff]  ;;  %v2219_v59 = vld [vmem:[#allocation3 + $0x40] sm:$0xff]  ;;  %v2222_v27 = vld [vmem:[#allocation3 + $0x58] sm:$0xff] }
 0x3e4   : > { %3562 = vst [vmem:[#allocation6 + $0x10] sm:$0xff] %v3514_v11  ;;  %3390 = vst [vmem:[#allocation4 + $0x8] sm:$0xff] %v3362_v42  ;;  %v3515_v55 = vadd.f32 %v3467_v41, %v3417_v60  ;;  %v3223_v10 = vmul.f32 %v6148_v21, %v3172_v9  ;;  %v3003_v7 = vadd.f32 %v4684_v45, %v6124_v18 }
 0x3e5   : > { %v2995_v0 = vadd.f32 %v2994_v47, %v6116_v19  ;;  %3560 = vst [vmem:[#allocation6] sm:$0xff] %v3512_v57  ;;  %3389 = vst [vmem:[#allocation4] sm:$0xff] %v3361_v50  ;;  %v3513_v2 = vadd.f32 %v3465_v17, %v3415_v46  ;;  %v3221_v5 = vmul.f32 %v6148_v21, %v3170_v54  ;;  %v2220_v57 = vld [vmem:[#allocation3 + $0x48] sm:$0xff]  ;;  %v3421_v17 = vld [vmem:[#allocation6 + $0x38] sm:$0xff] }
 0x3e6   : > { %3563 = vst [vmem:[#allocation6 + $0x18] sm:$0xff] %v3515_v55  ;;  %v3271_v4 = vsub.f32 %v3223_v10, %v2266_v49  ;;  %v3173_v6 = vsub.f32 %v2218_v20, %v3003_v7  ;;  %v3419_v49 = vld [vmem:[#allocation6 + $0x28] sm:$0xff]  ;;  %v2270_v7 = vld [vmem:[#allocation2 + $0x50] sm:$0xff] }
 0x3e7   : > { %v3171_v12 = vsub.f32 %v2216_v51, %v2995_v0  ;;  %3561 = vst [vmem:[#allocation6 + $0x8] sm:$0xff] %v3513_v2  ;;  %v3269_v34 = vsub.f32 %v3221_v5, %v2264_v36  ;;  %v6173_v23 = vpop.f32.mrb[32].mxu0  ;;  %v4687_v18 = vpop.f32.mrb[32].mxu1  ;;  %v2268_v0 = vld [vmem:[#allocation2 + $0x40] sm:$0xff] }
 0x3e8   : > { %3319 = vst [vmem:[#allocation2 + $0x30] sm:$0xff] %v3271_v4  ;;  %v3470_v19 = vmul.f32 %v6154_v48, %v3271_v4  ;;  %v3224_v3 = vmul.f32 %v6148_v21, %v3173_v6  ;;  %v3016_v39 = vadd.f32 %v4687_v18, %v6136_v35  ;;  %v2816_v44 = vpop.f32.mrb[33].mxu0  ;;  %v3007_v60 = vpop.f32.mrb[33].mxu1 }
 0x3e9   : > { %v3222_v32 = vmul.f32 %v6148_v21, %v3171_v12  ;;  %3317 = vst [vmem:[#allocation2 + $0x20] sm:$0xff] %v3269_v34  ;;  %v3468_v24 = vmul.f32 %v6154_v48, %v3269_v34  ;;  %v3008_v28 = vadd.f32 %v3007_v60, %v6128_v52  ;;  %v6181_v45 = vpop.f32.mrb[34].mxu0  ;;  %v4688_v11 = vpop.f32.mrb[34].mxu1  ;;  %v2269_v12 = vld [vmem:[#allocation2 + $0x48] sm:$0xff] }
 0x3ea   : > { %v3518_v42 = vadd.f32 %v3470_v19, %v3420_v13  ;;  %v3272_v41 = vsub.f32 %v3224_v3, %v2267_v53  ;;  %v3176_v9 = vsub.f32 %v2221_v25, %v3016_v39  ;;  %v2819_v47 = vpop.f32.mrb[35].mxu0  ;;  %v3010_v50 = vpop.f32.mrb[35].mxu1  ;;  %v3019_v20 = vadd.f32 %v4688_v11, %v6141_v61  ;;  %v2225_v19 = vld [vmem:[#allocation3 + $0x70] sm:$0xff] }
 0x3eb   : > { %v3270_v46 = vsub.f32 %v3222_v32, %v2265_v22  ;;  %v3516_v35 = vadd.f32 %v3468_v24, %v3418_v29  ;;  %v3174_v54 = vsub.f32 %v2219_v59, %v3008_v28  ;;  %v3011_v51 = vadd.f32 %v3010_v50, %v6132_v56  ;;  %v3424_v3 = vld [vmem:[#allocation6 + $0x50] sm:$0xff]  ;;  %v3422_v32 = vld [vmem:[#allocation6 + $0x40] sm:$0xff] }
 0x3ec   : > { %3566 = vst [vmem:[#allocation6 + $0x30] sm:$0xff] %v3518_v42  ;;  %3320 = vst [vmem:[#allocation2 + $0x38] sm:$0xff] %v3272_v41  ;;  %v3364_v52 = vpack.c.bf16 %v3272_v41, %v3271_v4  ;;  %v3471_v55 = vmul.f32 %v6154_v48, %v3272_v41  ;;  %v3227_v2 = vmul.f32 %v6148_v21, %v3176_v9  ;;  %v2271_v4 = vld [vmem:[#allocation2 + $0x58] sm:$0xff]  ;;  %v2223_v42 = vld [vmem:[#allocation3 + $0x60] sm:$0xff] }
 0x3ed   : > { %3318 = vst [vmem:[#allocation2 + $0x28] sm:$0xff] %v3270_v46  ;;  %v3363_v10 = vpack.c.bf16 %v3270_v46, %v3269_v34  ;;  %v3469_v36 = vmul.f32 %v6154_v48, %v3270_v46  ;;  %3564 = vst [vmem:[#allocation6 + $0x20] sm:$0xff] %v3516_v35  ;;  %v3225_v5 = vmul.f32 %v6148_v21, %v3174_v54  ;;  %v3425_v9 = vld [vmem:[#allocation6 + $0x58] sm:$0xff] }
 0x3ee   : > { %v3177_v53 = vsub.f32 %v2222_v27, %v3019_v20  ;;  %v3175_v61 = vsub.f32 %v2220_v57, %v3011_v51  ;;  %3392 = vst [vmem:[#allocation4 + $0x18] sm:$0xff] %v3364_v52  ;;  %v3519_v56 = vadd.f32 %v3471_v55, %v3421_v17  ;;  %v3275_v13 = vsub.f32 %v3227_v2, %v2270_v7  ;;  %v2226_v57 = vld [vmem:[#allocation3 + $0x78] sm:$0xff]  ;;  %v3423_v51 = vld [vmem:[#allocation6 + $0x48] sm:$0xff]  ;;  %v2274_v52 = vld [vmem:[#allocation2 + $0x70] sm:$0xff] }
 0x3ef   : > { %3391 = vst [vmem:[#allocation4 + $0x10] sm:$0xff] %v3363_v10  ;;  %v3517_v6 = vadd.f32 %v3469_v36, %v3419_v49  ;;  %v3273_v22 = vsub.f32 %v3225_v5, %v2268_v0  ;;  %v6191_v18 = vpop.f32.mrb[36].mxu0  ;;  %v4691_v29 = vpop.f32.mrb[36].mxu1  ;;  %v2224_v7 = vld [vmem:[#allocation3 + $0x68] sm:$0xff]  ;;  %v2272_v0 = vld [vmem:[#allocation2 + $0x60] sm:$0xff] }
 0x3f0   : > { %v3228_v34 = vmul.f32 %v6148_v21, %v3177_v53  ;;  %v3226_v25 = vmul.f32 %v6148_v21, %v3175_v61  ;;  %3567 = vst [vmem:[#allocation6 + $0x38] sm:$0xff] %v3519_v56  ;;  %v3032_v39 = vadd.f32 %v4691_v29, %v6159_v26  ;;  %v2824_v44 = vpop.f32.mrb[37].mxu0  ;;  %v3023_v59 = vpop.f32.mrb[37].mxu1  ;;  %3323 = vst [vmem:[#allocation2 + $0x50] sm:$0xff] %v3275_v13  ;;  %v2273_v29 = vld [vmem:[#allocation2 + $0x68] sm:$0xff] }
 0x3f1   : > { %3565 = vst [vmem:[#allocation6 + $0x28] sm:$0xff] %v3517_v6  ;;  %v3474_v60 = vmul.f32 %v6154_v48, %v3275_v13  ;;  %3321 = vst [vmem:[#allocation2 + $0x40] sm:$0xff] %v3273_v22  ;;  %v3472_v24 = vmul.f32 %v6154_v48, %v3273_v22  ;;  %v2825_v41 = vpop.f32.mrb[38].mxu0  ;;  %v4692_v46 = vpop.f32.mrb[38].mxu1  ;;  %v3024_v47 = vadd.f32 %v3023_v59, %v6146_v43  ;;  %v2275_v6 = vld [vmem:[#allocation2 + $0x78] sm:$0xff]  ;;  %v3426_v59 = vld [vmem:[#allocation6 + $0x60] sm:$0xff] }
 0x3f2   : > { %v3276_v28 = vsub.f32 %v3228_v34, %v2271_v4  ;;  %v3274_v11 = vsub.f32 %v3226_v25, %v2269_v12  ;;  %v3180_v27 = vsub.f32 %v2225_v19, %v3032_v39  ;;  %v3035_v26 = vadd.f32 %v4692_v46, %v6165_v37  ;;  %v2827_v50 = vpop.f32.mrb[39].mxu0  ;;  %v3026_v35 = vpop.f32.mrb[39].mxu1  ;;  %v3428_v4 = vld [vmem:[#allocation6 + $0x70] sm:$0xff]  ;;  %v2227_v39 = vld [vmem:[#allocation3 + $0x80] sm:$0xff] }
 0x3f3   : > { %v3522_v17 = vadd.f32 %v3474_v60, %v3424_v3  ;;  %v3520_v49 = vadd.f32 %v3472_v24, %v3422_v32  ;;  %v3178_v43 = vsub.f32 %v2223_v42, %v3024_v47  ;;  %v3027_v5 = vadd.f32 %v3026_v35, %v6150_v30  ;;  %v2229_v34 = vld [vmem:[#allocation3 + $0x90] sm:$0xff]  ;;  %v2230_v42 = vld [vmem:[#allocation3 + $0x98] sm:$0xff] }
 0x3f4   : > { %3324 = vst [vmem:[#allocation2 + $0x58] sm:$0xff] %v3276_v28  ;;  %v3366_v54 = vpack.c.bf16 %v3276_v28, %v3275_v13  ;;  %v3475_v20 = vmul.f32 %v6154_v48, %v3276_v28  ;;  %3322 = vst [vmem:[#allocation2 + $0x48] sm:$0xff] %v3274_v11  ;;  %v3365_v55 = vpack.c.bf16 %v3274_v11, %v3273_v22  ;;  %v3429_v47 = vld [vmem:[#allocation6 + $0x78] sm:$0xff] }
 0x3f5   : > { %v3473_v10 = vmul.f32 %v6154_v48, %v3274_v11  ;;  %v3231_v36 = vmul.f32 %v6148_v21, %v3180_v27  ;;  %3570 = vst [vmem:[#allocation6 + $0x50] sm:$0xff] %v3522_v17  ;;  %3568 = vst [vmem:[#allocation6 + $0x40] sm:$0xff] %v3520_v49  ;;  %v3181_v2 = vsub.f32 %v2226_v57, %v3035_v26 }
 0x3f6   : > { %3394 = vst [vmem:[#allocation4 + $0x28] sm:$0xff] %v3366_v54  ;;  %v3523_v37 = vadd.f32 %v3475_v20, %v3425_v9  ;;  %3393 = vst [vmem:[#allocation4 + $0x20] sm:$0xff] %v3365_v55  ;;  %v3229_v56 = vmul.f32 %v6148_v21, %v3178_v43  ;;  %v3179_v13 = vsub.f32 %v2224_v7, %v3027_v5  ;;  %v2278_v54 = vld [vmem:[#allocation2 + $0x90] sm:$0xff]  ;;  %v2228_v20 = vld [vmem:[#allocation3 + $0x88] sm:$0xff] }
 0x3f7   : > { %v3521_v53 = vadd.f32 %v3473_v10, %v3423_v51  ;;  %v3279_v61 = vsub.f32 %v3231_v36, %v2274_v52  ;;  %v3232_v12 = vmul.f32 %v6148_v21, %v3181_v2  ;;  %v6204_v22 = vpop.f32.mrb[40].mxu0  ;;  %v4695_v25 = vpop.f32.mrb[40].mxu1  ;;  %v3427_v52 = vld [vmem:[#allocation6 + $0x68] sm:$0xff]  ;;  %v2276_v10 = vld [vmem:[#allocation2 + $0x80] sm:$0xff]  ;;  %v2279_v2 = vld [vmem:[#allocation2 + $0x98] sm:$0xff] }
 0x3f8   : > { %3571 = vst [vmem:[#allocation6 + $0x58] sm:$0xff] %v3523_v37  ;;  %v3277_v30 = vsub.f32 %v3229_v56, %v2272_v0  ;;  %v3048_v3 = vadd.f32 %v4695_v25, %v6191_v18  ;;  %v2832_v32 = vpop.f32.mrb[41].mxu0  ;;  %v3039_v44 = vpop.f32.mrb[41].mxu1  ;;  %v3230_v24 = vmul.f32 %v6148_v21, %v3179_v13  ;;  %v3430_v25 = vld [vmem:[#allocation6 + $0x80] sm:$0xff] }
 0x3f9   : > { %3569 = vst [vmem:[#allocation6 + $0x48] sm:$0xff] %v3521_v53  ;;  %3327 = vst [vmem:[#allocation2 + $0x70] sm:$0xff] %v3279_v61  ;;  %v3478_v19 = vmul.f32 %v6154_v48, %v3279_v61  ;;  %v3280_v60 = vsub.f32 %v3232_v12, %v2275_v6  ;;  %v3040_v28 = vadd.f32 %v3039_v44, %v6173_v23  ;;  %v6210_v11 = vpop.f32.mrb[42].mxu0  ;;  %v4696_v46 = vpop.f32.mrb[42].mxu1  ;;  %v3432_v6 = vld [vmem:[#allocation6 + $0x90] sm:$0xff] }
 0x3fa   : > { %3325 = vst [vmem:[#allocation2 + $0x60] sm:$0xff] %v3277_v30  ;;  %v3476_v27 = vmul.f32 %v6154_v48, %v3277_v30  ;;  %v3184_v57 = vsub.f32 %v2229_v34, %v3048_v3  ;;  %v3051_v18 = vadd.f32 %v4696_v46, %v2825_v41  ;;  %v2835_v26 = vpop.f32.mrb[43].mxu0  ;;  %v3042_v50 = vpop.f32.mrb[43].mxu1  ;;  %v3278_v49 = vsub.f32 %v3230_v24, %v2273_v29  ;;  %v2233_v29 = vld [vmem:[#allocation3 + $0xb0] sm:$0xff] }
 0x3fb   : > { %v3526_v9 = vadd.f32 %v3478_v19, %v3428_v4  ;;  %3328 = vst [vmem:[#allocation2 + $0x78] sm:$0xff] %v3280_v60  ;;  %v3368_v35 = vpack.c.bf16 %v3280_v60, %v3279_v61  ;;  %v3479_v17 = vmul.f32 %v6154_v48, %v3280_v60  ;;  %v3182_v23 = vsub.f32 %v2227_v39, %v3040_v28  ;;  %v2231_v39 = vld [vmem:[#allocation3 + $0xa0] sm:$0xff]  ;;  %v3433_v60 = vld [vmem:[#allocation6 + $0x98] sm:$0xff] }
 0x3fc   : > { %v3524_v51 = vadd.f32 %v3476_v27, %v3426_v59  ;;  %v3235_v55 = vmul.f32 %v6148_v21, %v3184_v57  ;;  %v3185_v36 = vsub.f32 %v2230_v42, %v3051_v18  ;;  %v3043_v43 = vadd.f32 %v3042_v50, %v6181_v45  ;;  %3326 = vst [vmem:[#allocation2 + $0x68] sm:$0xff] %v3278_v49  ;;  %v2277_v45 = vld [vmem:[#allocation2 + $0x88] sm:$0xff]  ;;  %v2234_v57 = vld [vmem:[#allocation3 + $0xb8] sm:$0xff] }
 0x3fd   : > { %3574 = vst [vmem:[#allocation6 + $0x70] sm:$0xff] %v3526_v9  ;;  %3396 = vst [vmem:[#allocation4 + $0x38] sm:$0xff] %v3368_v35  ;;  %v3527_v41 = vadd.f32 %v3479_v17, %v3429_v47  ;;  %v3367_v7 = vpack.c.bf16 %v3278_v49, %v3277_v30  ;;  %v3477_v37 = vmul.f32 %v6154_v48, %v3278_v49  ;;  %v3431_v35 = vld [vmem:[#allocation6 + $0x88] sm:$0xff] }
 0x3fe   : > { %v3233_v0 = vmul.f32 %v6148_v21, %v3182_v23  ;;  %3572 = vst [vmem:[#allocation6 + $0x60] sm:$0xff] %v3524_v51  ;;  %v3283_v5 = vsub.f32 %v3235_v55, %v2278_v54  ;;  %v3236_v53 = vmul.f32 %v6148_v21, %v3185_v36  ;;  %v3183_v61 = vsub.f32 %v2228_v20, %v3043_v43  ;;  %v2232_v23 = vld [vmem:[#allocation3 + $0xa8] sm:$0xff]  ;;  %v2280_v55 = vld [vmem:[#allocation2 + $0xa0] sm:$0xff] }
 0x3ff   : > { %3575 = vst [vmem:[#allocation6 + $0x78] sm:$0xff] %v3527_v41  ;;  %3395 = vst [vmem:[#allocation4 + $0x30] sm:$0xff] %v3367_v7  ;;  %v3525_v56 = vadd.f32 %v3477_v37, %v3427_v52  ;;  %v2838_v12 = vpop.f32.mrb[44].mxu0  ;;  %v4699_v13 = vpop.f32.mrb[44].mxu1  ;;  %v2282_v52 = vld [vmem:[#allocation2 + $0xb0] sm:$0xff]  ;;  %v2283_v37 = vld [vmem:[#allocation2 + $0xb8] sm:$0xff] }
 0x400   : > { %v3281_v4 = vsub.f32 %v3233_v0, %v2276_v10  ;;  %3331 = vst [vmem:[#allocation2 + $0x90] sm:$0xff] %v3283_v5  ;;  %v3482_v34 = vmul.f32 %v6154_v48, %v3283_v5  ;;  %v3284_v19 = vsub.f32 %v3236_v53, %v2279_v2  ;;  %v3234_v30 = vmul.f32 %v6148_v21, %v3183_v61  ;;  %v2840_v32 = vpop.f32.mrb[45].mxu0  ;;  %v3055_v44 = vpop.f32.mrb[45].mxu1  ;;  %v2281_v61 = vld [vmem:[#allocation2 + $0xa8] sm:$0xff] }
 0x401   : > { %v3064_v3 = vadd.f32 %v4699_v13, %v2838_v12  ;;  %3573 = vst [vmem:[#allocation6 + $0x68] sm:$0xff] %v3525_v56  ;;  %v3056_v24 = vadd.f32 %v3055_v44, %v6204_v22  ;;  %v2841_v28 = vpop.f32.mrb[46].mxu0  ;;  %v4700_v42 = vpop.f32.mrb[46].mxu1 }
 0x402   : > { %3329 = vst [vmem:[#allocation2 + $0x80] sm:$0xff] %v3281_v4  ;;  %v3480_v59 = vmul.f32 %v6154_v48, %v3281_v4  ;;  %v3530_v46 = vadd.f32 %v3482_v34, %v3432_v6  ;;  %3332 = vst [vmem:[#allocation2 + $0x98] sm:$0xff] %v3284_v19  ;;  %v3370_v9 = vpack.c.bf16 %v3284_v19, %v3283_v5  ;;  %v2843_v18 = vpop.f32.mrb[47].mxu0  ;;  %v3058_v26 = vpop.f32.mrb[47].mxu1 }
 0x403   : > { %v3483_v27 = vmul.f32 %v6154_v48, %v3284_v19  ;;  %v3282_v47 = vsub.f32 %v3234_v30, %v2277_v45  ;;  %v3188_v17 = vsub.f32 %v2233_v29, %v3064_v3  ;;  %v3186_v49 = vsub.f32 %v2231_v39, %v3056_v24  ;;  %v2235_v30 = vld [vmem:[#allocation3 + $0xc0] sm:$0xff]  ;;  %v3437_v39 = vld [vmem:[#allocation6 + $0xb8] sm:$0xff] }
 0x404   : > { %v3528_v50 = vadd.f32 %v3480_v59, %v3430_v25  ;;  %v3067_v54 = vadd.f32 %v4700_v42, %v2841_v28  ;;  %3578 = vst [vmem:[#allocation6 + $0x90] sm:$0xff] %v3530_v46  ;;  %3398 = vst [vmem:[#allocation4 + $0x48] sm:$0xff] %v3370_v9  ;;  %v3059_v10 = vadd.f32 %v3058_v26, %v6210_v11  ;;  %v3436_v11 = vld [vmem:[#allocation6 + $0xb0] sm:$0xff]  ;;  %v3435_v9 = vld [vmem:[#allocation6 + $0xa8] sm:$0xff] }
 0x405   : > { %v3531_v22 = vadd.f32 %v3483_v27, %v3433_v60  ;;  %3330 = vst [vmem:[#allocation2 + $0x88] sm:$0xff] %v3282_v47  ;;  %v3369_v20 = vpack.c.bf16 %v3282_v47, %v3281_v4  ;;  %v3481_v51 = vmul.f32 %v6154_v48, %v3282_v47  ;;  %v3239_v36 = vmul.f32 %v6148_v21, %v3188_v17  ;;  %v3434_v4 = vld [vmem:[#allocation6 + $0xa0] sm:$0xff]  ;;  %v2236_v27 = vld [vmem:[#allocation3 + $0xc8] sm:$0xff] }
 0x406   : > { %3576 = vst [vmem:[#allocation6 + $0x80] sm:$0xff] %v3528_v50  ;;  %v3237_v43 = vmul.f32 %v6148_v21, %v3186_v49  ;;  %v3189_v41 = vsub.f32 %v2234_v57, %v3067_v54  ;;  %v3187_v0 = vsub.f32 %v2232_v23, %v3059_v10  ;;  %v2285_v23 = vld [vmem:[#allocation2 + $0xc8] sm:$0xff] }
 0x407   : > { %3579 = vst [vmem:[#allocation6 + $0x98] sm:$0xff] %v3531_v22  ;;  %3397 = vst [vmem:[#allocation4 + $0x40] sm:$0xff] %v3369_v20  ;;  %v3529_v7 = vadd.f32 %v3481_v51, %v3431_v35  ;;  %v3287_v2 = vsub.f32 %v3239_v36, %v2282_v52  ;;  %v2846_v56 = vpop.f32.mrb[48].mxu0  ;;  %v4703_v6 = vpop.f32.mrb[48].mxu1  ;;  %v2284_v35 = vld [vmem:[#allocation2 + $0xc0] sm:$0xff]  ;;  %v2237_v22 = vld [vmem:[#allocation3 + $0xd0] sm:$0xff] }
 0x408   : > { %v3285_v5 = vsub.f32 %v3237_v43, %v2280_v55  ;;  %v3240_v53 = vmul.f32 %v6148_v21, %v3189_v41  ;;  %v3238_v45 = vmul.f32 %v6148_v21, %v3187_v0  ;;  %v2848_v12 = vpop.f32.mrb[49].mxu0  ;;  %v3071_v13 = vpop.f32.mrb[49].mxu1  ;;  %v3438_v41 = vld [vmem:[#allocation6 + $0xc0] sm:$0xff] }
 0x409   : > { %3577 = vst [vmem:[#allocation6 + $0x88] sm:$0xff] %v3529_v7  ;;  %3335 = vst [vmem:[#allocation2 + $0xb0] sm:$0xff] %v3287_v2  ;;  %v3486_v34 = vmul.f32 %v6154_v48, %v3287_v2  ;;  %v3072_v29 = vadd.f32 %v3071_v13, %v2846_v56  ;;  %v2849_v3 = vpop.f32.mrb[50].mxu0  ;;  %v4704_v32 = vpop.f32.mrb[50].mxu1 }
 0x40a   : > { %3333 = vst [vmem:[#allocation2 + $0xa0] sm:$0xff] %v3285_v5  ;;  %v3484_v25 = vmul.f32 %v6154_v48, %v3285_v5  ;;  %v3288_v19 = vsub.f32 %v3240_v53, %v2283_v37  ;;  %v3286_v44 = vsub.f32 %v3238_v45, %v2281_v61  ;;  %v2851_v59 = vpop.f32.mrb[51].mxu0  ;;  %v3074_v60 = vpop.f32.mrb[51].mxu1  ;;  %v2238_v53 = vld [vmem:[#allocation3 + $0xd8] sm:$0xff]  ;;  %v2286_v45 = vld [vmem:[#allocation2 + $0xd0] sm:$0xff] }
 0x40b   : > { %v3534_v24 = vadd.f32 %v3486_v34, %v3436_v11  ;;  %v3190_v18 = vsub.f32 %v2235_v30, %v3072_v29  ;;  %v3075_v26 = vadd.f32 %v3074_v60, %v2849_v3  ;;  %v2287_v29 = vld [vmem:[#allocation2 + $0xd8] sm:$0xff]  ;;  %v3440_v3 = vld [vmem:[#allocation6 + $0xd0] sm:$0xff] }
 0x40c   : > { %v3532_v28 = vadd.f32 %v3484_v25, %v3434_v4  ;;  %3336 = vst [vmem:[#allocation2 + $0xb8] sm:$0xff] %v3288_v19  ;;  %v3372_v42 = vpack.c.bf16 %v3288_v19, %v3287_v2  ;;  %v3487_v46 = vmul.f32 %v6154_v48, %v3288_v19  ;;  %3334 = vst [vmem:[#allocation2 + $0xa8] sm:$0xff] %v3286_v44  ;;  %v3439_v4 = vld [vmem:[#allocation6 + $0xc8] sm:$0xff] }
 0x40d   : > { %v3371_v47 = vpack.c.bf16 %v3286_v44, %v3285_v5  ;;  %v3485_v57 = vmul.f32 %v6154_v48, %v3286_v44  ;;  %3582 = vst [vmem:[#allocation6 + $0xb0] sm:$0xff] %v3534_v24  ;;  %v3241_v49 = vmul.f32 %v6148_v21, %v3190_v18  ;;  %v3191_v54 = vsub.f32 %v2236_v27, %v3075_v26  ;;  %v3441_v18 = vld [vmem:[#allocation6 + $0xd8] sm:$0xff] }
 0x40e   : > { %3580 = vst [vmem:[#allocation6 + $0xa0] sm:$0xff] %v3532_v28  ;;  %3400 = vst [vmem:[#allocation4 + $0x58] sm:$0xff] %v3372_v42  ;;  %v3535_v50 = vadd.f32 %v3487_v46, %v3437_v39  ;;  %v2239_v39 = vld [vmem:[#allocation3 + $0xe0] sm:$0xff] }
 0x40f   : > { %3399 = vst [vmem:[#allocation4 + $0x50] sm:$0xff] %v3371_v47  ;;  %v3533_v17 = vadd.f32 %v3485_v57, %v3435_v9  ;;  %v2854_v20 = vpop.f32.mrb[52].mxu0  ;;  %v6235_v51 = vpop.f32.mrb[52].mxu1  ;;  %v3289_v52 = vsub.f32 %v3241_v49, %v2284_v35  ;;  %v3242_v55 = vmul.f32 %v6148_v21, %v3191_v54  ;;  %v2240_v9 = vld [vmem:[#allocation3 + $0xe8] sm:$0xff] }
 0x410   : > { %3583 = vst [vmem:[#allocation6 + $0xb8] sm:$0xff] %v3535_v50  ;;  %v3080_v10 = vadd.f32 %v4703_v6, %v2854_v20  ;;  %v2856_v36 = vpop.f32.mrb[53].mxu0  ;;  %v3087_v43 = vpop.f32.mrb[53].mxu1 }
 0x411   : > { %3581 = vst [vmem:[#allocation6 + $0xa8] sm:$0xff] %v3533_v17  ;;  %v2857_v7 = vpop.f32.mrb[54].mxu0  ;;  %v6238_v37 = vpop.f32.mrb[54].mxu1  ;;  %3337 = vst [vmem:[#allocation2 + $0xc0] sm:$0xff] %v3289_v52  ;;  %v3488_v0 = vmul.f32 %v6154_v48, %v3289_v52  ;;  %v3290_v2 = vsub.f32 %v3242_v55, %v2285_v23  ;;  %v2288_v23 = vld [vmem:[#allocation2 + $0xe0] sm:$0xff]  ;;  %v2289_v55 = vld [vmem:[#allocation2 + $0xe8] sm:$0xff] }
 0x412   : > { %v3192_v5 = vsub.f32 %v2237_v22, %v3080_v10  ;;  %v3083_v61 = vadd.f32 %v4704_v32, %v2857_v7  ;;  %v2859_v56 = vpop.f32.mrb[55].mxu0  ;;  %v3090_v11 = vpop.f32.mrb[55].mxu1 }
 0x413   : > { %v3536_v12 = vadd.f32 %v3488_v0, %v3438_v41  ;;  %3338 = vst [vmem:[#allocation2 + $0xc8] sm:$0xff] %v3290_v2  ;;  %v3373_v6 = vpack.c.bf16 %v3290_v2, %v3289_v52  ;;  %v3489_v13 = vmul.f32 %v6154_v48, %v3290_v2  ;;  %v2241_v41 = vld [vmem:[#allocation3 + $0xf0] sm:$0xff] }
 0x414   : > { %v3243_v34 = vmul.f32 %v6148_v21, %v3192_v5  ;;  %v3193_v25 = vsub.f32 %v2238_v53, %v3083_v61  ;;  %v2249_v61 = vld [vmem:[#allocation3 + $0x130] sm:$0xff] }
 0x415   : > { %3584 = vst [vmem:[#allocation6 + $0xc0] sm:$0xff] %v3536_v12  ;;  %3401 = vst [vmem:[#allocation4 + $0x60] sm:$0xff] %v3373_v6  ;;  %v3537_v19 = vadd.f32 %v3489_v13, %v3439_v4  ;;  %v2247_v4 = vld [vmem:[#allocation3 + $0x120] sm:$0xff]  ;;  %v3443_v12 = vld [vmem:[#allocation6 + $0xe8] sm:$0xff] }
 0x416   : > { %v3291_v30 = vsub.f32 %v3243_v34, %v2286_v45  ;;  %v3244_v32 = vmul.f32 %v6148_v21, %v3193_v25 }
 0x417   : > { %v2862_v44 = vpop.f32.mrb[56].mxu0  ;;  %v6244_v59 = vpop.f32.mrb[56].mxu1  ;;  %3585 = vst [vmem:[#allocation6 + $0xc8] sm:$0xff] %v3537_v19 }
 0x418   : > { %3339 = vst [vmem:[#allocation2 + $0xd0] sm:$0xff] %v3291_v30  ;;  %v3490_v60 = vmul.f32 %v6154_v48, %v3291_v30  ;;  %v3088_v24 = vadd.f32 %v3087_v43, %v2862_v44  ;;  %v2864_v28 = vpop.f32.mrb[57].mxu0  ;;  %v6247_v42 = vpop.f32.mrb[57].mxu1  ;;  %v3292_v46 = vsub.f32 %v3244_v32, %v2287_v29  ;;  %v3442_v43 = vld [vmem:[#allocation6 + $0xe0] sm:$0xff]  ;;  %v2250_v32 = vld [vmem:[#allocation3 + $0x138] sm:$0xff]  ;;  %v2290_v44 = vld [vmem:[#allocation2 + $0xf0] sm:$0xff] }
 0x419   : > { %v2865_v27 = vpop.f32.mrb[58].mxu0  ;;  %v6249_v47 = vpop.f32.mrb[58].mxu1 }
 0x41a   : > { %v3538_v57 = vadd.f32 %v3490_v60, %v3440_v3  ;;  %v3194_v26 = vsub.f32 %v2239_v39, %v3088_v24  ;;  %v3091_v50 = vadd.f32 %v3090_v11, %v2865_v27  ;;  %v2867_v35 = vpop.f32.mrb[59].mxu0  ;;  %v6251_v17 = vpop.f32.mrb[59].mxu1  ;;  %3340 = vst [vmem:[#allocation2 + $0xd8] sm:$0xff] %v3292_v46  ;;  %v3374_v49 = vpack.c.bf16 %v3292_v46, %v3291_v30  ;;  %v2242_v3 = vld [vmem:[#allocation3 + $0xf8] sm:$0xff]  ;;  %v2298_v27 = vld [vmem:[#allocation2 + $0x130] sm:$0xff] }
 0x41b   : > { %v3491_v54 = vmul.f32 %v6154_v48, %v3292_v46 }
 0x41c   : > { %3586 = vst [vmem:[#allocation6 + $0xd0] sm:$0xff] %v3538_v57  ;;  %v3245_v22 = vmul.f32 %v6148_v21, %v3194_v26  ;;  %v3195_v20 = vsub.f32 %v2240_v9, %v3091_v50  ;;  %3402 = vst [vmem:[#allocation4 + $0x68] sm:$0xff] %v3374_v49  ;;  %v2296_v57 = vld [vmem:[#allocation2 + $0x120] sm:$0xff] }
 0x41d   : > { %v3539_v52 = vadd.f32 %v3491_v54, %v3441_v18  ;;  %v3444_v54 = vld [vmem:[#allocation6 + $0xf0] sm:$0xff] }
 0x41e   : > { %v3293_v10 = vsub.f32 %v3245_v22, %v2288_v23  ;;  %v3246_v36 = vmul.f32 %v6148_v21, %v3195_v20  ;;  %v2299_v23 = vld [vmem:[#allocation2 + $0x138] sm:$0xff] }
 0x41f   : > { %3587 = vst [vmem:[#allocation6 + $0xd8] sm:$0xff] %v3539_v52  ;;  %v2870_v7 = vpop.f32.mrb[60].mxu0  ;;  %v4715_v0 = vpop.f32.mrb[60].mxu1 }
 0x420   : > { %3341 = vst [vmem:[#allocation2 + $0xe0] sm:$0xff] %v3293_v10  ;;  %v3492_v2 = vmul.f32 %v6154_v48, %v3293_v10  ;;  %v3294_v5 = vsub.f32 %v3246_v36, %v2289_v55  ;;  %v3096_v53 = vadd.f32 %v6235_v51, %v2870_v7  ;;  %v3128_v56 = vadd.f32 %v4715_v0, %v6108_v8  ;;  %v2872_v11 = vpop.f32.mrb[61].mxu0  ;;  %v3119_v45 = vpop.f32.mrb[61].mxu1  ;;  %v2297_v36 = vld [vmem:[#allocation2 + $0x128] sm:$0xff] }
 0x421   : > { %v3120_v6 = vadd.f32 %v3119_v45, %v6102_v63  ;;  %v2873_v13 = vpop.f32.mrb[62].mxu0  ;;  %v4716_v34 = vpop.f32.mrb[62].mxu1  ;;  %v2248_v63 = vld [vmem:[#allocation3 + $0x128] sm:$0xff] }
 0x422   : > { %v3540_v25 = vadd.f32 %v3492_v2, %v3442_v43  ;;  %3342 = vst [vmem:[#allocation2 + $0xe8] sm:$0xff] %v3294_v5  ;;  %v3375_v19 = vpack.c.bf16 %v3294_v5, %v3293_v10  ;;  %v3493_v30 = vmul.f32 %v6154_v48, %v3294_v5  ;;  %v3196_v29 = vsub.f32 %v2241_v41, %v3096_v53  ;;  %v2875_v51 = vpop.f32.mrb[63].mxu0  ;;  %v3122_v39 = vpop.f32.mrb[63].mxu1  ;;  %v2253_v41 = vld [vmem:[#allocation3 + $0x150] sm:$0xff]  ;;  %v3450_v5 = vld [vmem:[#allocation6 + $0x120] sm:$0xff] }
 0x423   : > { %v3204_v8 = vsub.f32 %v2249_v61, %v3128_v56  ;;  %v3202_v60 = vsub.f32 %v2247_v4, %v3120_v6  ;;  %v3099_v24 = vadd.f32 %v6238_v37, %v2873_v13  ;;  %v3131_v28 = vadd.f32 %v4716_v34, %v6110_v62  ;;  %v2291_v62 = vld [vmem:[#allocation2 + $0xf8] sm:$0xff]  ;;  %v3452_v2 = vld [vmem:[#allocation6 + $0x130] sm:$0xff] }
 0x424   : > { %3588 = vst [vmem:[#allocation6 + $0xe0] sm:$0xff] %v3540_v25  ;;  %3403 = vst [vmem:[#allocation4 + $0x70] sm:$0xff] %v3375_v19  ;;  %v3541_v46 = vadd.f32 %v3493_v30, %v3443_v12  ;;  %v3247_v9 = vmul.f32 %v6148_v21, %v3196_v29  ;;  %v3123_v18 = vadd.f32 %v3122_v39, %v6106_v16  ;;  %v2243_v16 = vld [vmem:[#allocation3 + $0x100] sm:$0xff]  ;;  %v3445_v30 = vld [vmem:[#allocation6 + $0xf8] sm:$0xff] }
 0x425   : > { %v3255_v26 = vmul.f32 %v6148_v21, %v3204_v8  ;;  %v3253_v50 = vmul.f32 %v6148_v21, %v3202_v60  ;;  %v3197_v35 = vsub.f32 %v2242_v3, %v3099_v24  ;;  %v3205_v49 = vsub.f32 %v2250_v32, %v3131_v28  ;;  %v3453_v60 = vld [vmem:[#allocation6 + $0x138] sm:$0xff]  ;;  %v3451_v24 = vld [vmem:[#allocation6 + $0x128] sm:$0xff] }
 0x426   : > { %3589 = vst [vmem:[#allocation6 + $0xe8] sm:$0xff] %v3541_v46  ;;  %v3295_v37 = vsub.f32 %v3247_v9, %v2290_v44  ;;  %v3203_v22 = vsub.f32 %v2248_v63, %v3123_v18  ;;  %v2251_v18 = vld [vmem:[#allocation3 + $0x140] sm:$0xff] }
 0x427   : > { %v3303_v20 = vsub.f32 %v3255_v26, %v2298_v27  ;;  %v3301_v52 = vsub.f32 %v3253_v50, %v2296_v57  ;;  %v3248_v55 = vmul.f32 %v6148_v21, %v3197_v35  ;;  %v3256_v10 = vmul.f32 %v6148_v21, %v3205_v49  ;;  %v2878_v43 = vpop.f32.mrb[64].mxu0  ;;  %v4719_v7 = vpop.f32.mrb[64].mxu1  ;;  %v2292_v27 = vld [vmem:[#allocation2 + $0x100] sm:$0xff]  ;;  %v2302_v57 = vld [vmem:[#allocation2 + $0x150] sm:$0xff] }
 0x428   : > { %3343 = vst [vmem:[#allocation2 + $0xf0] sm:$0xff] %v3295_v37  ;;  %v3494_v0 = vmul.f32 %v6154_v48, %v3295_v37  ;;  %v3254_v53 = vmul.f32 %v6148_v21, %v3203_v22  ;;  %v3104_v61 = vadd.f32 %v6247_v42, %v2878_v43  ;;  %v3144_v56 = vadd.f32 %v4719_v7, %v6122_v38  ;;  %v2880_v11 = vpop.f32.mrb[65].mxu0  ;;  %v3135_v4 = vpop.f32.mrb[65].mxu1 }
 0x429   : > { %3351 = vst [vmem:[#allocation2 + $0x130] sm:$0xff] %v3303_v20  ;;  %v3502_v45 = vmul.f32 %v6154_v48, %v3303_v20  ;;  %3349 = vst [vmem:[#allocation2 + $0x120] sm:$0xff] %v3301_v52  ;;  %v3500_v12 = vmul.f32 %v6154_v48, %v3301_v52  ;;  %v3296_v6 = vsub.f32 %v3248_v55, %v2291_v62  ;;  %v2881_v34 = vpop.f32.mrb[66].mxu0  ;;  %v4720_v25 = vpop.f32.mrb[66].mxu1 }
 0x42a   : > { %v3304_v13 = vsub.f32 %v3256_v10, %v2299_v23  ;;  %v3542_v19 = vadd.f32 %v3494_v0, %v3444_v54  ;;  %v3302_v29 = vsub.f32 %v3254_v53, %v2297_v36  ;;  %v3198_v3 = vsub.f32 %v2243_v16, %v3104_v61  ;;  %v2883_v42 = vpop.f32.mrb[67].mxu0  ;;  %v3138_v51 = vpop.f32.mrb[67].mxu1  ;;  %v2254_v54 = vld [vmem:[#allocation3 + $0x158] sm:$0xff]  ;;  %v3446_v0 = vld [vmem:[#allocation6 + $0x100] sm:$0xff] }
 0x42b   : > { %v3208_v32 = vsub.f32 %v2253_v41, %v3144_v56  ;;  %v3550_v38 = vadd.f32 %v3502_v45, %v3452_v2  ;;  %v3548_v39 = vadd.f32 %v3500_v12, %v3450_v5  ;;  %3344 = vst [vmem:[#allocation2 + $0xf8] sm:$0xff] %v3296_v6  ;;  %v3376_v44 = vpack.c.bf16 %v3296_v6, %v3295_v37  ;;  %v2244_v37 = vld [vmem:[#allocation3 + $0x108] sm:$0xff]  ;;  %v2257_v41 = vld [vmem:[#allocation3 + $0x170] sm:$0xff] }
 0x42c   : > { %v3495_v8 = vmul.f32 %v6154_v48, %v3296_v6  ;;  %3352 = vst [vmem:[#allocation2 + $0x138] sm:$0xff] %v3304_v13  ;;  %3590 = vst [vmem:[#allocation6 + $0xf0] sm:$0xff] %v3542_v19  ;;  %v3380_v28 = vpack.c.bf16 %v3304_v13, %v3303_v20  ;;  %v3503_v63 = vmul.f32 %v6154_v48, %v3304_v13  ;;  %v3456_v2 = vld [vmem:[#allocation6 + $0x150] sm:$0xff]  ;;  %v2293_v12 = vld [vmem:[#allocation2 + $0x108] sm:$0xff] }
 0x42d   : > { %3350 = vst [vmem:[#allocation2 + $0x128] sm:$0xff] %v3302_v29  ;;  %v3379_v46 = vpack.c.bf16 %v3302_v29, %v3301_v52  ;;  %v3501_v9 = vmul.f32 %v6154_v48, %v3302_v29  ;;  %3598 = vst [vmem:[#allocation6 + $0x130] sm:$0xff] %v3550_v38  ;;  %v3249_v50 = vmul.f32 %v6148_v21, %v3198_v3  ;;  %v2252_v52 = vld [vmem:[#allocation3 + $0x148] sm:$0xff]  ;;  %v2303_v6 = vld [vmem:[#allocation2 + $0x158] sm:$0xff] }
 0x42e   : > { %3596 = vst [vmem:[#allocation6 + $0x120] sm:$0xff] %v3548_v39  ;;  %3404 = vst [vmem:[#allocation4 + $0x78] sm:$0xff] %v3376_v44  ;;  %v3543_v26 = vadd.f32 %v3495_v8, %v3445_v30  ;;  %v3259_v35 = vmul.f32 %v6148_v21, %v3208_v32  ;;  %v3136_v49 = vadd.f32 %v3135_v4, %v6114_v1  ;;  %v2245_v1 = vld [vmem:[#allocation3 + $0x110] sm:$0xff]  ;;  %v2301_v19 = vld [vmem:[#allocation2 + $0x148] sm:$0xff] }
 0x42f   : > { %3408 = vst [vmem:[#allocation4 + $0x98] sm:$0xff] %v3380_v28  ;;  %v3551_v62 = vadd.f32 %v3503_v63, %v3453_v60  ;;  %3407 = vst [vmem:[#allocation4 + $0x90] sm:$0xff] %v3379_v46  ;;  %v3549_v23 = vadd.f32 %v3501_v9, %v3451_v24  ;;  %v3107_v22 = vadd.f32 %v6251_v17, %v2881_v34  ;;  %v2886_v43 = vpop.f32.mrb[68].mxu0  ;;  %v4723_v7 = vpop.f32.mrb[68].mxu1  ;;  %v2300_v17 = vld [vmem:[#allocation2 + $0x140] sm:$0xff]  ;;  %v2294_v24 = vld [vmem:[#allocation2 + $0x110] sm:$0xff] }
 0x430   : > { %v3147_v20 = vadd.f32 %v4720_v25, %v6126_v14  ;;  %3591 = vst [vmem:[#allocation6 + $0xf8] sm:$0xff] %v3543_v26  ;;  %v6283_v55 = vsub.f32 %v3249_v50, %v2292_v27  ;;  %v6285_v10 = vsub.f32 %v3259_v35, %v2302_v57  ;;  %v3206_v36 = vsub.f32 %v2251_v18, %v3136_v49  ;;  %v2888_v56 = vpop.f32.mrb[69].mxu0  ;;  %v3151_v11 = vpop.f32.mrb[69].mxu1  ;;  %v3454_v44 = vld [vmem:[#allocation6 + $0x140] sm:$0xff]  ;;  %v3447_v27 = vld [vmem:[#allocation6 + $0x108] sm:$0xff]  ;;  %v3457_v57 = vld [vmem:[#allocation6 + $0x158] sm:$0xff] }
 0x431   : > { %v3139_v16 = vadd.f32 %v3138_v51, %v6118_v33  ;;  %3599 = vst [vmem:[#allocation6 + $0x138] sm:$0xff] %v3551_v62  ;;  %3597 = vst [vmem:[#allocation6 + $0x128] sm:$0xff] %v3549_v23  ;;  %v3199_v5 = vsub.f32 %v2244_v37, %v3107_v22  ;;  %v3112_v53 = vadd.f32 %v6244_v59, %v2886_v43  ;;  %v2889_v59 = vpop.f32.mrb[70].mxu0  ;;  %v4724_v34 = vpop.f32.mrb[70].mxu1  ;;  %v2255_v46 = vld [vmem:[#allocation3 + $0x160] sm:$0xff]  ;;  %v2306_v26 = vld [vmem:[#allocation2 + $0x170] sm:$0xff] }
 0x432   : > { %v3209_v14 = vsub.f32 %v2254_v54, %v3147_v20  ;;  %v3160_v61 = vadd.f32 %v4723_v7, %v6138_v15  ;;  %3345 = vst [vmem:[#allocation2 + $0x100] sm:$0xff] %v6283_v55  ;;  %v3496_v33 = vmul.f32 %v6154_v48, %v6283_v55  ;;  %3355 = vst [vmem:[#allocation2 + $0x150] sm:$0xff] %v6285_v10  ;;  %v2891_v3 = vpop.f32.mrb[71].mxu0  ;;  %v3154_v32 = vpop.f32.mrb[71].mxu1  ;;  %v3455_v23 = vld [vmem:[#allocation6 + $0x148] sm:$0xff]  ;;  %v2246_v22 = vld [vmem:[#allocation3 + $0x118] sm:$0xff] }
 0x433   : > { %v3506_v4 = vmul.f32 %v6154_v48, %v6285_v10  ;;  %v3257_v45 = vmul.f32 %v6148_v21, %v3206_v36  ;;  %v3207_v13 = vsub.f32 %v2252_v52, %v3139_v16  ;;  %v3250_v15 = vmul.f32 %v6148_v21, %v3199_v5  ;;  %v2295_v56 = vld [vmem:[#allocation2 + $0x118] sm:$0xff] }
 0x434   : > { %v3260_v25 = vmul.f32 %v6148_v21, %v3209_v14  ;;  %v3200_v30 = vsub.f32 %v2245_v1, %v3112_v53  ;;  %v3212_v29 = vsub.f32 %v2257_v41, %v3160_v61  ;;  %v3544_v42 = vadd.f32 %v3496_v33, %v3446_v0  ;;  %v2258_v41 = vld [vmem:[#allocation3 + $0x178] sm:$0xff]  ;;  %v3460_v0 = vld [vmem:[#allocation6 + $0x170] sm:$0xff]  ;;  %v2256_v14 = vld [vmem:[#allocation3 + $0x168] sm:$0xff] }
 0x435   : > { %v3554_v51 = vadd.f32 %v3506_v4, %v3456_v2  ;;  %v3305_v38 = vsub.f32 %v3257_v45, %v2300_v17  ;;  %v3258_v39 = vmul.f32 %v6148_v21, %v3207_v13  ;;  %v3298_v8 = vsub.f32 %v3250_v15, %v2293_v12  ;;  %v2304_v2 = vld [vmem:[#allocation2 + $0x160] sm:$0xff]  ;;  %v2307_v13 = vld [vmem:[#allocation2 + $0x178] sm:$0xff] }
 0x436   : > { %v3308_v60 = vsub.f32 %v3260_v25, %v2303_v6  ;;  %v3251_v28 = vmul.f32 %v6148_v21, %v3200_v30  ;;  %v3263_v63 = vmul.f32 %v6148_v21, %v3212_v29  ;;  %3592 = vst [vmem:[#allocation6 + $0x100] sm:$0xff] %v3544_v42  ;;  %v3152_v50 = vadd.f32 %v3151_v11, %v6130_v40  ;;  %v2305_v25 = vld [vmem:[#allocation2 + $0x168] sm:$0xff] }
 0x437   : > { %3602 = vst [vmem:[#allocation6 + $0x150] sm:$0xff] %v3554_v51  ;;  %3353 = vst [vmem:[#allocation2 + $0x140] sm:$0xff] %v3305_v38  ;;  %v3504_v9 = vmul.f32 %v6154_v48, %v3305_v38  ;;  %v3306_v18 = vsub.f32 %v3258_v39, %v2301_v19  ;;  %v3115_v35 = vadd.f32 %v6249_v47, %v2889_v59  ;;  %v3458_v59 = vld [vmem:[#allocation6 + $0x160] sm:$0xff]  ;;  %v3461_v51 = vld [vmem:[#allocation6 + $0x178] sm:$0xff] }
 0x438   : > { %3346 = vst [vmem:[#allocation2 + $0x108] sm:$0xff] %v3298_v8  ;;  %v3377_v49 = vpack.c.bf16 %v3298_v8, %v6283_v55  ;;  %v3497_v37 = vmul.f32 %v6154_v48, %v3298_v8  ;;  %3356 = vst [vmem:[#allocation2 + $0x158] sm:$0xff] %v3308_v60  ;;  %v3382_v54 = vpack.c.bf16 %v3308_v60, %v6285_v10  ;;  %v3448_v55 = vld [vmem:[#allocation6 + $0x110] sm:$0xff] }
 0x439   : > { %v3507_v62 = vmul.f32 %v6154_v48, %v3308_v60  ;;  %v3552_v20 = vadd.f32 %v3504_v9, %v3454_v44  ;;  %3354 = vst [vmem:[#allocation2 + $0x148] sm:$0xff] %v3306_v18  ;;  %v3381_v52 = vpack.c.bf16 %v3306_v18, %v3305_v38  ;;  %v3505_v36 = vmul.f32 %v6154_v48, %v3306_v18  ;;  %v3459_v60 = vld [vmem:[#allocation6 + $0x168] sm:$0xff] }
 0x43a   : > { %v3299_v40 = vsub.f32 %v3251_v28, %v2294_v24  ;;  %3405 = vst [vmem:[#allocation4 + $0x80] sm:$0xff] %v3377_v49  ;;  %v3545_v47 = vadd.f32 %v3497_v37, %v3447_v27  ;;  %3410 = vst [vmem:[#allocation4 + $0xa8] sm:$0xff] %v3382_v54  ;;  %v3311_v1 = vsub.f32 %v3263_v63, %v2306_v26 }
 0x43b   : > { %v3555_v16 = vadd.f32 %v3507_v62, %v3457_v57  ;;  %v3210_v43 = vsub.f32 %v2255_v46, %v3152_v50  ;;  %3600 = vst [vmem:[#allocation6 + $0x140] sm:$0xff] %v3552_v20  ;;  %3409 = vst [vmem:[#allocation4 + $0xa0] sm:$0xff] %v3381_v52  ;;  %v3553_v10 = vadd.f32 %v3505_v36, %v3455_v23 }
 0x43c   : > { %3347 = vst [vmem:[#allocation2 + $0x110] sm:$0xff] %v3299_v40  ;;  %v3498_v7 = vmul.f32 %v6154_v48, %v3299_v40  ;;  %v3201_v17 = vsub.f32 %v2246_v22, %v3115_v35  ;;  %v3163_v5 = vadd.f32 %v4724_v34, %v6143_v31  ;;  %3593 = vst [vmem:[#allocation6 + $0x108] sm:$0xff] %v3545_v47 }
 0x43d   : > { %3603 = vst [vmem:[#allocation6 + $0x158] sm:$0xff] %v3555_v16  ;;  %3359 = vst [vmem:[#allocation2 + $0x170] sm:$0xff] %v3311_v1  ;;  %v3510_v53 = vmul.f32 %v6154_v48, %v3311_v1  ;;  %v3261_v61 = vmul.f32 %v6148_v21, %v3210_v43  ;;  %v3155_v11 = vadd.f32 %v3154_v32, %v6134_v58  ;;  %v3449_v58 = vld [vmem:[#allocation6 + $0x118] sm:$0xff] }
 0x43e   : > { %3601 = vst [vmem:[#allocation6 + $0x148] sm:$0xff] %v3553_v10  ;;  %v3546_v33 = vadd.f32 %v3498_v7, %v3448_v55  ;;  %v3252_v4 = vmul.f32 %v6148_v21, %v3201_v17  ;;  %v3213_v45 = vsub.f32 %v2258_v41, %v3163_v5 }
 0x43f   : > { %v3558_v12 = vadd.f32 %v3510_v53, %v3460_v0  ;;  %v3309_v6 = vsub.f32 %v3261_v61, %v2304_v2  ;;  %v3211_v31 = vsub.f32 %v2256_v14, %v3155_v11 }
 0x440   : > { %3594 = vst [vmem:[#allocation6 + $0x110] sm:$0xff] %v3546_v33  ;;  %v3300_v34 = vsub.f32 %v3252_v4, %v2295_v56  ;;  %v3264_v15 = vmul.f32 %v6148_v21, %v3213_v45 }
 0x441   : > { %3606 = vst [vmem:[#allocation6 + $0x170] sm:$0xff] %v3558_v12  ;;  %3357 = vst [vmem:[#allocation2 + $0x160] sm:$0xff] %v3309_v6  ;;  %v3508_v19 = vmul.f32 %v6154_v48, %v3309_v6  ;;  %v3262_v30 = vmul.f32 %v6148_v21, %v3211_v31 }
 0x442   : > { %3348 = vst [vmem:[#allocation2 + $0x118] sm:$0xff] %v3300_v34  ;;  %v3378_v29 = vpack.c.bf16 %v3300_v34, %v3299_v40  ;;  %v3499_v3 = vmul.f32 %v6154_v48, %v3300_v34  ;;  %v3312_v32 = vsub.f32 %v3264_v15, %v2307_v13 }
 0x443   : > { %v3556_v42 = vadd.f32 %v3508_v19, %v3458_v59  ;;  %v3310_v38 = vsub.f32 %v3262_v30, %v2305_v25 }
 0x444   : > { %3406 = vst [vmem:[#allocation4 + $0x88] sm:$0xff] %v3378_v29  ;;  %v3547_v39 = vadd.f32 %v3499_v3, %v3449_v58  ;;  %3360 = vst [vmem:[#allocation2 + $0x178] sm:$0xff] %v3312_v32  ;;  %v3384_v44 = vpack.c.bf16 %v3312_v32, %v3311_v1  ;;  %v3511_v8 = vmul.f32 %v6154_v48, %v3312_v32 }
 0x445   : > { %3604 = vst [vmem:[#allocation6 + $0x160] sm:$0xff] %v3556_v42  ;;  %3358 = vst [vmem:[#allocation2 + $0x168] sm:$0xff] %v3310_v38  ;;  %v3383_v24 = vpack.c.bf16 %v3310_v38, %v3309_v6  ;;  %v3509_v21 = vmul.f32 %v6154_v48, %v3310_v38 }
 0x446   : > { %3595 = vst [vmem:[#allocation6 + $0x118] sm:$0xff] %v3547_v39  ;;  %3412 = vst [vmem:[#allocation4 + $0xb8] sm:$0xff] %v3384_v44  ;;  %v3559_v28 = vadd.f32 %v3511_v8, %v3461_v51 }
 0x447   : > { %3411 = vst [vmem:[#allocation4 + $0xb0] sm:$0xff] %v3383_v24  ;;  %v3557_v63 = vadd.f32 %v3509_v21, %v3459_v60 }
 0x448   : > { %3607 = vst [vmem:[#allocation6 + $0x178] sm:$0xff] %v3559_v28 }
 0x449   : > { %3605 = vst [vmem:[#allocation6 + $0x168] sm:$0xff] %v3557_v63 }
 0x44a PF: > { %p4488_p1 = scmp.ne.s32.totalorder %s5316_s15, 3 }
 0x44b   : > { %v5151_v46 = vld [vmem:[#allocation14] sm:$0xff] (!%p4488_p1)   ;;  %v5152_v9 = vld [vmem:[#allocation14 + $0x8] sm:$0xff] (!%p4488_p1)   ;;  %v5153_v48 = vld [vmem:[#allocation14 + $0x10] sm:$0xff] (!%p4488_p1)  }
 0x44c   : > { %3611 = sbr.rel (%p4488_p1) target bundleno = 1394 (0x572), region = 68  ;;  %4725 = vmatprep.subr.bf16.mxu0 (!%p4488_p1), %v5151_v46  ;;  %4853 = vmatprep.subr.bf16.mxu1 (!%p4488_p1), %v5151_v46  ;;  %v5154_v27 = vld [vmem:[#allocation14 + $0x18] sm:$0xff] (!%p4488_p1)   ;;  %v3613_v57 = vld [vmem:[#allocation6] sm:$0xff] (!%p4488_p1)  ;;  %v3614_v18 = vld [vmem:[#allocation6 + $0x8] sm:$0xff] (!%p4488_p1) }
 0x44d   : > { %4726 = vmatpush3.bf16.msra.mxu0 (!%p4488_p1), %v5151_v46  ;;  %4861 = vmatpush3.bf16.msra.mxu1 (!%p4488_p1), %v5151_v46  ;;  %v3637_v26 = vld [vmem:[#allocation6 + $0xc0] sm:$0xff] (!%p4488_p1)  ;;  %v3661_v50 = vpack.c.bf16 (!%p4488_p1), %v3614_v18, %v3613_v57  ;;  %v3638_v35 = vld [vmem:[#allocation6 + $0xc8] sm:$0xff] (!%p4488_p1)  ;;  %v5157_v62 = vld [vmem:[#allocation14 + $0x30] sm:$0xff] (!%p4488_p1)  }
 0x44e   : > { %4727 = vmatprep.subr.bf16.mxu0 (!%p4488_p1), %v5152_v9  ;;  %4854 = vmatprep.subr.bf16.mxu1 (!%p4488_p1), %v5152_v9  ;;  %v3673_v49 = vpack.c.bf16 (!%p4488_p1), %v3638_v35, %v3637_v26  ;;  %v5155_v37 = vld [vmem:[#allocation14 + $0x20] sm:$0xff] (!%p4488_p1)   ;;  %v5156_v54 = vld [vmem:[#allocation14 + $0x28] sm:$0xff] (!%p4488_p1)   ;;  %v5158_v23 = vld [vmem:[#allocation14 + $0x38] sm:$0xff] (!%p4488_p1)  }
 0x44f   : > { %4741 = vmatprep.mubr.bf16.mxu0 (!%p4488_p1), %v3661_v50  ;;  %v3615_v22 = vld [vmem:[#allocation6 + $0x10] sm:$0xff] (!%p4488_p1)  ;;  %v3616_v20 = vld [vmem:[#allocation6 + $0x18] sm:$0xff] (!%p4488_p1)  ;;  %v3617_v40 = vld [vmem:[#allocation6 + $0x20] sm:$0xff] (!%p4488_p1) }
 0x450   : > { %4765 = vmatprep.mubr.bf16.mxu1 (!%p4488_p1), %v3673_v49  ;;  %v3639_v52 = vld [vmem:[#allocation6 + $0xd0] sm:$0xff] (!%p4488_p1)  ;;  %v3640_v36 = vld [vmem:[#allocation6 + $0xd8] sm:$0xff] (!%p4488_p1)  ;;  %v3618_v47 = vld [vmem:[#allocation6 + $0x28] sm:$0xff] (!%p4488_p1)  ;;  %v3662_v1 = vpack.c.bf16 (!%p4488_p1), %v3616_v20, %v3615_v22 }
 0x451   : > { %4728 = vmatpush3.bf16.msra.mxu0 (!%p4488_p1), %v5152_v9  ;;  %4862 = vmatpush3.bf16.msra.mxu1 (!%p4488_p1), %v5152_v9  ;;  %v3641_v16 = vld [vmem:[#allocation6 + $0xe0] sm:$0xff] (!%p4488_p1)  ;;  %v3642_v55 = vld [vmem:[#allocation6 + $0xe8] sm:$0xff] (!%p4488_p1)  ;;  %v3674_v43 = vpack.c.bf16 (!%p4488_p1), %v3640_v36, %v3639_v52  ;;  %v3663_v41 = vpack.c.bf16 (!%p4488_p1), %v3618_v47, %v3617_v40  ;;  %v3619_v7 = vld [vmem:[#allocation6 + $0x30] sm:$0xff] (!%p4488_p1) }
 0x452   : > { %4729 = vmatprep.subr.bf16.mxu0 (!%p4488_p1), %v5153_v48  ;;  %4855 = vmatprep.subr.bf16.mxu1 (!%p4488_p1), %v5153_v48  ;;  %v3675_v10 = vpack.c.bf16 (!%p4488_p1), %v3642_v55, %v3641_v16  ;;  %v3620_v0 = vld [vmem:[#allocation6 + $0x38] sm:$0xff] (!%p4488_p1)  ;;  %v3643_v2 = vld [vmem:[#allocation6 + $0xf0] sm:$0xff] (!%p4488_p1)  ;;  %v3621_v5 = vld [vmem:[#allocation6 + $0x40] sm:$0xff] (!%p4488_p1) }
 0x453   : > { %v3644_v17 = vld [vmem:[#allocation6 + $0xf8] sm:$0xff]  ;;  %v3622_v14 = vld [vmem:[#allocation6 + $0x48] sm:$0xff]  ;;  %v3645_v53 = vld [vmem:[#allocation6 + $0x100] sm:$0xff]  ;;  %v3664_v56 = vpack.c.bf16 %v3620_v0, %v3619_v7 }
 0x454   : > { %v3646_v61 = vld [vmem:[#allocation6 + $0x108] sm:$0xff]  ;;  %v3676_v11 = vpack.c.bf16 %v3644_v17, %v3643_v2  ;;  %v3665_v33 = vpack.c.bf16 %v3622_v14, %v3621_v5  ;;  %v3623_v45 = vld [vmem:[#allocation6 + $0x50] sm:$0xff]  ;;  %v3624_v12 = vld [vmem:[#allocation6 + $0x58] sm:$0xff] }
 0x455   : > { %4730 = vmatpush3.bf16.msra.mxu0 %v5153_v48  ;;  %4863 = vmatpush3.bf16.msra.mxu1 %v5153_v48  ;;  %v3677_v4 = vpack.c.bf16 %v3646_v61, %v3645_v53  ;;  %v3647_v6 = vld [vmem:[#allocation6 + $0x110] sm:$0xff]  ;;  %v3648_v13 = vld [vmem:[#allocation6 + $0x118] sm:$0xff]  ;;  %v3625_v31 = vld [vmem:[#allocation6 + $0x60] sm:$0xff]  ;;  %v3666_v25 = vpack.c.bf16 %v3624_v12, %v3623_v45 }
 0x456   : > { %4731 = vmatprep.subr.bf16.mxu0 %v5154_v27  ;;  %4856 = vmatprep.subr.bf16.mxu1 %v5154_v27  ;;  %v3626_v59 = vld [vmem:[#allocation6 + $0x68] sm:$0xff]  ;;  %v3649_v34 = vld [vmem:[#allocation6 + $0x120] sm:$0xff]  ;;  %v3678_v19 = vpack.c.bf16 %v3648_v13, %v3647_v6  ;;  %v3627_v29 = vld [vmem:[#allocation6 + $0x70] sm:$0xff] }
 0x457   : > { %v3650_v15 = vld [vmem:[#allocation6 + $0x128] sm:$0xff]  ;;  %v3667_v58 = vpack.c.bf16 %v3626_v59, %v3625_v31  ;;  %v3628_v3 = vld [vmem:[#allocation6 + $0x78] sm:$0xff]  ;;  %v3651_v32 = vld [vmem:[#allocation6 + $0x130] sm:$0xff] }
 0x458   : > { %v3679_v30 = vpack.c.bf16 %v3650_v15, %v3649_v34  ;;  %v3652_v42 = vld [vmem:[#allocation6 + $0x138] sm:$0xff]  ;;  %v3629_v51 = vld [vmem:[#allocation6 + $0x80] sm:$0xff]  ;;  %v3630_v38 = vld [vmem:[#allocation6 + $0x88] sm:$0xff]  ;;  %v3668_v8 = vpack.c.bf16 %v3628_v3, %v3627_v29 }
 0x459   : > { %4732 = vmatpush3.bf16.msra.mxu0 %v5154_v27  ;;  %4864 = vmatpush3.bf16.msra.mxu1 %v5154_v27  ;;  %v3653_v39 = vld [vmem:[#allocation6 + $0x140] sm:$0xff]  ;;  %v3654_v44 = vld [vmem:[#allocation6 + $0x148] sm:$0xff]  ;;  %v3680_v60 = vpack.c.bf16 %v3652_v42, %v3651_v32  ;;  %v3669_v24 = vpack.c.bf16 %v3630_v38, %v3629_v51  ;;  %v3631_v28 = vld [vmem:[#allocation6 + $0x90] sm:$0xff] }
 0x45a   : > { %4733 = vmatprep.subr.bf16.mxu0 %v5155_v37  ;;  %4857 = vmatprep.subr.bf16.mxu1 %v5155_v37  ;;  %v3681_v21 = vpack.c.bf16 %v3654_v44, %v3653_v39  ;;  %v3632_v63 = vld [vmem:[#allocation6 + $0x98] sm:$0xff]  ;;  %v3655_v46 = vld [vmem:[#allocation6 + $0x150] sm:$0xff]  ;;  %v3633_v48 = vld [vmem:[#allocation6 + $0xa0] sm:$0xff] }
 0x45b   : > { %v3656_v9 = vld [vmem:[#allocation6 + $0x158] sm:$0xff]  ;;  %v3634_v27 = vld [vmem:[#allocation6 + $0xa8] sm:$0xff]  ;;  %v3657_v57 = vld [vmem:[#allocation6 + $0x160] sm:$0xff]  ;;  %v3670_v26 = vpack.c.bf16 %v3632_v63, %v3631_v28 }
 0x45c   : > { %v3658_v18 = vld [vmem:[#allocation6 + $0x168] sm:$0xff]  ;;  %v3682_v50 = vpack.c.bf16 %v3656_v9, %v3655_v46  ;;  %v3671_v35 = vpack.c.bf16 %v3634_v27, %v3633_v48 }
 0x45d   : > { %4734 = vmatpush3.bf16.msra.mxu0 %v5155_v37  ;;  %4865 = vmatpush3.bf16.msra.mxu1 %v5155_v37  ;;  %v3683_v49 = vpack.c.bf16 %v3658_v18, %v3657_v57  ;;  %v3635_v37 = vld [vmem:[#allocation6 + $0xb0] sm:$0xff] }
 0x45e   : > { %4735 = vmatprep.subr.bf16.mxu0 %v5156_v54  ;;  %4858 = vmatprep.subr.bf16.mxu1 %v5156_v54 }
 0x461   : > { %4736 = vmatpush3.bf16.msra.mxu0 %v5156_v54  ;;  %4866 = vmatpush3.bf16.msra.mxu1 %v5156_v54  ;;  %v3636_v54 = vld [vmem:[#allocation6 + $0xb8] sm:$0xff] }
 0x462   : > { %4737 = vmatprep.subr.bf16.mxu0 %v5157_v62  ;;  %4859 = vmatprep.subr.bf16.mxu1 %v5157_v62  ;;  %v3672_v22 = vpack.c.bf16 %v3636_v54, %v3635_v37 }
 0x465   : > { %4738 = vmatpush3.bf16.msra.mxu0 %v5157_v62  ;;  %4867 = vmatpush3.bf16.msra.mxu1 %v5157_v62  ;;  %v3659_v62 = vld [vmem:[#allocation6 + $0x170] sm:$0xff] }
 0x466   : > { %4739 = vmatprep.subr.bf16.mxu0 %v5158_v23  ;;  %4860 = vmatprep.subr.bf16.mxu1 %v5158_v23 }
 0x469   : > { %4740 = vmatpush3.bf16.msra.mxu0 %v5158_v23  ;;  %4868 = vmatpush3.bf16.msra.mxu1 %v5158_v23  ;;  %v3660_v23 = vld [vmem:[#allocation6 + $0x178] sm:$0xff] }
 0x46a   : > { %v3684_v20 = vpack.c.bf16 %v3660_v23, %v3659_v62 }
 0x46c   : > { %4742 = vmatmul.mubr.bf16.vlgmr.msra.gmra.mrb[0].mxu0 %v3662_v1  ;;  %4766 = vmatmul.mubr.bf16.vlgmr.msra.gmra.mrb[0].mxu1 %v3674_v43 }
 0x46d   : > { %4745 = vmatprep.mubr.bf16.mxu0 %v3663_v41  ;;  %4769 = vmatprep.mubr.bf16.mxu1 %v3675_v10 }
 0x474   : > { %4746 = vmatmul.mubr.bf16.gmra.mrb[4].mxu0 %v3664_v56  ;;  %4770 = vmatmul.mubr.bf16.gmra.mrb[4].mxu1 %v3676_v11 }
 0x475   : > { %4749 = vmatprep.mubr.bf16.mxu0 %v3665_v33  ;;  %4773 = vmatprep.mubr.bf16.mxu1 %v3677_v4 }
 0x47c   : > { %4750 = vmatmul.mubr.bf16.gmra.mrb[8].mxu0 %v3666_v25  ;;  %4774 = vmatmul.mubr.bf16.gmra.mrb[8].mxu1 %v3678_v19 }
 0x47d   : > { %4753 = vmatprep.mubr.bf16.mxu0 %v3667_v58  ;;  %4777 = vmatprep.mubr.bf16.mxu1 %v3679_v30 }
 0x484   : > { %4754 = vmatmul.mubr.bf16.gmra.mrb[12].mxu0 %v3668_v8  ;;  %4778 = vmatmul.mubr.bf16.gmra.mrb[12].mxu1 %v3680_v60 }
 0x485   : > { %4757 = vmatprep.mubr.bf16.mxu0 %v3669_v24  ;;  %4781 = vmatprep.mubr.bf16.mxu1 %v3681_v21 }
 0x48c   : > { %4758 = vmatmul.mubr.bf16.gmra.mrb[16].mxu0 %v3670_v26  ;;  %4782 = vmatmul.mubr.bf16.gmra.mrb[16].mxu1 %v3682_v50 }
 0x48d   : > { %4761 = vmatprep.mubr.bf16.mxu0 %v3671_v35  ;;  %4785 = vmatprep.mubr.bf16.mxu1 %v3683_v49 }
 0x494   : > { %4762 = vmatmul.mubr.bf16.gmra.mrb[20].mxu0 %v3672_v22  ;;  %4786 = vmatmul.mubr.bf16.gmra.mrb[20].mxu1 %v3684_v20 }
 0x53f   : > { %v4743_v52 = vpop.f32.mrb[0].mxu0  ;;  %v4767_v36 = vpop.f32.mrb[0].mxu1 }
 0x540   : > { %vm3976_vm0 = vcmp.gt.f32.partialorder %v4743_v52, 0.0  ;;  %v4024_v40 = vmul.f32 0.01, %v4743_v52  ;;  %vm4000_vm1 = vcmp.gt.f32.partialorder %v4767_v36, 0.0  ;;  %v4048_v47 = vmul.f32 0.01, %v4767_v36 }
 0x541   : > { %v3783_v16 = vpop.f32.mrb[1].mxu0  ;;  %v3879_v55 = vpop.f32.mrb[1].mxu1 }
 0x542   : > { %v4072_v1 = vsel %vm3976_vm0, %v4743_v52, %v4024_v40  ;;  %v4096_v43 = vsel %vm4000_vm1, %v4767_v36, %v4048_v47  ;;  %vm3974_vm2 = vcmp.gt.f32.partialorder %v3783_v16, 0.0  ;;  %v4022_v41 = vmul.f32 0.01, %v3783_v16  ;;  %v4744_v10 = vpop.f32.mrb[2].mxu0  ;;  %v4768_v7 = vpop.f32.mrb[2].mxu1 }
 0x543   : > { %4120 = vst [vmem:[#allocation15 + $0x10] sm:$0xff] %v4072_v1  ;;  %4144 = vst [vmem:[#allocation15 + $0xd0] sm:$0xff] %v4096_v43  ;;  %vm3998_vm3 = vcmp.gt.f32.partialorder %v3879_v55, 0.0  ;;  %v4046_v0 = vmul.f32 0.01, %v3879_v55  ;;  %vm3977_vm4 = vcmp.gt.f32.partialorder %v4744_v10, 0.0 }
 0x544   : > { %v4025_v2 = vmul.f32 0.01, %v4744_v10  ;;  %v4070_v17 = vsel %vm3974_vm2, %v3783_v16, %v4022_v41  ;;  %vm4001_vm5 = vcmp.gt.f32.partialorder %v4768_v7, 0.0  ;;  %v4049_v5 = vmul.f32 0.01, %v4768_v7  ;;  %v3786_v14 = vpop.f32.mrb[3].mxu0 }
 0x545   : > { %v3882_v53 = vpop.f32.mrb[3].mxu1  ;;  %4118 = vst [vmem:[#allocation15] sm:$0xff] %v4070_v17  ;;  %v4094_v61 = vsel %vm3998_vm3, %v3879_v55, %v4046_v0  ;;  %vm3975_vm6 = vcmp.gt.f32.partialorder %v3786_v14, 0.0  ;;  %v4023_v11 = vmul.f32 0.01, %v3786_v14 }
 0x546   : > { %v4073_v56 = vsel %vm3977_vm4, %v4744_v10, %v4025_v2  ;;  %4142 = vst [vmem:[#allocation15 + $0xc0] sm:$0xff] %v4094_v61  ;;  %v4097_v33 = vsel %vm4001_vm5, %v4768_v7, %v4049_v5  ;;  %vm3999_vm7 = vcmp.gt.f32.partialorder %v3882_v53, 0.0  ;;  %v4047_v4 = vmul.f32 0.01, %v3882_v53 }
 0x547   : > { %4121 = vst [vmem:[#allocation15 + $0x18] sm:$0xff] %v4073_v56  ;;  %4145 = vst [vmem:[#allocation15 + $0xd8] sm:$0xff] %v4097_v33  ;;  %v4071_v45 = vsel %vm3975_vm6, %v3786_v14, %v4023_v11  ;;  %v4747_v12 = vpop.f32.mrb[4].mxu0  ;;  %v4771_v6 = vpop.f32.mrb[4].mxu1 }
 0x548   : > { %4119 = vst [vmem:[#allocation15 + $0x8] sm:$0xff] %v4071_v45  ;;  %v4095_v13 = vsel %vm3999_vm7, %v3882_v53, %v4047_v4  ;;  %vm3980_vm8 = vcmp.gt.f32.partialorder %v4747_v12, 0.0  ;;  %v4028_v31 = vmul.f32 0.01, %v4747_v12  ;;  %vm4004_vm9 = vcmp.gt.f32.partialorder %v4771_v6, 0.0  ;;  %v3799_v59 = vpop.f32.mrb[5].mxu0 }
 0x549   : > { %v3895_v34 = vpop.f32.mrb[5].mxu1  ;;  %4143 = vst [vmem:[#allocation15 + $0xc8] sm:$0xff] %v4095_v13  ;;  %v4052_v15 = vmul.f32 0.01, %v4771_v6  ;;  %vm3978_vm10 = vcmp.gt.f32.partialorder %v3799_v59, 0.0  ;;  %v4748_v30 = vpop.f32.mrb[6].mxu0 }
 0x54a   : > { %v4026_v25 = vmul.f32 0.01, %v3799_v59  ;;  %vm4002_vm11 = vcmp.gt.f32.partialorder %v3895_v34, 0.0  ;;  %v4076_v19 = vsel %vm3980_vm8, %v4747_v12, %v4028_v31  ;;  %v4050_v58 = vmul.f32 0.01, %v3895_v34  ;;  %v4772_v29 = vpop.f32.mrb[6].mxu1 }
 0x54b   : > { %4124 = vst [vmem:[#allocation15 + $0x30] sm:$0xff] %v4076_v19  ;;  %v4100_v3 = vsel %vm4004_vm9, %v4771_v6, %v4052_v15  ;;  %vm3981_vm12 = vcmp.gt.f32.partialorder %v4748_v30, 0.0  ;;  %v4029_v42 = vmul.f32 0.01, %v4748_v30  ;;  %v3802_v51 = vpop.f32.mrb[7].mxu0  ;;  %v3898_v38 = vpop.f32.mrb[7].mxu1 }
 0x54c   : > { %v4074_v32 = vsel %vm3978_vm10, %v3799_v59, %v4026_v25  ;;  %4148 = vst [vmem:[#allocation15 + $0xf0] sm:$0xff] %v4100_v3  ;;  %v4098_v39 = vsel %vm4002_vm11, %v3895_v34, %v4050_v58  ;;  %vm4005_vm13 = vcmp.gt.f32.partialorder %v4772_v29, 0.0  ;;  %v4053_v44 = vmul.f32 0.01, %v4772_v29 }
 0x54d   : > { %4122 = vst [vmem:[#allocation15 + $0x20] sm:$0xff] %v4074_v32  ;;  %vm3979_vm14 = vcmp.gt.f32.partialorder %v3802_v51, 0.0  ;;  %4146 = vst [vmem:[#allocation15 + $0xe0] sm:$0xff] %v4098_v39  ;;  %v4077_v8 = vsel %vm3981_vm12, %v4748_v30, %v4029_v42  ;;  %v4027_v60 = vmul.f32 0.01, %v3802_v51  ;;  %vm4003_vm15 = vcmp.gt.f32.partialorder %v3898_v38, 0.0 }
 0x54e   : > { %v4051_v24 = vmul.f32 0.01, %v3898_v38  ;;  %4125 = vst [vmem:[#allocation15 + $0x38] sm:$0xff] %v4077_v8  ;;  %v4101_v21 = vsel %vm4005_vm13, %v4772_v29, %v4053_v44 }
 0x54f   : > { %4149 = vst [vmem:[#allocation15 + $0xf8] sm:$0xff] %v4101_v21  ;;  %v4075_v28 = vsel %vm3979_vm14, %v3802_v51, %v4027_v60  ;;  %v4751_v46 = vpop.f32.mrb[8].mxu0  ;;  %v4775_v9 = vpop.f32.mrb[8].mxu1 }
 0x550   : > { %v4099_v63 = vsel %vm4003_vm15, %v3898_v38, %v4051_v24  ;;  %4123 = vst [vmem:[#allocation15 + $0x28] sm:$0xff] %v4075_v28  ;;  %vm3984_vm0 = vcmp.gt.f32.partialorder %v4751_v46, 0.0  ;;  %v4032_v48 = vmul.f32 0.01, %v4751_v46  ;;  %vm4008_vm1 = vcmp.gt.f32.partialorder %v4775_v9, 0.0  ;;  %v3815_v57 = vpop.f32.mrb[9].mxu0 }
 0x551   : > { %4147 = vst [vmem:[#allocation15 + $0xe8] sm:$0xff] %v4099_v63  ;;  %v4056_v27 = vmul.f32 0.01, %v4775_v9  ;;  %v3911_v18 = vpop.f32.mrb[9].mxu1  ;;  %vm3982_vm2 = vcmp.gt.f32.partialorder %v3815_v57, 0.0  ;;  %v4752_v49 = vpop.f32.mrb[10].mxu0 }
 0x552   : > { %v4080_v26 = vsel %vm3984_vm0, %v4751_v46, %v4032_v48  ;;  %v4030_v35 = vmul.f32 0.01, %v3815_v57  ;;  %v4776_v37 = vpop.f32.mrb[10].mxu1  ;;  %vm4006_vm3 = vcmp.gt.f32.partialorder %v3911_v18, 0.0  ;;  %v4054_v54 = vmul.f32 0.01, %v3911_v18 }
 0x553   : > { %v4104_v50 = vsel %vm4008_vm1, %v4775_v9, %v4056_v27  ;;  %4128 = vst [vmem:[#allocation15 + $0x50] sm:$0xff] %v4080_v26  ;;  %vm3985_vm4 = vcmp.gt.f32.partialorder %v4752_v49, 0.0  ;;  %v4033_v62 = vmul.f32 0.01, %v4752_v49  ;;  %vm4009_vm5 = vcmp.gt.f32.partialorder %v4776_v37, 0.0  ;;  %v3818_v20 = vpop.f32.mrb[11].mxu0 }
 0x554   : > { %4152 = vst [vmem:[#allocation15 + $0x110] sm:$0xff] %v4104_v50  ;;  %v4078_v23 = vsel %vm3982_vm2, %v3815_v57, %v4030_v35  ;;  %v4057_v22 = vmul.f32 0.01, %v4776_v37  ;;  %v3914_v52 = vpop.f32.mrb[11].mxu1  ;;  %v4102_v36 = vsel %vm4006_vm3, %v3911_v18, %v4054_v54  ;;  %vm3983_vm6 = vcmp.gt.f32.partialorder %v3818_v20, 0.0 }
 0x555   : > { %4126 = vst [vmem:[#allocation15 + $0x40] sm:$0xff] %v4078_v23  ;;  %v4081_v40 = vsel %vm3985_vm4, %v4752_v49, %v4033_v62  ;;  %v4031_v47 = vmul.f32 0.01, %v3818_v20  ;;  %4150 = vst [vmem:[#allocation15 + $0x100] sm:$0xff] %v4102_v36  ;;  %vm4007_vm7 = vcmp.gt.f32.partialorder %v3914_v52, 0.0 }
 0x556   : > { %4129 = vst [vmem:[#allocation15 + $0x58] sm:$0xff] %v4081_v40  ;;  %v4105_v16 = vsel %vm4009_vm5, %v4776_v37, %v4057_v22  ;;  %v4055_v55 = vmul.f32 0.01, %v3914_v52 }
 0x557   : > { %4153 = vst [vmem:[#allocation15 + $0x118] sm:$0xff] %v4105_v16  ;;  %v4079_v1 = vsel %vm3983_vm6, %v3818_v20, %v4031_v47  ;;  %v4755_v43 = vpop.f32.mrb[12].mxu0  ;;  %v4779_v41 = vpop.f32.mrb[12].mxu1 }
 0x558   : > { %4127 = vst [vmem:[#allocation15 + $0x48] sm:$0xff] %v4079_v1  ;;  %v4103_v10 = vsel %vm4007_vm7, %v3914_v52, %v4055_v55  ;;  %vm3988_vm8 = vcmp.gt.f32.partialorder %v4755_v43, 0.0  ;;  %v4036_v7 = vmul.f32 0.01, %v4755_v43  ;;  %vm4012_vm9 = vcmp.gt.f32.partialorder %v4779_v41, 0.0  ;;  %v3831_v0 = vpop.f32.mrb[13].mxu0 }
 0x559   : > { %v3927_v2 = vpop.f32.mrb[13].mxu1  ;;  %4151 = vst [vmem:[#allocation15 + $0x108] sm:$0xff] %v4103_v10  ;;  %v4060_v17 = vmul.f32 0.01, %v4779_v41  ;;  %vm3986_vm10 = vcmp.gt.f32.partialorder %v3831_v0, 0.0  ;;  %v4756_v61 = vpop.f32.mrb[14].mxu0 }
 0x55a   : > { %v4034_v5 = vmul.f32 0.01, %v3831_v0  ;;  %vm4010_vm11 = vcmp.gt.f32.partialorder %v3927_v2, 0.0  ;;  %v4084_v14 = vsel %vm3988_vm8, %v4755_v43, %v4036_v7  ;;  %v4058_v53 = vmul.f32 0.01, %v3927_v2  ;;  %v4780_v56 = vpop.f32.mrb[14].mxu1 }
 0x55b   : > { %4132 = vst [vmem:[#allocation15 + $0x70] sm:$0xff] %v4084_v14  ;;  %v4108_v11 = vsel %vm4012_vm9, %v4779_v41, %v4060_v17  ;;  %vm3989_vm12 = vcmp.gt.f32.partialorder %v4756_v61, 0.0  ;;  %v4037_v4 = vmul.f32 0.01, %v4756_v61  ;;  %v3834_v45 = vpop.f32.mrb[15].mxu0  ;;  %v3930_v12 = vpop.f32.mrb[15].mxu1 }
 0x55c   : > { %v4082_v33 = vsel %vm3986_vm10, %v3831_v0, %v4034_v5  ;;  %4156 = vst [vmem:[#allocation15 + $0x130] sm:$0xff] %v4108_v11  ;;  %v4106_v6 = vsel %vm4010_vm11, %v3927_v2, %v4058_v53  ;;  %vm4013_vm13 = vcmp.gt.f32.partialorder %v4780_v56, 0.0  ;;  %v4061_v13 = vmul.f32 0.01, %v4780_v56 }
 0x55d   : > { %4130 = vst [vmem:[#allocation15 + $0x60] sm:$0xff] %v4082_v33  ;;  %vm3987_vm14 = vcmp.gt.f32.partialorder %v3834_v45, 0.0  ;;  %4154 = vst [vmem:[#allocation15 + $0x120] sm:$0xff] %v4106_v6  ;;  %v4085_v31 = vsel %vm3989_vm12, %v4756_v61, %v4037_v4  ;;  %v4035_v59 = vmul.f32 0.01, %v3834_v45  ;;  %vm4011_vm15 = vcmp.gt.f32.partialorder %v3930_v12, 0.0 }
 0x55e   : > { %v4059_v34 = vmul.f32 0.01, %v3930_v12  ;;  %4133 = vst [vmem:[#allocation15 + $0x78] sm:$0xff] %v4085_v31  ;;  %v4109_v15 = vsel %vm4013_vm13, %v4780_v56, %v4061_v13 }
 0x55f   : > { %4157 = vst [vmem:[#allocation15 + $0x138] sm:$0xff] %v4109_v15  ;;  %v4083_v25 = vsel %vm3987_vm14, %v3834_v45, %v4035_v59  ;;  %v4759_v58 = vpop.f32.mrb[16].mxu0  ;;  %v4783_v30 = vpop.f32.mrb[16].mxu1 }
 0x560   : > { %v4107_v19 = vsel %vm4011_vm15, %v3930_v12, %v4059_v34  ;;  %4131 = vst [vmem:[#allocation15 + $0x68] sm:$0xff] %v4083_v25  ;;  %vm3992_vm0 = vcmp.gt.f32.partialorder %v4759_v58, 0.0  ;;  %v4040_v29 = vmul.f32 0.01, %v4759_v58  ;;  %vm4016_vm1 = vcmp.gt.f32.partialorder %v4783_v30, 0.0  ;;  %v3847_v32 = vpop.f32.mrb[17].mxu0 }
 0x561   : > { %4155 = vst [vmem:[#allocation15 + $0x128] sm:$0xff] %v4107_v19  ;;  %v4064_v3 = vmul.f32 0.01, %v4783_v30  ;;  %v3943_v42 = vpop.f32.mrb[17].mxu1  ;;  %vm3990_vm2 = vcmp.gt.f32.partialorder %v3847_v32, 0.0  ;;  %v4760_v44 = vpop.f32.mrb[18].mxu0 }
 0x562   : > { %v4088_v51 = vsel %vm3992_vm0, %v4759_v58, %v4040_v29  ;;  %v4038_v39 = vmul.f32 0.01, %v3847_v32  ;;  %v4784_v8 = vpop.f32.mrb[18].mxu1  ;;  %vm4014_vm3 = vcmp.gt.f32.partialorder %v3943_v42, 0.0  ;;  %v4062_v60 = vmul.f32 0.01, %v3943_v42 }
 0x563   : > { %v4112_v38 = vsel %vm4016_vm1, %v4783_v30, %v4064_v3  ;;  %4136 = vst [vmem:[#allocation15 + $0x90] sm:$0xff] %v4088_v51  ;;  %vm3993_vm4 = vcmp.gt.f32.partialorder %v4760_v44, 0.0  ;;  %v4041_v24 = vmul.f32 0.01, %v4760_v44  ;;  %vm4017_vm5 = vcmp.gt.f32.partialorder %v4784_v8, 0.0  ;;  %v3850_v63 = vpop.f32.mrb[19].mxu0 }
 0x564   : > { %4160 = vst [vmem:[#allocation15 + $0x150] sm:$0xff] %v4112_v38  ;;  %v4086_v21 = vsel %vm3990_vm2, %v3847_v32, %v4038_v39  ;;  %v4065_v28 = vmul.f32 0.01, %v4784_v8  ;;  %v3946_v46 = vpop.f32.mrb[19].mxu1  ;;  %v4110_v9 = vsel %vm4014_vm3, %v3943_v42, %v4062_v60  ;;  %vm3991_vm6 = vcmp.gt.f32.partialorder %v3850_v63, 0.0 }
 0x565   : > { %4134 = vst [vmem:[#allocation15 + $0x80] sm:$0xff] %v4086_v21  ;;  %v4089_v48 = vsel %vm3993_vm4, %v4760_v44, %v4041_v24  ;;  %v4039_v27 = vmul.f32 0.01, %v3850_v63  ;;  %4158 = vst [vmem:[#allocation15 + $0x140] sm:$0xff] %v4110_v9  ;;  %vm4015_vm7 = vcmp.gt.f32.partialorder %v3946_v46, 0.0 }
 0x566   : > { %4137 = vst [vmem:[#allocation15 + $0x98] sm:$0xff] %v4089_v48  ;;  %v4113_v57 = vsel %vm4017_vm5, %v4784_v8, %v4065_v28  ;;  %v4063_v18 = vmul.f32 0.01, %v3946_v46 }
 0x567   : > { %4161 = vst [vmem:[#allocation15 + $0x158] sm:$0xff] %v4113_v57  ;;  %v4087_v26 = vsel %vm3991_vm6, %v3850_v63, %v4039_v27  ;;  %v4763_v50 = vpop.f32.mrb[20].mxu0  ;;  %v4787_v35 = vpop.f32.mrb[20].mxu1 }
 0x568   : > { %4135 = vst [vmem:[#allocation15 + $0x88] sm:$0xff] %v4087_v26  ;;  %v4111_v49 = vsel %vm4015_vm7, %v3946_v46, %v4063_v18  ;;  %vm3996_vm8 = vcmp.gt.f32.partialorder %v4763_v50, 0.0  ;;  %v4044_v37 = vmul.f32 0.01, %v4763_v50  ;;  %vm4020_vm9 = vcmp.gt.f32.partialorder %v4787_v35, 0.0  ;;  %v3863_v54 = vpop.f32.mrb[21].mxu0 }
 0x569   : > { %v3959_v62 = vpop.f32.mrb[21].mxu1  ;;  %4159 = vst [vmem:[#allocation15 + $0x148] sm:$0xff] %v4111_v49  ;;  %v4068_v23 = vmul.f32 0.01, %v4787_v35  ;;  %vm3994_vm10 = vcmp.gt.f32.partialorder %v3863_v54, 0.0  ;;  %v4764_v36 = vpop.f32.mrb[22].mxu0 }
 0x56a   : > { %v4042_v22 = vmul.f32 0.01, %v3863_v54  ;;  %vm4018_vm11 = vcmp.gt.f32.partialorder %v3959_v62, 0.0  ;;  %v4092_v20 = vsel %vm3996_vm8, %v4763_v50, %v4044_v37  ;;  %v4066_v52 = vmul.f32 0.01, %v3959_v62  ;;  %v4788_v40 = vpop.f32.mrb[22].mxu1 }
 0x56b   : > { %4140 = vst [vmem:[#allocation15 + $0xb0] sm:$0xff] %v4092_v20  ;;  %v4116_v47 = vsel %vm4020_vm9, %v4787_v35, %v4068_v23  ;;  %vm3997_vm12 = vcmp.gt.f32.partialorder %v4764_v36, 0.0  ;;  %v4045_v55 = vmul.f32 0.01, %v4764_v36  ;;  %v3866_v1 = vpop.f32.mrb[23].mxu0  ;;  %v3962_v43 = vpop.f32.mrb[23].mxu1 }
 0x56c   : > { %v4090_v16 = vsel %vm3994_vm10, %v3863_v54, %v4042_v22  ;;  %4164 = vst [vmem:[#allocation15 + $0x170] sm:$0xff] %v4116_v47  ;;  %v4114_v41 = vsel %vm4018_vm11, %v3959_v62, %v4066_v52  ;;  %vm4021_vm13 = vcmp.gt.f32.partialorder %v4788_v40, 0.0  ;;  %v4069_v10 = vmul.f32 0.01, %v4788_v40 }
 0x56d   : > { %4138 = vst [vmem:[#allocation15 + $0xa0] sm:$0xff] %v4090_v16  ;;  %vm3995_vm14 = vcmp.gt.f32.partialorder %v3866_v1, 0.0  ;;  %4162 = vst [vmem:[#allocation15 + $0x160] sm:$0xff] %v4114_v41  ;;  %v4093_v7 = vsel %vm3997_vm12, %v4764_v36, %v4045_v55  ;;  %v4043_v0 = vmul.f32 0.01, %v3866_v1  ;;  %vm4019_vm15 = vcmp.gt.f32.partialorder %v3962_v43, 0.0 }
 0x56e   : > { %v4067_v2 = vmul.f32 0.01, %v3962_v43  ;;  %4141 = vst [vmem:[#allocation15 + $0xb8] sm:$0xff] %v4093_v7  ;;  %v4117_v17 = vsel %vm4021_vm13, %v4788_v40, %v4069_v10 }
 0x56f   : > { %4165 = vst [vmem:[#allocation15 + $0x178] sm:$0xff] %v4117_v17  ;;  %v4091_v5 = vsel %vm3995_vm14, %v3866_v1, %v4043_v0 }
 0x570   : > { %v4115_v14 = vsel %vm4019_vm15, %v3962_v43, %v4067_v2  ;;  %4139 = vst [vmem:[#allocation15 + $0xa8] sm:$0xff] %v4091_v5 }
 0x571   : > { %4163 = vst [vmem:[#allocation15 + $0x168] sm:$0xff] %v4115_v14 }
 0x572 PF: > { %p4916_p4 = scmp.eq.s32.totalorder %s5383_s20, 3  ;;  %s5339_s15 = smov [#allocation15]  }
 0x573   : > { %s4182_s6 = sshll.u32 %s5339_s15, 4  ;;  %s4183_s6 = int_to_ptr.vmem [resolvable:$true] %s4182_s6 }
 0x574   : > { %s5256_s11 = scalar_lea.vmem %s4183_s6, 6144  ;;  %s5262_s12 = scalar_lea.vmem %s4183_s6, 12288 }
 0x575   : > { %p5257_p13 = scmp.ne.s32.totalorder %s4183_s6, %s5256_s11  ;;  %p5263_p3 = scmp.lt.s32.totalorder %s4183_s6, %s4183_s6 }
 0x576   : > { %p5264_p8 = scmp.lt.s32.totalorder %s5262_s12, %s5256_s11 }
 0x577   : > { %p5258_p6 = pnand %p5257_p13, %p4916_p4 }
 0x578   : > { %p5265_p9 = por %p5264_p8, %p5263_p3 }
 0x579   : > { %p5259_p2 = pneg %p5258_p6 }
 0x57b   : > { %p5266_p10 = pnand %p5265_p9, %p5259_p2 }
 0x57d   : > { %5269 = shalt.err (!%p5266_p10)
}
 0x57e   : > { %s5270_s18 = scalar_lea.hbm %s6358_s4, 6144 }
 0x57f   : > { %p5271_p12 = scmp.ne.s32.totalorder %s6358_s4, %s5270_s18  ;;  %p5276_p11 = scmp.lt.u32.totalorder %s5270_s18, %s6358_s4 }
 0x581   : > { %p5272_p7 = pnand %p5271_p12, %p4916_p4 }
 0x583   : > { %p5273_p5 = pneg %p5272_p7 }
 0x585   : > { %p5278_p0 = pnand %p5276_p11, %p5273_p5 }
 0x587   : > { %5281 = shalt.err (!%p5278_p0)
}
 0x588   : > { %s5340_s22 = smov 128   ;;  %s5341_s19 = smov 8  }
 0x589   : > { %4886 = dma.vmem_to_hbm [thread:$0]  (%p4916_p4), %s4183_s6, 6144, %s6358_s4, [#allocation9], %s5340_s22, %s5340_s22, %s5341_s19  }
 0x58a PF: > { %p4917_p1 = scmp.ge.s32.totalorder %s5324_s17, 2  ;;  %p4918_p13 = scmp.eq.s32.totalorder %s4327_s21, 3 }
 0x58c   : > { %p4904_p6 = pnand %p4918_p13, %p4917_p1 }
 0x58e   : > { %5311 = dma.done.wait (!%p4904_p6), [#allocation9], 6144  }
 0x58f   : > { %5313 = vsyncadd (!%p4904_p6), [#allocation9], 4294961152  ;;  %s22_s17 = sadd.s32 1, %s5324_s17   ;;  %s6375_s15 = smov %s5320_s16 }
 0x590   : > { %p19_p2 = scmp.ge.s32.totalorder %s22_s17, 6   ;;  %s6376_s16 = smov %s6378_s24 }
 0x592   :  { %21 = sbr.rel (!%p19_p2) target bundleno = 7 (0x7), region = 126 }
 0x599   :  { %4203 = vsyncpa [#allocation8], 1 }
 0x59a   :  { %4205 = vsyncpa [#allocation8 + $0x1], 1 }
 0x59b   :  { %4206 = vsyncpa [#allocation13], 1 }
 0x59c   :  { %4208 = vsyncpa [#allocation13 + $0x1], 1 }
 0x59d   :  { %4209 = vsyncpa [#allocation9], 1 }
 0x59e   :  { %4211 = vsyncpa [#allocation9 + $0x1], 1 }
 0x59f   :  { %4212 = vsyncpa [#allocation10], 1 }
 0x5a0   :  { %4214 = vsyncpa [#allocation10 + $0x1], 1 }

</bundles_post_ra>
